<compile_context>
chip_gen: v7x
topology: tpu7x:2x2x1
jax: 0.10.0
libtpu: 0.0.40
codegen_flags: <defaults>
</compile_context>

<pallas_src>
import math
import functools

import jax
import jax.numpy as jnp
from jax.experimental import pallas as pl
from jax.experimental.pallas import tpu as pltpu


_INV_SQRT2 = 0.7071067811865476


def _cparams(n_axes=1):
    return pltpu.CompilerParams(dimension_semantics=("parallel",) * n_axes)


def _pick_tm(M):
    """M-tile for the linear kernels.  Tiny M (<= 512) -> one block (per-step
    pipeline overhead dominates any split); large M -> biggest divisor <= 512."""
    if M <= 512 or M % 8 != 0:
        return M
    for tm in (512, 256, 128, 64, 32, 16, 8):
        if M % tm == 0:
            return tm
    return M


# ----------------------------------------------------------------------------
# In-kernel helpers (operate on loaded VMEM values, all shapes static)
# ----------------------------------------------------------------------------

def _circ_unfold3(x):
    """x: (L, C) -> (L, 3C) columns [x[t-1], x[t], x[t+1]] with circular wrap.
    Tap j of the (3C, Cout) weight corresponds to PyTorch conv weight[:, :, j].T
    (circular padding=1, so tap 0 <-> t-1, tap 1 <-> t, tap 2 <-> t+1)."""
    xm1 = jnp.concatenate([x[-1:, :], x[:-1, :]], axis=0)
    xp1 = jnp.concatenate([x[1:, :], x[:1, :]], axis=0)
    return jnp.concatenate([xm1, x, xp1], axis=1)


def _moving_avg_decomp(s, k):
    """series_decomp of s: (L, D), AvgPool1d(k, stride=1) with edge replication
    done in-kernel (k assumed odd, as in the reference configs).
    Note: for large k (e.g. the default 25) a roll / prefix-sum formulation
    would be cheaper; at k=5 the unrolled shifted-add is fine."""
    L, D = s.shape
    half = (k - 1) // 2
    acc = s
    for off in range(1, half + 1):
        front = jnp.broadcast_to(s[0:1, :], (off, D))
        back = jnp.broadcast_to(s[L - 1:L, :], (off, D))
        acc = acc + jnp.concatenate([front, s[:L - off, :]], axis=0)  # x[t-off]
        acc = acc + jnp.concatenate([s[off:, :], back], axis=0)       # x[t+off]
    trend = acc * (1.0 / k)
    return s - trend, trend


def _gelu(h):
    return 0.5 * h * (1.0 + jax.lax.erf(h * _INV_SQRT2))              # exact gelu


def _ffn(x, w1_ref, w2_ref):
    h = jnp.dot(x.astype(jnp.bfloat16), w1_ref[...],
                preferred_element_type=jnp.float32)
    h = _gelu(h)
    return jnp.dot(h.astype(jnp.bfloat16), w2_ref[...],
                   preferred_element_type=jnp.float32)


def _my_layernorm(x, g, b):
    mu = jnp.mean(x, axis=-1, keepdims=True)
    var = jnp.mean((x - mu) ** 2, axis=-1, keepdims=True)
    x_hat = (x - mu) * jax.lax.rsqrt(var + 1e-5) * g + b
    return x_hat - jnp.mean(x_hat, axis=0, keepdims=True)


# ----------------------------------------------------------------------------
# Pallas kernels
# ----------------------------------------------------------------------------

def _linear_kernel(x_ref, w_ref, b_ref, o_ref):
    # o = x @ w + b   (f32 activations -> bf16 MXU operands, f32 accumulation)
    o_ref[...] = jnp.dot(x_ref[...].astype(jnp.bfloat16), w_ref[...],
                         preferred_element_type=jnp.float32) + b_ref[...]


def _embedding_kernel(x_ref, m_ref, w_ref, o_ref):
    # DataEmbedding_wo_pos: circular k=3 token conv (bias=False) + timeF linear
    # (bias=False), merged into ONE matmul with the stacked weight.
    xu = jnp.concatenate([_circ_unfold3(x_ref[0]), m_ref[0]],
                         axis=1).astype(jnp.bfloat16)                  # (L, 3Cin+Cm)
    o_ref[0] = jnp.dot(xu, w_ref[...], preferred_element_type=jnp.float32)


def _attn_agg_out_kernel(idx_ref, corr_ref, v_ref, wo_ref, bo_ref, o_ref, *, top_k):
    # time_delay_agg_training + out_projection, fused.
    #   out[t] = (sum_i w[b,i] * V[(t + idx[i]) % L]) @ Wo + bo
    # The per-batch (L,L) aggregation matrix is built in VMEM from the SMEM
    # scalars (never materialized in HBM) and consumed immediately.
    b = pl.program_id(0)
    L = v_ref.shape[1]
    t = jax.lax.broadcasted_iota(jnp.int32, (L, L), 0)
    s = jax.lax.broadcasted_iota(jnp.int32, (L, L), 1)
    diff = s - t                                     # in [-(L-1), L-1]
    a = jnp.zeros((L, L), jnp.float32)
    for i in range(top_k):
        d = idx_ref[i]                               # int32 scalar (SMEM)
        w = corr_ref[b, i]                           # f32 scalar (SMEM)
        hit = jnp.logical_or(diff == d, diff == d - L)   # (s - t) % L == d
        a = a + jnp.where(hit, w, 0.0)
    agg = jnp.dot(a, v_ref[0], preferred_element_type=jnp.float32)     # f32 A@V
    o_ref[0] = jnp.dot(agg.astype(jnp.bfloat16), wo_ref[...],
                       preferred_element_type=jnp.float32) + bo_ref[...]


def _decomp_kernel(x_ref, sea_ref, trend_ref, *, k):
    sea, trend = _moving_avg_decomp(x_ref[0], k)
    sea_ref[0] = sea
    trend_ref[0] = trend


def _decomp_add_kernel(x_ref, y_ref, sea_ref, trend_ref, *, k):
    # fused residual add + series_decomp (decoder, post self-attention)
    sea, trend = _moving_avg_decomp(x_ref[0] + y_ref[0], k)
    sea_ref[0] = sea
    trend_ref[0] = trend


def _enc_layer_tail_kernel(x_ref, a_ref, w1_ref, w2_ref, o_ref, *, k):
    # EncoderLayer minus attention, fully fused:
    #   x1 = decomp(x + attn); y = conv2(gelu(conv1(x1))); out = decomp(x1 + y)
    x1, _ = _moving_avg_decomp(x_ref[0] + a_ref[0], k)
    y = _ffn(x1, w1_ref, w2_ref)
    x2, _ = _moving_avg_decomp(x1 + y, k)
    o_ref[0] = x2


def _dec_layer_tail_kernel(x_ref, ca_ref, t1_ref, trend_ref, w1_ref, w2_ref,
                           wt_ref, o_ref, trend_o_ref, *, k):
    # DecoderLayer tail, fully fused:
    #   x2, t2 = decomp(x1 + cross_attn)
    #   y      = conv2(gelu(conv1(x2)))
    #   x3, t3 = decomp(x2 + y)
    #   trend_out = trend_in + CircularConv3(t1 + t2 + t3)
    x2, t2 = _moving_avg_decomp(x_ref[0] + ca_ref[0], k)
    y = _ffn(x2, w1_ref, w2_ref)
    x3, t3 = _moving_avg_decomp(x2 + y, k)
    rt = t1_ref[0] + t2 + t3                                         # (L, D)
    rtu = _circ_unfold3(rt).astype(jnp.bfloat16)                     # (L, 3D)
    proj = jnp.dot(rtu, wt_ref[...], preferred_element_type=jnp.float32)
    o_ref[0] = x3
    trend_o_ref[0] = trend_ref[0] + proj


def _my_layernorm_kernel(x_ref, g_ref, b_ref, o_ref):
    # my_Layernorm: LayerNorm over channels, then subtract the time-mean
    o_ref[0] = _my_layernorm(x_ref[0], g_ref[...], b_ref[...])


def _dec_final_kernel(x_ref, trend_ref, g_ref, b_ref, w_ref, bias_ref, o_ref,
                      *, pred_len):
    # fused decoder tail: my_Layernorm -> Linear(d_model, c_out) -> + trend
    # -> keep only the last pred_len steps (single lane-sparse write)
    xn = _my_layernorm(x_ref[0], g_ref[...], b_ref[...])
    sea = jnp.dot(xn.astype(jnp.bfloat16), w_ref[...],
                  preferred_element_type=jnp.float32) + bias_ref[...]
    out = trend_ref[0] + sea
    o_ref[0] = out[-pred_len:, :]


# ----------------------------------------------------------------------------
# Pallas wrappers
# ----------------------------------------------------------------------------

def pallas_linear(x, w, b):
    """x: (..., K) @ w(bf16): (K, N) + b -> (..., N) f32."""
    orig = x.shape
    K = orig[-1]
    M = int(math.prod(orig[:-1]))
    N = w.shape[1]
    x2 = x.reshape(M, K)
    b2 = b.reshape(1, N)
    TM = _pick_tm(M)
    out = pl.pallas_call(
        _linear_kernel,
        grid=(M // TM,),
        in_specs=[pl.BlockSpec((TM, K), lambda i: (i, 0)),
                  pl.BlockSpec((K, N), lambda i: (0, 0)),
                  pl.BlockSpec((1, N), lambda i: (0, 0))],
        out_specs=pl.BlockSpec((TM, N), lambda i: (i, 0)),
        out_shape=jax.ShapeDtypeStruct((M, N), jnp.float32),
        compiler_params=_cparams(),
    )(x2, w, b2)
    return out.reshape(*orig[:-1], N)


def data_embedding(p, x, x_mark):
    """TokenEmbedding (circular conv k=3) + TimeFeatureEmbedding, one matmul."""
    B, L, Cin = x.shape
    Cm = x_mark.shape[-1]
    w = p['emb_w']                                   # (3*Cin + Cm, D) bf16
    D = w.shape[1]
    return pl.pallas_call(
        _embedding_kernel,
        grid=(B,),
        in_specs=[pl.BlockSpec((1, L, Cin), lambda b: (b, 0, 0)),
                  pl.BlockSpec((1, L, Cm), lambda b: (b, 0, 0)),
                  pl.BlockSpec((3 * Cin + Cm, D), lambda b: (0, 0))],
        out_specs=pl.BlockSpec((1, L, D), lambda b: (b, 0, 0)),
        out_shape=jax.ShapeDtypeStruct((B, L, D), jnp.float32),
        compiler_params=_cparams(),
    )(x, x_mark, w)


def pallas_attn_out(index, tmp_corr, v2, wo, bo):
    """out[b] = TimeDelayAgg(v2[b]; index, tmp_corr[b]) @ wo + bo."""
    B, L, D = v2.shape
    top_k = index.shape[0]
    return pl.pallas_call(
        functools.partial(_attn_agg_out_kernel, top_k=top_k),
        grid=(B,),
        in_specs=[pl.BlockSpec(memory_space=pltpu.MemorySpace.SMEM),   # (top_k,) i32
                  pl.BlockSpec(memory_space=pltpu.MemorySpace.SMEM),   # (B, top_k) f32
                  pl.BlockSpec((1, L, D), lambda b: (b, 0, 0)),
                  pl.BlockSpec((D, D), lambda b: (0, 0)),
                  pl.BlockSpec((1, D), lambda b: (0, 0))],
        out_specs=pl.BlockSpec((1, L, D), lambda b: (b, 0, 0)),
        out_shape=jax.ShapeDtypeStruct((B, L, D), jnp.float32),
        compiler_params=_cparams(),
    )(index, tmp_corr, v2, wo, bo.reshape(1, D))


def series_decomp(x, k):
    B, L, D = x.shape
    spec = pl.BlockSpec((1, L, D), lambda b: (b, 0, 0))
    shape = jax.ShapeDtypeStruct((B, L, D), jnp.float32)
    return pl.pallas_call(
        functools.partial(_decomp_kernel, k=k),
        grid=(B,),
        in_specs=[spec],
        out_specs=(spec, spec),
        out_shape=(shape, shape),
        compiler_params=_cparams(),
    )(x)


def series_decomp_add(x, y, k):
    B, L, D = x.shape
    spec = pl.BlockSpec((1, L, D), lambda b: (b, 0, 0))
    shape = jax.ShapeDtypeStruct((B, L, D), jnp.float32)
    return pl.pallas_call(
        functools.partial(_decomp_add_kernel, k=k),
        grid=(B,),
        in_specs=[spec, spec],
        out_specs=(spec, spec),
        out_shape=(shape, shape),
        compiler_params=_cparams(),
    )(x, y)


def enc_layer_tail(x, attn_out, w1, w2, k):
    B, L, D = x.shape
    d_ff = w1.shape[1]
    spec = pl.BlockSpec((1, L, D), lambda b: (b, 0, 0))
    return pl.pallas_call(
        functools.partial(_enc_layer_tail_kernel, k=k),
        grid=(B,),
        in_specs=[spec, spec,
                  pl.BlockSpec((D, d_ff), lambda b: (0, 0)),
                  pl.BlockSpec((d_ff, D), lambda b: (0, 0))],
        out_specs=spec,
        out_shape=jax.ShapeDtypeStruct((B, L, D), jnp.float32),
        compiler_params=_cparams(),
    )(x, attn_out, w1, w2)


def dec_layer_tail(x1, ca, t1, trend, w1, w2, wt, k):
    B, L, D = x1.shape
    d_ff = w1.shape[1]
    c_out = wt.shape[1]
    dspec = pl.BlockSpec((1, L, D), lambda b: (b, 0, 0))
    cspec = pl.BlockSpec((1, L, c_out), lambda b: (b, 0, 0))
    return pl.pallas_call(
        functools.partial(_dec_layer_tail_kernel, k=k),
        grid=(B,),
        in_specs=[dspec, dspec, dspec, cspec,
                  pl.BlockSpec((D, d_ff), lambda b: (0, 0)),
                  pl.BlockSpec((d_ff, D), lambda b: (0, 0)),
                  pl.BlockSpec((3 * D, c_out), lambda b: (0, 0))],
        out_specs=(dspec, cspec),
        out_shape=(jax.ShapeDtypeStruct((B, L, D), jnp.float32),
                   jax.ShapeDtypeStruct((B, L, c_out), jnp.float32)),
        compiler_params=_cparams(),
    )(x1, ca, t1, trend, w1, w2, wt)


def my_layernorm(x, g, b):
    B, L, D = x.shape
    return pl.pallas_call(
        _my_layernorm_kernel,
        grid=(B,),
        in_specs=[pl.BlockSpec((1, L, D), lambda i: (i, 0, 0)),
                  pl.BlockSpec((1, D), lambda i: (0, 0)),
                  pl.BlockSpec((1, D), lambda i: (0, 0))],
        out_specs=pl.BlockSpec((1, L, D), lambda i: (i, 0, 0)),
        out_shape=jax.ShapeDtypeStruct((B, L, D), jnp.float32),
        compiler_params=_cparams(),
    )(x, g.reshape(1, D), b.reshape(1, D))


def dec_final(x, trend, g, b, w, bias, pred_len):
    B, L, D = x.shape
    c_out = w.shape[1]
    return pl.pallas_call(
        functools.partial(_dec_final_kernel, pred_len=pred_len),
        grid=(B,),
        in_specs=[pl.BlockSpec((1, L, D), lambda i: (i, 0, 0)),
                  pl.BlockSpec((1, L, c_out), lambda i: (i, 0, 0)),
                  pl.BlockSpec((1, D), lambda i: (0, 0)),
                  pl.BlockSpec((1, D), lambda i: (0, 0)),
                  pl.BlockSpec((D, c_out), lambda i: (0, 0)),
                  pl.BlockSpec((1, c_out), lambda i: (0, 0))],
        out_specs=pl.BlockSpec((1, pred_len, c_out), lambda i: (i, 0, 0)),
        out_shape=jax.ShapeDtypeStruct((B, pred_len, c_out), jnp.float32),
        compiler_params=_cparams(),
    )(x, trend, g.reshape(1, D), b.reshape(1, D), w, bias.reshape(1, c_out))


# ----------------------------------------------------------------------------
# Auto-correlation (FFT / top-k / softmax stay in JAX; aggregation is in-kernel)
# ----------------------------------------------------------------------------

def auto_correlation(q, k, v, factor, output_attention):
    """Returns (index (top_k,), tmp_corr (B, top_k), v2 (B, L, H*E), attn).
    The time_delay_agg_training roll-and-accumulate is performed inside the
    Pallas attention-output kernel from these SMEM scalars (single pass over V,
    no (B,L,L) HBM materialization)."""
    B, L, H, E = q.shape
    S = v.shape[1]
    if L > S:
        z = jnp.zeros((B, L - S, H, E), q.dtype)
        v = jnp.concatenate([v, z], axis=1)
        k = jnp.concatenate([k, z], axis=1)
    else:
        v = v[:, :L]
        k = k[:, :L]

    qp = jnp.transpose(q, (0, 2, 3, 1))              # (B, H, E, L)
    kp = jnp.transpose(k, (0, 2, 3, 1))
    # TODO(synk): FFT has no Pallas TPU equivalent; jnp.fft runs through XLA.
    res = jnp.fft.rfft(qp, axis=-1) * jnp.conj(jnp.fft.rfft(kp, axis=-1))
    corr = jnp.fft.irfft(res, n=L, axis=-1)          # (B, H, E, L)

    # time_delay_agg_training path (module default training mode)
    top_k = int(factor * math.log(L))
    mean_value = jnp.mean(jnp.mean(corr, axis=1), axis=1)            # (B, L)
    index = jax.lax.top_k(jnp.mean(mean_value, axis=0), top_k)[1]    # (top_k,) int32
    weights = mean_value[:, index]                                   # (B, top_k)
    tmp_corr = jax.nn.softmax(weights, axis=-1)

    v2 = v.reshape(B, L, H * E)
    attn = jnp.transpose(corr, (0, 3, 1, 2)) if output_attention else None
    return index, tmp_corr, v2, attn


def attention_layer_self(p, x, cfg, output_attention):
    B, L, D = x.shape
    H = cfg['n_heads']
    qkv = pallas_linear(x, p['wqkv'], p['bqkv'])     # fused Q/K/V projection
    q = qkv[..., :D].reshape(B, L, H, -1)
    k = qkv[..., D:2 * D].reshape(B, L, H, -1)
    v = qkv[..., 2 * D:].reshape(B, L, H, -1)
    index, tmp_corr, v2, attn = auto_correlation(q, k, v, cfg['factor'],
                                                 output_attention)
    out = pallas_attn_out(index, tmp_corr, v2, p['wo'], p['bo'])
    return out, attn


def attention_layer_cross(p, x, cross, cfg):
    B, L, D = x.shape
    S = cross.shape[1]
    H = cfg['n_heads']
    q = pallas_linear(x, p['wq'], p['bq']).reshape(B, L, H, -1)
    kv = pallas_linear(cross, p['wkv'], p['bkv'])    # fused K/V projection
    k = kv[..., :D].reshape(B, S, H, -1)
    v = kv[..., D:].reshape(B, S, H, -1)
    index, tmp_corr, v2, _ = auto_correlation(q, k, v, cfg['factor'], False)
    out = pallas_attn_out(index, tmp_corr, v2, p['wo'], p['bo'])
    return out


# ----------------------------------------------------------------------------
# Encoder / Decoder / top-level forward
# ----------------------------------------------------------------------------

def encoder_layer(p, x, cfg):
    new_x, attn = attention_layer_self(p['attn'], x, cfg, output_attention=True)
    x = enc_layer_tail(x, new_x, p['w1'], p['w2'], cfg['moving_avg'])
    return x, attn


def encoder(p, x, cfg):
    attns = []
    for lp in p['layers']:
        x, attn = encoder_layer(lp, x, cfg)
        attns.append(attn)
    x = my_layernorm(x, p['norm_g'], p['norm_b'])
    return x, attns


def decoder_layer(p, x, cross, trend, cfg):
    sa, _ = attention_layer_self(p['self_attn'], x, cfg, output_attention=False)
    x1, t1 = series_decomp_add(x, sa, cfg['moving_avg'])
    ca = attention_layer_cross(p['cross_attn'], x1, cross, cfg)
    x_out, trend_out = dec_layer_tail(x1, ca, t1, trend, p['w1'], p['w2'],
                                      p['trend_proj_w'], cfg['moving_avg'])
    return x_out, trend_out


def decoder(p, x, cross, trend, cfg):
    for lp in p['layers']:
        x, trend = decoder_layer(lp, x, cross, trend, cfg)
    return x, trend


def autoformer_forward(params, x_enc, x_mark_enc, x_dec, x_mark_dec, cfg):
    B = x_enc.shape[0]
    pred_len, label_len = cfg['pred_len'], cfg['label_len']

    mean = jnp.mean(x_enc, axis=1, keepdims=True)
    mean = jnp.broadcast_to(mean, (B, pred_len, x_enc.shape[2]))
    zeros = jnp.zeros((x_dec.shape[0], pred_len, x_dec.shape[2]), x_enc.dtype)

    seasonal_init, trend_init = series_decomp(x_enc, cfg['moving_avg'])
    trend_init = jnp.concatenate([trend_init[:, -label_len:, :], mean], axis=1)
    seasonal_init = jnp.concatenate([seasonal_init[:, -label_len:, :], zeros], axis=1)

    enc_out = data_embedding(params['enc_emb'], x_enc, x_mark_enc)
    enc_out, attns = encoder(params['encoder'], enc_out, cfg)

    dec_out = data_embedding(params['dec_emb'], seasonal_init, x_mark_dec)
    seasonal_x, trend_x = decoder(params['decoder'], dec_out, enc_out,
                                  trend_init, cfg)
    dp = params['decoder']
    out = dec_final(seasonal_x, trend_x, dp['norm_g'], dp['norm_b'],
                    dp['proj_w'], dp['proj_b'], pred_len)
    return out, attns


# ----------------------------------------------------------------------------
# Deterministic parameter initialization (shapes follow the nn.Module __init__)
# MXU-feeding weights are stored pre-cast to bf16 (one-time cast).
# ----------------------------------------------------------------------------

def init_params(key, cfg):
    d_model, d_ff = cfg['d_model'], cfg['d_ff']
    enc_in, dec_in, c_out = cfg['enc_in'], cfg['dec_in'], cfg['c_out']
    mark_dim = cfg['mark_dim']
    keys = iter(jax.random.split(key, 128))

    def w(shape, scale=0.05):                        # bf16 MXU weight
        return (scale * jax.random.normal(next(keys), shape, jnp.float32)
                ).astype(jnp.bfloat16)

    def b(shape, scale=0.05):                        # f32 bias
        return scale * jax.random.normal(next(keys), shape, jnp.float32)

    def attn_self():
        return dict(wqkv=w((d_model, 3 * d_model)), bqkv=b((3 * d_model,)),
                    wo=w((d_model, d_model)), bo=b((d_model,)))

    def attn_cross():
        return dict(wq=w((d_model, d_model)), bq=b((d_model,)),
                    wkv=w((d_model, 2 * d_model)), bkv=b((2 * d_model,)),
                    wo=w((d_model, d_model)), bo=b((d_model,)))

    enc_layers = [dict(attn=attn_self(),
                       w1=w((d_model, d_ff)), w2=w((d_ff, d_model)))
                  for _ in range(cfg['e_layers'])]
    dec_layers = [dict(self_attn=attn_self(), cross_attn=attn_cross(),
                       w1=w((d_model, d_ff)), w2=w((d_ff, d_model)),
                       trend_proj_w=w((3 * d_model, c_out)))
                  for _ in range(cfg['d_layers'])]

    return dict(
        enc_emb=dict(emb_w=w((3 * enc_in + mark_dim, d_model))),
        dec_emb=dict(emb_w=w((3 * dec_in + mark_dim, d_model))),
        encoder=dict(layers=enc_layers,
                     norm_g=jnp.ones((d_model,), jnp.float32),
                     norm_b=jnp.zeros((d_model,), jnp.float32)),
        decoder=dict(layers=dec_layers,
                     norm_g=jnp.ones((d_model,), jnp.float32),
                     norm_b=jnp.zeros((d_model,), jnp.float32),
                     proj_w=w((d_model, c_out)), proj_b=b((c_out,))),
    )


# ----------------------------------------------------------------------------
if __name__ == "__main__":
    cfg = dict(enc_in=4, dec_in=4, c_out=4,
               seq_len=16, label_len=8, pred_len=8,
               d_model=128, d_ff=256, n_heads=4,    # lane-dense channels
               e_layers=2, d_layers=1,
               factor=1, moving_avg=5,              # odd moving-average kernel
               mark_dim=4)                          # freq='h' -> 4 time features

    key = jax.random.PRNGKey(0)
    kp, k1, k2, k3, k4 = jax.random.split(key, 5)
    params = init_params(kp, cfg)

    B = 2
    dec_len = cfg['label_len'] + cfg['pred_len']
    x_enc = jax.random.normal(k1, (B, cfg['seq_len'], cfg['enc_in']), jnp.float32)
    x_mark_enc = jax.random.normal(k2, (B, cfg['seq_len'], cfg['mark_dim']), jnp.float32)
    x_dec = jax.random.normal(k3, (B, dec_len, cfg['dec_in']), jnp.float32)
    x_mark_dec = jax.random.normal(k4, (B, dec_len, cfg['mark_dim']), jnp.float32)

    fwd = jax.jit(functools.partial(autoformer_forward, cfg=cfg))
    out, attns = fwd(params, x_enc, x_mark_enc, x_dec, x_mark_dec)
    jax.block_until_ready(out)
    jax.block_until_ready(attns)

    assert out.shape == (B, cfg['pred_len'], cfg['c_out'])
    assert len(attns) == cfg['e_layers']
    assert all(a.shape == (B, cfg['seq_len'], cfg['n_heads'],
                           cfg['d_model'] // cfg['n_heads']) for a in attns)
    print("KERNEL_OK")
</pallas_src>

<mosaic_0001>
module attributes {stable_mosaic.version = 11 : i64} {
  func.func @_decomp_kernel(%arg0: i32, %arg1: memref<1x16x4xf32, #tpu.memory_space<vmem>>, %arg2: memref<1x16x4xf32, #tpu.memory_space<vmem>>, %arg3: memref<1x16x4xf32, #tpu.memory_space<vmem>>) attributes {dimension_semantics = [#tpu.dimension_semantics<parallel>], iteration_bounds = array<i64: 2>, scalar_prefetch = 0 : i64, scratch_operands = 0 : i64, tpu.core_type = #tpu.core_type<tc>, window_params = [{transform_indices = @transform_0, window_bounds = array<i64: 1, 16, 4>}, {transform_indices = @transform_1, window_bounds = array<i64: 1, 16, 4>}, {transform_indices = @transform_2, window_bounds = array<i64: 1, 16, 4>}]} {
    %c0 = arith.constant 0 : index
    %c0_0 = arith.constant 0 : index
    %c0_1 = arith.constant 0 : index
    %0 = vector.load %arg1[%c0, %c0_0, %c0_1] : memref<1x16x4xf32, #tpu.memory_space<vmem>>, vector<1x16x4xf32>
    %1 = vector.shape_cast %0 : vector<1x16x4xf32> to vector<16x4xf32>
    %2 = vector.extract_strided_slice %1 {offsets = [0, 0], sizes = [1, 4], strides = [1, 1]} : vector<16x4xf32> to vector<1x4xf32>
    %3 = vector.extract_strided_slice %1 {offsets = [15, 0], sizes = [1, 4], strides = [1, 1]} : vector<16x4xf32> to vector<1x4xf32>
    %4 = vector.extract_strided_slice %1 {offsets = [0, 0], sizes = [15, 4], strides = [1, 1]} : vector<16x4xf32> to vector<15x4xf32>
    %5 = tpu.concatenate %2, %4 in 0 : vector<1x4xf32>, vector<15x4xf32> -> vector<16x4xf32>
    %6 = arith.addf %1, %5 : vector<16x4xf32>
    %7 = vector.extract_strided_slice %1 {offsets = [1, 0], sizes = [15, 4], strides = [1, 1]} : vector<16x4xf32> to vector<15x4xf32>
    %8 = tpu.concatenate %7, %3 in 0 : vector<15x4xf32>, vector<1x4xf32> -> vector<16x4xf32>
    %9 = arith.addf %6, %8 : vector<16x4xf32>
    %10 = vector.extract_strided_slice %1 {offsets = [0, 0], sizes = [1, 4], strides = [1, 1]} : vector<16x4xf32> to vector<1x4xf32>
    %11 = vector.shape_cast %10 : vector<1x4xf32> to vector<1x4xf32>
    %12 = vector.broadcast %11 : vector<1x4xf32> to vector<2x4xf32>
    %13 = vector.extract_strided_slice %1 {offsets = [15, 0], sizes = [1, 4], strides = [1, 1]} : vector<16x4xf32> to vector<1x4xf32>
    %14 = vector.shape_cast %13 : vector<1x4xf32> to vector<1x4xf32>
    %15 = vector.broadcast %14 : vector<1x4xf32> to vector<2x4xf32>
    %16 = vector.extract_strided_slice %1 {offsets = [0, 0], sizes = [14, 4], strides = [1, 1]} : vector<16x4xf32> to vector<14x4xf32>
    %17 = tpu.concatenate %12, %16 in 0 : vector<2x4xf32>, vector<14x4xf32> -> vector<16x4xf32>
    %18 = arith.addf %9, %17 : vector<16x4xf32>
    %19 = vector.extract_strided_slice %1 {offsets = [2, 0], sizes = [14, 4], strides = [1, 1]} : vector<16x4xf32> to vector<14x4xf32>
    %20 = tpu.concatenate %19, %15 in 0 : vector<14x4xf32>, vector<2x4xf32> -> vector<16x4xf32>
    %21 = arith.addf %18, %20 : vector<16x4xf32>
    %cst = arith.constant 2.000000e-01 : f32
    %22 = vector.broadcast %cst : f32 to vector<16x4xf32>
    %23 = arith.mulf %21, %22 : vector<16x4xf32>
    %24 = arith.subf %1, %23 : vector<16x4xf32>
    %c0_2 = arith.constant 0 : index
    %c0_3 = arith.constant 0 : index
    %c0_4 = arith.constant 0 : index
    %25 = vector.load %arg2[%c0_2, %c0_3, %c0_4] : memref<1x16x4xf32, #tpu.memory_space<vmem>>, vector<1x16x4xf32>
    %26 = vector.shape_cast %25 : vector<1x16x4xf32> to vector<16x4xf32>
    %27 = vector.shape_cast %24 : vector<16x4xf32> to vector<1x16x4xf32>
    tpu.vector_store %arg2[%c0_2, %c0_3, %c0_4], %27 {strides = array<i32>} : memref<1x16x4xf32, #tpu.memory_space<vmem>>, vector<1x16x4xf32>,
    %c0_5 = arith.constant 0 : index
    %c0_6 = arith.constant 0 : index
    %c0_7 = arith.constant 0 : index
    %28 = vector.load %arg3[%c0_5, %c0_6, %c0_7] : memref<1x16x4xf32, #tpu.memory_space<vmem>>, vector<1x16x4xf32>
    %29 = vector.shape_cast %28 : vector<1x16x4xf32> to vector<16x4xf32>
    %30 = vector.shape_cast %23 : vector<16x4xf32> to vector<1x16x4xf32>
    tpu.vector_store %arg3[%c0_5, %c0_6, %c0_7], %30 {strides = array<i32>} : memref<1x16x4xf32, #tpu.memory_space<vmem>>, vector<1x16x4xf32>,
    return
  }
  func.func @transform_0(%arg0: i32) -> (i32, i32, i32) {
    %c0_i32 = arith.constant 0 : i32
    %c0_i32_0 = arith.constant 0 : i32
    %c0_i32_1 = arith.constant 0 : i32
    return %arg0, %c0_i32, %c0_i32_0 : i32, i32, i32
  }
  func.func @transform_1(%arg0: i32) -> (i32, i32, i32) {
    %c0_i32 = arith.constant 0 : i32
    %c0_i32_0 = arith.constant 0 : i32
    %c0_i32_1 = arith.constant 0 : i32
    return %arg0, %c0_i32, %c0_i32_0 : i32, i32, i32
  }
  func.func @transform_2(%arg0: i32) -> (i32, i32, i32) {
    %c0_i32 = arith.constant 0 : i32
    %c0_i32_0 = arith.constant 0 : i32
    %c0_i32_1 = arith.constant 0 : i32
    return %arg0, %c0_i32, %c0_i32_0 : i32, i32, i32
  }
}

module attributes {stable_mosaic.version = 11 : i64} {
  func.func @_embedding_kernel(%arg0: i32, %arg1: memref<1x16x4xf32, #tpu.memory_space<vmem>>, %arg2: memref<1x16x4xf32, #tpu.memory_space<vmem>>, %arg3: memref<16x128xbf16, #tpu.memory_space<vmem>>, %arg4: memref<1x16x128xf32, #tpu.memory_space<vmem>>) attributes {dimension_semantics = [#tpu.dimension_semantics<parallel>], iteration_bounds = array<i64: 2>, scalar_prefetch = 0 : i64, scratch_operands = 0 : i64, tpu.core_type = #tpu.core_type<tc>, window_params = [{transform_indices = @transform_0, window_bounds = array<i64: 1, 16, 4>}, {transform_indices = @transform_1, window_bounds = array<i64: 1, 16, 4>}, {pipeline_mode = #tpu.pipeline_mode<synchronous>, transform_indices = @transform_2, window_bounds = array<i64: 16, 128>}, {transform_indices = @transform_3, window_bounds = array<i64: 1, 16, 128>}]} {
    %c0 = arith.constant 0 : index
    %c0_0 = arith.constant 0 : index
    %c0_1 = arith.constant 0 : index
    %0 = vector.load %arg1[%c0, %c0_0, %c0_1] : memref<1x16x4xf32, #tpu.memory_space<vmem>>, vector<1x16x4xf32>
    %1 = vector.shape_cast %0 : vector<1x16x4xf32> to vector<16x4xf32>
    %2 = vector.extract_strided_slice %1 {offsets = [15, 0], sizes = [1, 4], strides = [1, 1]} : vector<16x4xf32> to vector<1x4xf32>
    %3 = vector.extract_strided_slice %1 {offsets = [0, 0], sizes = [15, 4], strides = [1, 1]} : vector<16x4xf32> to vector<15x4xf32>
    %4 = tpu.concatenate %2, %3 in 0 : vector<1x4xf32>, vector<15x4xf32> -> vector<16x4xf32>
    %5 = vector.extract_strided_slice %1 {offsets = [1, 0], sizes = [15, 4], strides = [1, 1]} : vector<16x4xf32> to vector<15x4xf32>
    %6 = vector.extract_strided_slice %1 {offsets = [0, 0], sizes = [1, 4], strides = [1, 1]} : vector<16x4xf32> to vector<1x4xf32>
    %7 = tpu.concatenate %5, %6 in 0 : vector<15x4xf32>, vector<1x4xf32> -> vector<16x4xf32>
    %8 = tpu.concatenate %4, %1, %7 in 1 : vector<16x4xf32>, vector<16x4xf32>, vector<16x4xf32> -> vector<16x12xf32>
    %c0_2 = arith.constant 0 : index
    %c0_3 = arith.constant 0 : index
    %c0_4 = arith.constant 0 : index
    %9 = vector.load %arg2[%c0_2, %c0_3, %c0_4] : memref<1x16x4xf32, #tpu.memory_space<vmem>>, vector<1x16x4xf32>
    %10 = vector.shape_cast %9 : vector<1x16x4xf32> to vector<16x4xf32>
    %11 = tpu.concatenate %8, %10 in 1 : vector<16x12xf32>, vector<16x4xf32> -> vector<16x16xf32>
    %12 = arith.truncf %11 : vector<16x16xf32> to vector<16x16xbf16>
    %c0_5 = arith.constant 0 : index
    %c0_6 = arith.constant 0 : index
    %13 = vector.load %arg3[%c0_5, %c0_6] : memref<16x128xbf16, #tpu.memory_space<vmem>>, vector<16x128xbf16>
    %cst = arith.constant dense<0.000000e+00> : vector<16x128xf32>
    %14 = tpu.matmul %12, %13, %cst {dimension_numbers = #tpu.dot_dimension_numbers<[1], [0], [0], [1], [0, 0, 1, 1], [], []>} : vector<16x16xbf16>, vector<16x128xbf16>, vector<16x128xf32> -> vector<16x128xf32>
    %c0_7 = arith.constant 0 : index
    %c0_8 = arith.constant 0 : index
    %c0_9 = arith.constant 0 : index
    %15 = vector.load %arg4[%c0_7, %c0_8, %c0_9] : memref<1x16x128xf32, #tpu.memory_space<vmem>>, vector<1x16x128xf32>
    %16 = vector.shape_cast %15 : vector<1x16x128xf32> to vector<16x128xf32>
    %17 = vector.shape_cast %14 : vector<16x128xf32> to vector<1x16x128xf32>
    tpu.vector_store %arg4[%c0_7, %c0_8, %c0_9], %17 {strides = array<i32>} : memref<1x16x128xf32, #tpu.memory_space<vmem>>, vector<1x16x128xf32>,
    return
  }
  func.func @transform_0(%arg0: i32) -> (i32, i32, i32) {
    %c0_i32 = arith.constant 0 : i32
    %c0_i32_0 = arith.constant 0 : i32
    %c0_i32_1 = arith.constant 0 : i32
    return %arg0, %c0_i32, %c0_i32_0 : i32, i32, i32
  }
  func.func @transform_1(%arg0: i32) -> (i32, i32, i32) {
    %c0_i32 = arith.constant 0 : i32
    %c0_i32_0 = arith.constant 0 : i32
    %c0_i32_1 = arith.constant 0 : i32
    return %arg0, %c0_i32, %c0_i32_0 : i32, i32, i32
  }
  func.func @transform_2(%arg0: i32) -> (i32, i32) {
    %c0_i32 = arith.constant 0 : i32
    %c0_i32_0 = arith.constant 0 : i32
    %c0_i32_1 = arith.constant 0 : i32
    return %c0_i32, %c0_i32_0 : i32, i32
  }
  func.func @transform_3(%arg0: i32) -> (i32, i32, i32) {
    %c0_i32 = arith.constant 0 : i32
    %c0_i32_0 = arith.constant 0 : i32
    %c0_i32_1 = arith.constant 0 : i32
    return %arg0, %c0_i32, %c0_i32_0 : i32, i32, i32
  }
}

module attributes {stable_mosaic.version = 11 : i64} {
  func.func @_linear_kernel(%arg0: i32, %arg1: memref<32x128xf32, #tpu.memory_space<vmem>>, %arg2: memref<128x384xbf16, #tpu.memory_space<vmem>>, %arg3: memref<1x384xf32, #tpu.memory_space<vmem>>, %arg4: memref<32x384xf32, #tpu.memory_space<vmem>>) attributes {dimension_semantics = [#tpu.dimension_semantics<parallel>], iteration_bounds = array<i64: 1>, scalar_prefetch = 0 : i64, scratch_operands = 0 : i64, tpu.core_type = #tpu.core_type<tc>, window_params = [{transform_indices = @transform_0, window_bounds = array<i64: 32, 128>}, {pipeline_mode = #tpu.pipeline_mode<synchronous>, transform_indices = @transform_1, window_bounds = array<i64: 128, 384>}, {pipeline_mode = #tpu.pipeline_mode<synchronous>, transform_indices = @transform_2, window_bounds = array<i64: 1, 384>}, {transform_indices = @transform_3, window_bounds = array<i64: 32, 384>}]} {
    %c0 = arith.constant 0 : index
    %c0_0 = arith.constant 0 : index
    %0 = vector.load %arg1[%c0, %c0_0] : memref<32x128xf32, #tpu.memory_space<vmem>>, vector<32x128xf32>
    %1 = arith.truncf %0 : vector<32x128xf32> to vector<32x128xbf16>
    %c0_1 = arith.constant 0 : index
    %c0_2 = arith.constant 0 : index
    %2 = vector.load %arg2[%c0_1, %c0_2] : memref<128x384xbf16, #tpu.memory_space<vmem>>, vector<128x384xbf16>
    %cst = arith.constant dense<0.000000e+00> : vector<32x384xf32>
    %3 = tpu.matmul %1, %2, %cst {dimension_numbers = #tpu.dot_dimension_numbers<[1], [0], [0], [1], [0, 0, 1, 1], [], []>} : vector<32x128xbf16>, vector<128x384xbf16>, vector<32x384xf32> -> vector<32x384xf32>
    %c0_3 = arith.constant 0 : index
    %c0_4 = arith.constant 0 : index
    %4 = vector.load %arg3[%c0_3, %c0_4] : memref<1x384xf32, #tpu.memory_space<vmem>>, vector<1x384xf32>
    %5 = vector.broadcast %4 : vector<1x384xf32> to vector<32x384xf32>
    %6 = arith.addf %3, %5 : vector<32x384xf32>
    %c0_5 = arith.constant 0 : index
    %c0_6 = arith.constant 0 : index
    %7 = vector.load %arg4[%c0_5, %c0_6] : memref<32x384xf32, #tpu.memory_space<vmem>>, vector<32x384xf32>
    tpu.vector_store %arg4[%c0_5, %c0_6], %6 {strides = array<i32>} : memref<32x384xf32, #tpu.memory_space<vmem>>, vector<32x384xf32>,
    return
  }
  func.func @transform_0(%arg0: i32) -> (i32, i32) {
    %c0_i32 = arith.constant 0 : i32
    %c0_i32_0 = arith.constant 0 : i32
    return %arg0, %c0_i32 : i32, i32
  }
  func.func @transform_1(%arg0: i32) -> (i32, i32) {
    %c0_i32 = arith.constant 0 : i32
    %c0_i32_0 = arith.constant 0 : i32
    %c0_i32_1 = arith.constant 0 : i32
    return %c0_i32, %c0_i32_0 : i32, i32
  }
  func.func @transform_2(%arg0: i32) -> (i32, i32) {
    %c0_i32 = arith.constant 0 : i32
    %c0_i32_0 = arith.constant 0 : i32
    %c0_i32_1 = arith.constant 0 : i32
    return %c0_i32, %c0_i32_0 : i32, i32
  }
  func.func @transform_3(%arg0: i32) -> (i32, i32) {
    %c0_i32 = arith.constant 0 : i32
    %c0_i32_0 = arith.constant 0 : i32
    return %arg0, %c0_i32 : i32, i32
  }
}

module attributes {stable_mosaic.version = 11 : i64} {
  func.func @_attn_agg_out_kernel(%arg0: i32, %arg1: memref<2xi32, #tpu.memory_space<smem>>, %arg2: memref<2x2xf32, #tpu.memory_space<smem>>, %arg3: memref<1x16x128xf32, #tpu.memory_space<vmem>>, %arg4: memref<128x128xbf16, #tpu.memory_space<vmem>>, %arg5: memref<1x128xf32, #tpu.memory_space<vmem>>, %arg6: memref<1x16x128xf32, #tpu.memory_space<vmem>>) attributes {dimension_semantics = [#tpu.dimension_semantics<parallel>], iteration_bounds = array<i64: 2>, scalar_prefetch = 0 : i64, scratch_operands = 0 : i64, tpu.core_type = #tpu.core_type<tc>, window_params = [{transform_indices = @transform_0, window_bounds = array<i64: 2>}, {transform_indices = @transform_1, window_bounds = array<i64: 2, 2>}, {transform_indices = @transform_2, window_bounds = array<i64: 1, 16, 128>}, {pipeline_mode = #tpu.pipeline_mode<synchronous>, transform_indices = @transform_3, window_bounds = array<i64: 128, 128>}, {pipeline_mode = #tpu.pipeline_mode<synchronous>, transform_indices = @transform_4, window_bounds = array<i64: 1, 128>}, {transform_indices = @transform_5, window_bounds = array<i64: 1, 16, 128>}]} {
    %0 = tpu.iota {dimensions = array<i32: 0>} : vector<16x16xi32>
    %1 = tpu.iota {dimensions = array<i32: 1>} : vector<16x16xi32>
    %2 = arith.subi %1, %0 : vector<16x16xi32>
    %cst = arith.constant 0.000000e+00 : f32
    %3 = vector.broadcast %cst : f32 to vector<16x16xf32>
    %c0 = arith.constant 0 : index
    %4 = memref.load %arg1[%c0] : memref<2xi32, #tpu.memory_space<smem>>
    %5 = arith.index_cast %arg0 : i32 to index
    %c0_0 = arith.constant 0 : index
    %6 = memref.load %arg2[%5, %c0_0] : memref<2x2xf32, #tpu.memory_space<smem>>
    %7 = vector.broadcast %4 : i32 to vector<16x16xi32>
    %8 = arith.cmpi eq, %2, %7 : vector<16x16xi32>
    %c16_i32 = arith.constant 16 : i32
    %9 = arith.subi %4, %c16_i32 : i32
    %10 = vector.broadcast %9 : i32 to vector<16x16xi32>
    %11 = arith.cmpi eq, %2, %10 : vector<16x16xi32>
    %12 = arith.ori %8, %11 : vector<16x16xi1>
    %cst_1 = arith.constant 0.000000e+00 : f32
    %13 = vector.broadcast %6 : f32 to vector<16x16xf32>
    %14 = vector.broadcast %cst_1 : f32 to vector<16x16xf32>
    %15 = arith.select %12, %13, %14 : vector<16x16xi1>, vector<16x16xf32>
    %16 = arith.addf %3, %15 : vector<16x16xf32>
    %c1 = arith.constant 1 : index
    %17 = memref.load %arg1[%c1] : memref<2xi32, #tpu.memory_space<smem>>
    %18 = arith.index_cast %arg0 : i32 to index
    %c1_2 = arith.constant 1 : index
    %19 = memref.load %arg2[%18, %c1_2] : memref<2x2xf32, #tpu.memory_space<smem>>
    %20 = vector.broadcast %17 : i32 to vector<16x16xi32>
    %21 = arith.cmpi eq, %2, %20 : vector<16x16xi32>
    %c16_i32_3 = arith.constant 16 : i32
    %22 = arith.subi %17, %c16_i32_3 : i32
    %23 = vector.broadcast %22 : i32 to vector<16x16xi32>
    %24 = arith.cmpi eq, %2, %23 : vector<16x16xi32>
    %25 = arith.ori %21, %24 : vector<16x16xi1>
    %cst_4 = arith.constant 0.000000e+00 : f32
    %26 = vector.broadcast %19 : f32 to vector<16x16xf32>
    %27 = vector.broadcast %cst_4 : f32 to vector<16x16xf32>
    %28 = arith.select %25, %26, %27 : vector<16x16xi1>, vector<16x16xf32>
    %29 = arith.addf %16, %28 : vector<16x16xf32>
    %c0_5 = arith.constant 0 : index
    %c0_6 = arith.constant 0 : index
    %c0_7 = arith.constant 0 : index
    %30 = vector.load %arg3[%c0_5, %c0_6, %c0_7] : memref<1x16x128xf32, #tpu.memory_space<vmem>>, vector<1x16x128xf32>
    %31 = vector.shape_cast %30 : vector<1x16x128xf32> to vector<16x128xf32>
    %cst_8 = arith.constant dense<0.000000e+00> : vector<16x128xf32>
    %32 = tpu.matmul %29, %31, %cst_8 {dimension_numbers = #tpu.dot_dimension_numbers<[1], [0], [0], [1], [0, 0, 1, 1], [], []>} : vector<16x16xf32>, vector<16x128xf32>, vector<16x128xf32> -> vector<16x128xf32>
    %33 = arith.truncf %32 : vector<16x128xf32> to vector<16x128xbf16>
    %c0_9 = arith.constant 0 : index
    %c0_10 = arith.constant 0 : index
    %34 = vector.load %arg4[%c0_9, %c0_10] : memref<128x128xbf16, #tpu.memory_space<vmem>>, vector<128x128xbf16>
    %cst_11 = arith.constant dense<0.000000e+00> : vector<16x128xf32>
    %35 = tpu.matmul %33, %34, %cst_11 {dimension_numbers = #tpu.dot_dimension_numbers<[1], [0], [0], [1], [0, 0, 1, 1], [], []>} : vector<16x128xbf16>, vector<128x128xbf16>, vector<16x128xf32> -> vector<16x128xf32>
    %c0_12 = arith.constant 0 : index
    %c0_13 = arith.constant 0 : index
    %36 = vector.load %arg5[%c0_12, %c0_13] : memref<1x128xf32, #tpu.memory_space<vmem>>, vector<1x128xf32>
    %37 = vector.broadcast %36 : vector<1x128xf32> to vector<16x128xf32>
    %38 = arith.addf %35, %37 : vector<16x128xf32>
    %c0_14 = arith.constant 0 : index
    %c0_15 = arith.constant 0 : index
    %c0_16 = arith.constant 0 : index
    %39 = vector.load %arg6[%c0_14, %c0_15, %c0_16] : memref<1x16x128xf32, #tpu.memory_space<vmem>>, vector<1x16x128xf32>
    %40 = vector.shape_cast %39 : vector<1x16x128xf32> to vector<16x128xf32>
    %41 = vector.shape_cast %38 : vector<16x128xf32> to vector<1x16x128xf32>
    tpu.vector_store %arg6[%c0_14, %c0_15, %c0_16], %41 {strides = array<i32>} : memref<1x16x128xf32, #tpu.memory_space<vmem>>, vector<1x16x128xf32>,
    return
  }
  func.func @transform_0(%arg0: i32) -> i32 {
    %c0_i32 = arith.constant 0 : i32
    %c0_i32_0 = arith.constant 0 : i32
    return %c0_i32 : i32
  }
  func.func @transform_1(%arg0: i32) -> (i32, i32) {
    %c0_i32 = arith.constant 0 : i32
    %c0_i32_0 = arith.constant 0 : i32
    %c0_i32_1 = arith.constant 0 : i32
    return %c0_i32, %c0_i32_0 : i32, i32
  }
  func.func @transform_2(%arg0: i32) -> (i32, i32, i32) {
    %c0_i32 = arith.constant 0 : i32
    %c0_i32_0 = arith.constant 0 : i32
    %c0_i32_1 = arith.constant 0 : i32
    return %arg0, %c0_i32, %c0_i32_0 : i32, i32, i32
  }
  func.func @transform_3(%arg0: i32) -> (i32, i32) {
    %c0_i32 = arith.constant 0 : i32
    %c0_i32_0 = arith.constant 0 : i32
    %c0_i32_1 = arith.constant 0 : i32
    return %c0_i32, %c0_i32_0 : i32, i32
  }
  func.func @transform_4(%arg0: i32) -> (i32, i32) {
    %c0_i32 = arith.constant 0 : i32
    %c0_i32_0 = arith.constant 0 : i32
    %c0_i32_1 = arith.constant 0 : i32
    return %c0_i32, %c0_i32_0 : i32, i32
  }
  func.func @transform_5(%arg0: i32) -> (i32, i32, i32) {
    %c0_i32 = arith.constant 0 : i32
    %c0_i32_0 = arith.constant 0 : i32
    %c0_i32_1 = arith.constant 0 : i32
    return %arg0, %c0_i32, %c0_i32_0 : i32, i32, i32
  }
}

module attributes {stable_mosaic.version = 11 : i64} {
  func.func @_enc_layer_tail_kernel(%arg0: i32, %arg1: memref<1x16x128xf32, #tpu.memory_space<vmem>>, %arg2: memref<1x16x128xf32, #tpu.memory_space<vmem>>, %arg3: memref<128x256xbf16, #tpu.memory_space<vmem>>, %arg4: memref<256x128xbf16, #tpu.memory_space<vmem>>, %arg5: memref<1x16x128xf32, #tpu.memory_space<vmem>>) attributes {dimension_semantics = [#tpu.dimension_semantics<parallel>], iteration_bounds = array<i64: 2>, scalar_prefetch = 0 : i64, scratch_operands = 0 : i64, tpu.core_type = #tpu.core_type<tc>, window_params = [{transform_indices = @transform_0, window_bounds = array<i64: 1, 16, 128>}, {transform_indices = @transform_1, window_bounds = array<i64: 1, 16, 128>}, {pipeline_mode = #tpu.pipeline_mode<synchronous>, transform_indices = @transform_2, window_bounds = array<i64: 128, 256>}, {pipeline_mode = #tpu.pipeline_mode<synchronous>, transform_indices = @transform_3, window_bounds = array<i64: 256, 128>}, {transform_indices = @transform_4, window_bounds = array<i64: 1, 16, 128>}]} {
    %c0 = arith.constant 0 : index
    %c0_0 = arith.constant 0 : index
    %c0_1 = arith.constant 0 : index
    %0 = vector.load %arg1[%c0, %c0_0, %c0_1] : memref<1x16x128xf32, #tpu.memory_space<vmem>>, vector<1x16x128xf32>
    %1 = vector.shape_cast %0 : vector<1x16x128xf32> to vector<16x128xf32>
    %c0_2 = arith.constant 0 : index
    %c0_3 = arith.constant 0 : index
    %c0_4 = arith.constant 0 : index
    %2 = vector.load %arg2[%c0_2, %c0_3, %c0_4] : memref<1x16x128xf32, #tpu.memory_space<vmem>>, vector<1x16x128xf32>
    %3 = vector.shape_cast %2 : vector<1x16x128xf32> to vector<16x128xf32>
    %4 = arith.addf %1, %3 : vector<16x128xf32>
    %5 = vector.extract_strided_slice %4 {offsets = [0, 0], sizes = [1, 128], strides = [1, 1]} : vector<16x128xf32> to vector<1x128xf32>
    %6 = vector.extract_strided_slice %4 {offsets = [15, 0], sizes = [1, 128], strides = [1, 1]} : vector<16x128xf32> to vector<1x128xf32>
    %7 = vector.extract_strided_slice %4 {offsets = [0, 0], sizes = [15, 128], strides = [1, 1]} : vector<16x128xf32> to vector<15x128xf32>
    %8 = tpu.concatenate %5, %7 in 0 : vector<1x128xf32>, vector<15x128xf32> -> vector<16x128xf32>
    %9 = arith.addf %4, %8 : vector<16x128xf32>
    %10 = vector.extract_strided_slice %4 {offsets = [1, 0], sizes = [15, 128], strides = [1, 1]} : vector<16x128xf32> to vector<15x128xf32>
    %11 = tpu.concatenate %10, %6 in 0 : vector<15x128xf32>, vector<1x128xf32> -> vector<16x128xf32>
    %12 = arith.addf %9, %11 : vector<16x128xf32>
    %13 = vector.extract_strided_slice %4 {offsets = [0, 0], sizes = [1, 128], strides = [1, 1]} : vector<16x128xf32> to vector<1x128xf32>
    %14 = vector.shape_cast %13 : vector<1x128xf32> to vector<1x128xf32>
    %15 = vector.broadcast %14 : vector<1x128xf32> to vector<2x128xf32>
    %16 = vector.extract_strided_slice %4 {offsets = [15, 0], sizes = [1, 128], strides = [1, 1]} : vector<16x128xf32> to vector<1x128xf32>
    %17 = vector.shape_cast %16 : vector<1x128xf32> to vector<1x128xf32>
    %18 = vector.broadcast %17 : vector<1x128xf32> to vector<2x128xf32>
    %19 = vector.extract_strided_slice %4 {offsets = [0, 0], sizes = [14, 128], strides = [1, 1]} : vector<16x128xf32> to vector<14x128xf32>
    %20 = tpu.concatenate %15, %19 in 0 : vector<2x128xf32>, vector<14x128xf32> -> vector<16x128xf32>
    %21 = arith.addf %12, %20 : vector<16x128xf32>
    %22 = vector.extract_strided_slice %4 {offsets = [2, 0], sizes = [14, 128], strides = [1, 1]} : vector<16x128xf32> to vector<14x128xf32>
    %23 = tpu.concatenate %22, %18 in 0 : vector<14x128xf32>, vector<2x128xf32> -> vector<16x128xf32>
    %24 = arith.addf %21, %23 : vector<16x128xf32>
    %cst = arith.constant 2.000000e-01 : f32
    %25 = vector.broadcast %cst : f32 to vector<16x128xf32>
    %26 = arith.mulf %24, %25 : vector<16x128xf32>
    %27 = arith.subf %4, %26 : vector<16x128xf32>
    %28 = arith.truncf %27 : vector<16x128xf32> to vector<16x128xbf16>
    %c0_5 = arith.constant 0 : index
    %c0_6 = arith.constant 0 : index
    %29 = vector.load %arg3[%c0_5, %c0_6] : memref<128x256xbf16, #tpu.memory_space<vmem>>, vector<128x256xbf16>
    %cst_7 = arith.constant dense<0.000000e+00> : vector<16x256xf32>
    %30 = tpu.matmul %28, %29, %cst_7 {dimension_numbers = #tpu.dot_dimension_numbers<[1], [0], [0], [1], [0, 0, 1, 1], [], []>} : vector<16x128xbf16>, vector<128x256xbf16>, vector<16x256xf32> -> vector<16x256xf32>
    %cst_8 = arith.constant 5.000000e-01 : f32
    %31 = vector.broadcast %cst_8 : f32 to vector<16x256xf32>
    %32 = arith.mulf %31, %30 : vector<16x256xf32>
    %cst_9 = arith.constant 0.707106769 : f32
    %33 = vector.broadcast %cst_9 : f32 to vector<16x256xf32>
    %34 = arith.mulf %30, %33 : vector<16x256xf32>
    %35 = math.erf %34 : vector<16x256xf32>
    %cst_10 = arith.constant 1.000000e+00 : f32
    %36 = vector.broadcast %cst_10 : f32 to vector<16x256xf32>
    %37 = arith.addf %36, %35 : vector<16x256xf32>
    %38 = arith.mulf %32, %37 : vector<16x256xf32>
    %39 = arith.truncf %38 : vector<16x256xf32> to vector<16x256xbf16>
    %c0_11 = arith.constant 0 : index
    %c0_12 = arith.constant 0 : index
    %40 = vector.load %arg4[%c0_11, %c0_12] : memref<256x128xbf16, #tpu.memory_space<vmem>>, vector<256x128xbf16>
    %cst_13 = arith.constant dense<0.000000e+00> : vector<16x128xf32>
    %41 = tpu.matmul %39, %40, %cst_13 {dimension_numbers = #tpu.dot_dimension_numbers<[1], [0], [0], [1], [0, 0, 1, 1], [], []>} : vector<16x256xbf16>, vector<256x128xbf16>, vector<16x128xf32> -> vector<16x128xf32>
    %42 = arith.addf %27, %41 : vector<16x128xf32>
    %43 = vector.extract_strided_slice %42 {offsets = [0, 0], sizes = [1, 128], strides = [1, 1]} : vector<16x128xf32> to vector<1x128xf32>
    %44 = vector.extract_strided_slice %42 {offsets = [15, 0], sizes = [1, 128], strides = [1, 1]} : vector<16x128xf32> to vector<1x128xf32>
    %45 = vector.extract_strided_slice %42 {offsets = [0, 0], sizes = [15, 128], strides = [1, 1]} : vector<16x128xf32> to vector<15x128xf32>
    %46 = tpu.concatenate %43, %45 in 0 : vector<1x128xf32>, vector<15x128xf32> -> vector<16x128xf32>
    %47 = arith.addf %42, %46 : vector<16x128xf32>
    %48 = vector.extract_strided_slice %42 {offsets = [1, 0], sizes = [15, 128], strides = [1, 1]} : vector<16x128xf32> to vector<15x128xf32>
    %49 = tpu.concatenate %48, %44 in 0 : vector<15x128xf32>, vector<1x128xf32> -> vector<16x128xf32>
    %50 = arith.addf %47, %49 : vector<16x128xf32>
    %51 = vector.extract_strided_slice %42 {offsets = [0, 0], sizes = [1, 128], strides = [1, 1]} : vector<16x128xf32> to vector<1x128xf32>
    %52 = vector.shape_cast %51 : vector<1x128xf32> to vector<1x128xf32>
    %53 = vector.broadcast %52 : vector<1x128xf32> to vector<2x128xf32>
    %54 = vector.extract_strided_slice %42 {offsets = [15, 0], sizes = [1, 128], strides = [1, 1]} : vector<16x128xf32> to vector<1x128xf32>
    %55 = vector.shape_cast %54 : vector<1x128xf32> to vector<1x128xf32>
    %56 = vector.broadcast %55 : vector<1x128xf32> to vector<2x128xf32>
    %57 = vector.extract_strided_slice %42 {offsets = [0, 0], sizes = [14, 128], strides = [1, 1]} : vector<16x128xf32> to vector<14x128xf32>
    %58 = tpu.concatenate %53, %57 in 0 : vector<2x128xf32>, vector<14x128xf32> -> vector<16x128xf32>
    %59 = arith.addf %50, %58 : vector<16x128xf32>
    %60 = vector.extract_strided_slice %42 {offsets = [2, 0], sizes = [14, 128], strides = [1, 1]} : vector<16x128xf32> to vector<14x128xf32>
    %61 = tpu.concatenate %60, %56 in 0 : vector<14x128xf32>, vector<2x128xf32> -> vector<16x128xf32>
    %62 = arith.addf %59, %61 : vector<16x128xf32>
    %cst_14 = arith.constant 2.000000e-01 : f32
    %63 = vector.broadcast %cst_14 : f32 to vector<16x128xf32>
    %64 = arith.mulf %62, %63 : vector<16x128xf32>
    %65 = arith.subf %42, %64 : vector<16x128xf32>
    %c0_15 = arith.constant 0 : index
    %c0_16 = arith.constant 0 : index
    %c0_17 = arith.constant 0 : index
    %66 = vector.load %arg5[%c0_15, %c0_16, %c0_17] : memref<1x16x128xf32, #tpu.memory_space<vmem>>, vector<1x16x128xf32>
    %67 = vector.shape_cast %66 : vector<1x16x128xf32> to vector<16x128xf32>
    %68 = vector.shape_cast %65 : vector<16x128xf32> to vector<1x16x128xf32>
    tpu.vector_store %arg5[%c0_15, %c0_16, %c0_17], %68 {strides = array<i32>} : memref<1x16x128xf32, #tpu.memory_space<vmem>>, vector<1x16x128xf32>,
    return
  }
  func.func @transform_0(%arg0: i32) -> (i32, i32, i32) {
    %c0_i32 = arith.constant 0 : i32
    %c0_i32_0 = arith.constant 0 : i32
    %c0_i32_1 = arith.constant 0 : i32
    return %arg0, %c0_i32, %c0_i32_0 : i32, i32, i32
  }
  func.func @transform_1(%arg0: i32) -> (i32, i32, i32) {
    %c0_i32 = arith.constant 0 : i32
    %c0_i32_0 = arith.constant 0 : i32
    %c0_i32_1 = arith.constant 0 : i32
    return %arg0, %c0_i32, %c0_i32_0 : i32, i32, i32
  }
  func.func @transform_2(%arg0: i32) -> (i32, i32) {
    %c0_i32 = arith.constant 0 : i32
    %c0_i32_0 = arith.constant 0 : i32
    %c0_i32_1 = arith.constant 0 : i32
    return %c0_i32, %c0_i32_0 : i32, i32
  }
  func.func @transform_3(%arg0: i32) -> (i32, i32) {
    %c0_i32 = arith.constant 0 : i32
    %c0_i32_0 = arith.constant 0 : i32
    %c0_i32_1 = arith.constant 0 : i32
    return %c0_i32, %c0_i32_0 : i32, i32
  }
  func.func @transform_4(%arg0: i32) -> (i32, i32, i32) {
    %c0_i32 = arith.constant 0 : i32
    %c0_i32_0 = arith.constant 0 : i32
    %c0_i32_1 = arith.constant 0 : i32
    return %arg0, %c0_i32, %c0_i32_0 : i32, i32, i32
  }
}

module attributes {stable_mosaic.version = 11 : i64} {
  func.func @_my_layernorm_kernel(%arg0: i32, %arg1: memref<1x16x128xf32, #tpu.memory_space<vmem>>, %arg2: memref<1x128xf32, #tpu.memory_space<vmem>>, %arg3: memref<1x128xf32, #tpu.memory_space<vmem>>, %arg4: memref<1x16x128xf32, #tpu.memory_space<vmem>>) attributes {dimension_semantics = [#tpu.dimension_semantics<parallel>], iteration_bounds = array<i64: 2>, scalar_prefetch = 0 : i64, scratch_operands = 0 : i64, tpu.core_type = #tpu.core_type<tc>, window_params = [{transform_indices = @transform_0, window_bounds = array<i64: 1, 16, 128>}, {pipeline_mode = #tpu.pipeline_mode<synchronous>, transform_indices = @transform_1, window_bounds = array<i64: 1, 128>}, {pipeline_mode = #tpu.pipeline_mode<synchronous>, transform_indices = @transform_2, window_bounds = array<i64: 1, 128>}, {transform_indices = @transform_3, window_bounds = array<i64: 1, 16, 128>}]} {
    %c0 = arith.constant 0 : index
    %c0_0 = arith.constant 0 : index
    %c0_1 = arith.constant 0 : index
    %0 = vector.load %arg1[%c0, %c0_0, %c0_1] : memref<1x16x128xf32, #tpu.memory_space<vmem>>, vector<1x16x128xf32>
    %1 = vector.shape_cast %0 : vector<1x16x128xf32> to vector<16x128xf32>
    %c0_2 = arith.constant 0 : index
    %c0_3 = arith.constant 0 : index
    %2 = vector.load %arg2[%c0_2, %c0_3] : memref<1x128xf32, #tpu.memory_space<vmem>>, vector<1x128xf32>
    %c0_4 = arith.constant 0 : index
    %c0_5 = arith.constant 0 : index
    %3 = vector.load %arg3[%c0_4, %c0_5] : memref<1x128xf32, #tpu.memory_space<vmem>>, vector<1x128xf32>
    %cst = arith.constant dense<0.000000e+00> : vector<16xf32>
    %4 = vector.multi_reduction <add>, %1, %cst [1] : vector<16x128xf32> to vector<16xf32>
    %5 = vector.shape_cast %4 : vector<16xf32> to vector<16x1xf32>
    %cst_6 = arith.constant 1.280000e+02 : f32
    %6 = vector.broadcast %cst_6 : f32 to vector<16x1xf32>
    %7 = arith.divf %5, %6 : vector<16x1xf32>
    %8 = vector.broadcast %7 : vector<16x1xf32> to vector<16x128xf32>
    %9 = arith.subf %1, %8 : vector<16x128xf32>
    %10 = arith.mulf %9, %9 : vector<16x128xf32>
    %cst_7 = arith.constant dense<0.000000e+00> : vector<16xf32>
    %11 = vector.multi_reduction <add>, %10, %cst_7 [1] : vector<16x128xf32> to vector<16xf32>
    %12 = vector.shape_cast %11 : vector<16xf32> to vector<16x1xf32>
    %cst_8 = arith.constant 1.280000e+02 : f32
    %13 = vector.broadcast %cst_8 : f32 to vector<16x1xf32>
    %14 = arith.divf %12, %13 : vector<16x1xf32>
    %15 = vector.broadcast %7 : vector<16x1xf32> to vector<16x128xf32>
    %16 = arith.subf %1, %15 : vector<16x128xf32>
    %cst_9 = arith.constant 9.99999974E-6 : f32
    %17 = vector.broadcast %cst_9 : f32 to vector<16x1xf32>
    %18 = arith.addf %14, %17 : vector<16x1xf32>
    %19 = math.rsqrt %18 : vector<16x1xf32>
    %20 = vector.broadcast %19 : vector<16x1xf32> to vector<16x128xf32>
    %21 = arith.mulf %16, %20 : vector<16x128xf32>
    %22 = vector.broadcast %2 : vector<1x128xf32> to vector<16x128xf32>
    %23 = arith.mulf %21, %22 : vector<16x128xf32>
    %24 = vector.broadcast %3 : vector<1x128xf32> to vector<16x128xf32>
    %25 = arith.addf %23, %24 : vector<16x128xf32>
    %cst_10 = arith.constant dense<0.000000e+00> : vector<128xf32>
    %26 = vector.multi_reduction <add>, %25, %cst_10 [0] : vector<16x128xf32> to vector<128xf32>
    %27 = vector.shape_cast %26 : vector<128xf32> to vector<1x128xf32>
    %cst_11 = arith.constant 1.600000e+01 : f32
    %28 = vector.broadcast %cst_11 : f32 to vector<1x128xf32>
    %29 = arith.divf %27, %28 : vector<1x128xf32>
    %30 = vector.broadcast %29 : vector<1x128xf32> to vector<16x128xf32>
    %31 = arith.subf %25, %30 : vector<16x128xf32>
    %c0_12 = arith.constant 0 : index
    %c0_13 = arith.constant 0 : index
    %c0_14 = arith.constant 0 : index
    %32 = vector.load %arg4[%c0_12, %c0_13, %c0_14] : memref<1x16x128xf32, #tpu.memory_space<vmem>>, vector<1x16x128xf32>
    %33 = vector.shape_cast %32 : vector<1x16x128xf32> to vector<16x128xf32>
    %34 = vector.shape_cast %31 : vector<16x128xf32> to vector<1x16x128xf32>
    tpu.vector_store %arg4[%c0_12, %c0_13, %c0_14], %34 {strides = array<i32>} : memref<1x16x128xf32, #tpu.memory_space<vmem>>, vector<1x16x128xf32>,
    return
  }
  func.func @transform_0(%arg0: i32) -> (i32, i32, i32) {
    %c0_i32 = arith.constant 0 : i32
    %c0_i32_0 = arith.constant 0 : i32
    %c0_i32_1 = arith.constant 0 : i32
    return %arg0, %c0_i32, %c0_i32_0 : i32, i32, i32
  }
  func.func @transform_1(%arg0: i32) -> (i32, i32) {
    %c0_i32 = arith.constant 0 : i32
    %c0_i32_0 = arith.constant 0 : i32
    %c0_i32_1 = arith.constant 0 : i32
    return %c0_i32, %c0_i32_0 : i32, i32
  }
  func.func @transform_2(%arg0: i32) -> (i32, i32) {
    %c0_i32 = arith.constant 0 : i32
    %c0_i32_0 = arith.constant 0 : i32
    %c0_i32_1 = arith.constant 0 : i32
    return %c0_i32, %c0_i32_0 : i32, i32
  }
  func.func @transform_3(%arg0: i32) -> (i32, i32, i32) {
    %c0_i32 = arith.constant 0 : i32
    %c0_i32_0 = arith.constant 0 : i32
    %c0_i32_1 = arith.constant 0 : i32
    return %arg0, %c0_i32, %c0_i32_0 : i32, i32, i32
  }
}

module attributes {stable_mosaic.version = 11 : i64} {
  func.func @_linear_kernel(%arg0: i32, %arg1: memref<32x128xf32, #tpu.memory_space<vmem>>, %arg2: memref<128x256xbf16, #tpu.memory_space<vmem>>, %arg3: memref<1x256xf32, #tpu.memory_space<vmem>>, %arg4: memref<32x256xf32, #tpu.memory_space<vmem>>) attributes {dimension_semantics = [#tpu.dimension_semantics<parallel>], iteration_bounds = array<i64: 1>, scalar_prefetch = 0 : i64, scratch_operands = 0 : i64, tpu.core_type = #tpu.core_type<tc>, window_params = [{transform_indices = @transform_0, window_bounds = array<i64: 32, 128>}, {pipeline_mode = #tpu.pipeline_mode<synchronous>, transform_indices = @transform_1, window_bounds = array<i64: 128, 256>}, {pipeline_mode = #tpu.pipeline_mode<synchronous>, transform_indices = @transform_2, window_bounds = array<i64: 1, 256>}, {transform_indices = @transform_3, window_bounds = array<i64: 32, 256>}]} {
    %c0 = arith.constant 0 : index
    %c0_0 = arith.constant 0 : index
    %0 = vector.load %arg1[%c0, %c0_0] : memref<32x128xf32, #tpu.memory_space<vmem>>, vector<32x128xf32>
    %1 = arith.truncf %0 : vector<32x128xf32> to vector<32x128xbf16>
    %c0_1 = arith.constant 0 : index
    %c0_2 = arith.constant 0 : index
    %2 = vector.load %arg2[%c0_1, %c0_2] : memref<128x256xbf16, #tpu.memory_space<vmem>>, vector<128x256xbf16>
    %cst = arith.constant dense<0.000000e+00> : vector<32x256xf32>
    %3 = tpu.matmul %1, %2, %cst {dimension_numbers = #tpu.dot_dimension_numbers<[1], [0], [0], [1], [0, 0, 1, 1], [], []>} : vector<32x128xbf16>, vector<128x256xbf16>, vector<32x256xf32> -> vector<32x256xf32>
    %c0_3 = arith.constant 0 : index
    %c0_4 = arith.constant 0 : index
    %4 = vector.load %arg3[%c0_3, %c0_4] : memref<1x256xf32, #tpu.memory_space<vmem>>, vector<1x256xf32>
    %5 = vector.broadcast %4 : vector<1x256xf32> to vector<32x256xf32>
    %6 = arith.addf %3, %5 : vector<32x256xf32>
    %c0_5 = arith.constant 0 : index
    %c0_6 = arith.constant 0 : index
    %7 = vector.load %arg4[%c0_5, %c0_6] : memref<32x256xf32, #tpu.memory_space<vmem>>, vector<32x256xf32>
    tpu.vector_store %arg4[%c0_5, %c0_6], %6 {strides = array<i32>} : memref<32x256xf32, #tpu.memory_space<vmem>>, vector<32x256xf32>,
    return
  }
  func.func @transform_0(%arg0: i32) -> (i32, i32) {
    %c0_i32 = arith.constant 0 : i32
    %c0_i32_0 = arith.constant 0 : i32
    return %arg0, %c0_i32 : i32, i32
  }
  func.func @transform_1(%arg0: i32) -> (i32, i32) {
    %c0_i32 = arith.constant 0 : i32
    %c0_i32_0 = arith.constant 0 : i32
    %c0_i32_1 = arith.constant 0 : i32
    return %c0_i32, %c0_i32_0 : i32, i32
  }
  func.func @transform_2(%arg0: i32) -> (i32, i32) {
    %c0_i32 = arith.constant 0 : i32
    %c0_i32_0 = arith.constant 0 : i32
    %c0_i32_1 = arith.constant 0 : i32
    return %c0_i32, %c0_i32_0 : i32, i32
  }
  func.func @transform_3(%arg0: i32) -> (i32, i32) {
    %c0_i32 = arith.constant 0 : i32
    %c0_i32_0 = arith.constant 0 : i32
    return %arg0, %c0_i32 : i32, i32
  }
}

module attributes {stable_mosaic.version = 11 : i64} {
  func.func @_linear_kernel(%arg0: i32, %arg1: memref<32x128xf32, #tpu.memory_space<vmem>>, %arg2: memref<128x128xbf16, #tpu.memory_space<vmem>>, %arg3: memref<1x128xf32, #tpu.memory_space<vmem>>, %arg4: memref<32x128xf32, #tpu.memory_space<vmem>>) attributes {dimension_semantics = [#tpu.dimension_semantics<parallel>], iteration_bounds = array<i64: 1>, scalar_prefetch = 0 : i64, scratch_operands = 0 : i64, tpu.core_type = #tpu.core_type<tc>, window_params = [{transform_indices = @transform_0, window_bounds = array<i64: 32, 128>}, {pipeline_mode = #tpu.pipeline_mode<synchronous>, transform_indices = @transform_1, window_bounds = array<i64: 128, 128>}, {pipeline_mode = #tpu.pipeline_mode<synchronous>, transform_indices = @transform_2, window_bounds = array<i64: 1, 128>}, {transform_indices = @transform_3, window_bounds = array<i64: 32, 128>}]} {
    %c0 = arith.constant 0 : index
    %c0_0 = arith.constant 0 : index
    %0 = vector.load %arg1[%c0, %c0_0] : memref<32x128xf32, #tpu.memory_space<vmem>>, vector<32x128xf32>
    %1 = arith.truncf %0 : vector<32x128xf32> to vector<32x128xbf16>
    %c0_1 = arith.constant 0 : index
    %c0_2 = arith.constant 0 : index
    %2 = vector.load %arg2[%c0_1, %c0_2] : memref<128x128xbf16, #tpu.memory_space<vmem>>, vector<128x128xbf16>
    %cst = arith.constant dense<0.000000e+00> : vector<32x128xf32>
    %3 = tpu.matmul %1, %2, %cst {dimension_numbers = #tpu.dot_dimension_numbers<[1], [0], [0], [1], [0, 0, 1, 1], [], []>} : vector<32x128xbf16>, vector<128x128xbf16>, vector<32x128xf32> -> vector<32x128xf32>
    %c0_3 = arith.constant 0 : index
    %c0_4 = arith.constant 0 : index
    %4 = vector.load %arg3[%c0_3, %c0_4] : memref<1x128xf32, #tpu.memory_space<vmem>>, vector<1x128xf32>
    %5 = vector.broadcast %4 : vector<1x128xf32> to vector<32x128xf32>
    %6 = arith.addf %3, %5 : vector<32x128xf32>
    %c0_5 = arith.constant 0 : index
    %c0_6 = arith.constant 0 : index
    %7 = vector.load %arg4[%c0_5, %c0_6] : memref<32x128xf32, #tpu.memory_space<vmem>>, vector<32x128xf32>
    tpu.vector_store %arg4[%c0_5, %c0_6], %6 {strides = array<i32>} : memref<32x128xf32, #tpu.memory_space<vmem>>, vector<32x128xf32>,
    return
  }
  func.func @transform_0(%arg0: i32) -> (i32, i32) {
    %c0_i32 = arith.constant 0 : i32
    %c0_i32_0 = arith.constant 0 : i32
    return %arg0, %c0_i32 : i32, i32
  }
  func.func @transform_1(%arg0: i32) -> (i32, i32) {
    %c0_i32 = arith.constant 0 : i32
    %c0_i32_0 = arith.constant 0 : i32
    %c0_i32_1 = arith.constant 0 : i32
    return %c0_i32, %c0_i32_0 : i32, i32
  }
  func.func @transform_2(%arg0: i32) -> (i32, i32) {
    %c0_i32 = arith.constant 0 : i32
    %c0_i32_0 = arith.constant 0 : i32
    %c0_i32_1 = arith.constant 0 : i32
    return %c0_i32, %c0_i32_0 : i32, i32
  }
  func.func @transform_3(%arg0: i32) -> (i32, i32) {
    %c0_i32 = arith.constant 0 : i32
    %c0_i32_0 = arith.constant 0 : i32
    return %arg0, %c0_i32 : i32, i32
  }
}

module attributes {stable_mosaic.version = 11 : i64} {
  func.func @_decomp_add_kernel(%arg0: i32, %arg1: memref<1x16x128xf32, #tpu.memory_space<vmem>>, %arg2: memref<1x16x128xf32, #tpu.memory_space<vmem>>, %arg3: memref<1x16x128xf32, #tpu.memory_space<vmem>>, %arg4: memref<1x16x128xf32, #tpu.memory_space<vmem>>) attributes {dimension_semantics = [#tpu.dimension_semantics<parallel>], iteration_bounds = array<i64: 2>, scalar_prefetch = 0 : i64, scratch_operands = 0 : i64, tpu.core_type = #tpu.core_type<tc>, window_params = [{transform_indices = @transform_0, window_bounds = array<i64: 1, 16, 128>}, {transform_indices = @transform_1, window_bounds = array<i64: 1, 16, 128>}, {transform_indices = @transform_2, window_bounds = array<i64: 1, 16, 128>}, {transform_indices = @transform_3, window_bounds = array<i64: 1, 16, 128>}]} {
    %c0 = arith.constant 0 : index
    %c0_0 = arith.constant 0 : index
    %c0_1 = arith.constant 0 : index
    %0 = vector.load %arg1[%c0, %c0_0, %c0_1] : memref<1x16x128xf32, #tpu.memory_space<vmem>>, vector<1x16x128xf32>
    %1 = vector.shape_cast %0 : vector<1x16x128xf32> to vector<16x128xf32>
    %c0_2 = arith.constant 0 : index
    %c0_3 = arith.constant 0 : index
    %c0_4 = arith.constant 0 : index
    %2 = vector.load %arg2[%c0_2, %c0_3, %c0_4] : memref<1x16x128xf32, #tpu.memory_space<vmem>>, vector<1x16x128xf32>
    %3 = vector.shape_cast %2 : vector<1x16x128xf32> to vector<16x128xf32>
    %4 = arith.addf %1, %3 : vector<16x128xf32>
    %5 = vector.extract_strided_slice %4 {offsets = [0, 0], sizes = [1, 128], strides = [1, 1]} : vector<16x128xf32> to vector<1x128xf32>
    %6 = vector.extract_strided_slice %4 {offsets = [15, 0], sizes = [1, 128], strides = [1, 1]} : vector<16x128xf32> to vector<1x128xf32>
    %7 = vector.extract_strided_slice %4 {offsets = [0, 0], sizes = [15, 128], strides = [1, 1]} : vector<16x128xf32> to vector<15x128xf32>
    %8 = tpu.concatenate %5, %7 in 0 : vector<1x128xf32>, vector<15x128xf32> -> vector<16x128xf32>
    %9 = arith.addf %4, %8 : vector<16x128xf32>
    %10 = vector.extract_strided_slice %4 {offsets = [1, 0], sizes = [15, 128], strides = [1, 1]} : vector<16x128xf32> to vector<15x128xf32>
    %11 = tpu.concatenate %10, %6 in 0 : vector<15x128xf32>, vector<1x128xf32> -> vector<16x128xf32>
    %12 = arith.addf %9, %11 : vector<16x128xf32>
    %13 = vector.extract_strided_slice %4 {offsets = [0, 0], sizes = [1, 128], strides = [1, 1]} : vector<16x128xf32> to vector<1x128xf32>
    %14 = vector.shape_cast %13 : vector<1x128xf32> to vector<1x128xf32>
    %15 = vector.broadcast %14 : vector<1x128xf32> to vector<2x128xf32>
    %16 = vector.extract_strided_slice %4 {offsets = [15, 0], sizes = [1, 128], strides = [1, 1]} : vector<16x128xf32> to vector<1x128xf32>
    %17 = vector.shape_cast %16 : vector<1x128xf32> to vector<1x128xf32>
    %18 = vector.broadcast %17 : vector<1x128xf32> to vector<2x128xf32>
    %19 = vector.extract_strided_slice %4 {offsets = [0, 0], sizes = [14, 128], strides = [1, 1]} : vector<16x128xf32> to vector<14x128xf32>
    %20 = tpu.concatenate %15, %19 in 0 : vector<2x128xf32>, vector<14x128xf32> -> vector<16x128xf32>
    %21 = arith.addf %12, %20 : vector<16x128xf32>
    %22 = vector.extract_strided_slice %4 {offsets = [2, 0], sizes = [14, 128], strides = [1, 1]} : vector<16x128xf32> to vector<14x128xf32>
    %23 = tpu.concatenate %22, %18 in 0 : vector<14x128xf32>, vector<2x128xf32> -> vector<16x128xf32>
    %24 = arith.addf %21, %23 : vector<16x128xf32>
    %cst = arith.constant 2.000000e-01 : f32
    %25 = vector.broadcast %cst : f32 to vector<16x128xf32>
    %26 = arith.mulf %24, %25 : vector<16x128xf32>
    %27 = arith.subf %4, %26 : vector<16x128xf32>
    %c0_5 = arith.constant 0 : index
    %c0_6 = arith.constant 0 : index
    %c0_7 = arith.constant 0 : index
    %28 = vector.load %arg3[%c0_5, %c0_6, %c0_7] : memref<1x16x128xf32, #tpu.memory_space<vmem>>, vector<1x16x128xf32>
    %29 = vector.shape_cast %28 : vector<1x16x128xf32> to vector<16x128xf32>
    %30 = vector.shape_cast %27 : vector<16x128xf32> to vector<1x16x128xf32>
    tpu.vector_store %arg3[%c0_5, %c0_6, %c0_7], %30 {strides = array<i32>} : memref<1x16x128xf32, #tpu.memory_space<vmem>>, vector<1x16x128xf32>,
    %c0_8 = arith.constant 0 : index
    %c0_9 = arith.constant 0 : index
    %c0_10 = arith.constant 0 : index
    %31 = vector.load %arg4[%c0_8, %c0_9, %c0_10] : memref<1x16x128xf32, #tpu.memory_space<vmem>>, vector<1x16x128xf32>
    %32 = vector.shape_cast %31 : vector<1x16x128xf32> to vector<16x128xf32>
    %33 = vector.shape_cast %26 : vector<16x128xf32> to vector<1x16x128xf32>
    tpu.vector_store %arg4[%c0_8, %c0_9, %c0_10], %33 {strides = array<i32>} : memref<1x16x128xf32, #tpu.memory_space<vmem>>, vector<1x16x128xf32>,
    return
  }
  func.func @transform_0(%arg0: i32) -> (i32, i32, i32) {
    %c0_i32 = arith.constant 0 : i32
    %c0_i32_0 = arith.constant 0 : i32
    %c0_i32_1 = arith.constant 0 : i32
    return %arg0, %c0_i32, %c0_i32_0 : i32, i32, i32
  }
  func.func @transform_1(%arg0: i32) -> (i32, i32, i32) {
    %c0_i32 = arith.constant 0 : i32
    %c0_i32_0 = arith.constant 0 : i32
    %c0_i32_1 = arith.constant 0 : i32
    return %arg0, %c0_i32, %c0_i32_0 : i32, i32, i32
  }
  func.func @transform_2(%arg0: i32) -> (i32, i32, i32) {
    %c0_i32 = arith.constant 0 : i32
    %c0_i32_0 = arith.constant 0 : i32
    %c0_i32_1 = arith.constant 0 : i32
    return %arg0, %c0_i32, %c0_i32_0 : i32, i32, i32
  }
  func.func @transform_3(%arg0: i32) -> (i32, i32, i32) {
    %c0_i32 = arith.constant 0 : i32
    %c0_i32_0 = arith.constant 0 : i32
    %c0_i32_1 = arith.constant 0 : i32
    return %arg0, %c0_i32, %c0_i32_0 : i32, i32, i32
  }
}

module attributes {stable_mosaic.version = 11 : i64} {
  func.func @_dec_layer_tail_kernel(%arg0: i32, %arg1: memref<1x16x128xf32, #tpu.memory_space<vmem>>, %arg2: memref<1x16x128xf32, #tpu.memory_space<vmem>>, %arg3: memref<1x16x128xf32, #tpu.memory_space<vmem>>, %arg4: memref<1x16x4xf32, #tpu.memory_space<vmem>>, %arg5: memref<128x256xbf16, #tpu.memory_space<vmem>>, %arg6: memref<256x128xbf16, #tpu.memory_space<vmem>>, %arg7: memref<384x4xbf16, #tpu.memory_space<vmem>>, %arg8: memref<1x16x128xf32, #tpu.memory_space<vmem>>, %arg9: memref<1x16x4xf32, #tpu.memory_space<vmem>>) attributes {dimension_semantics = [#tpu.dimension_semantics<parallel>], iteration_bounds = array<i64: 2>, scalar_prefetch = 0 : i64, scratch_operands = 0 : i64, tpu.core_type = #tpu.core_type<tc>, window_params = [{transform_indices = @transform_0, window_bounds = array<i64: 1, 16, 128>}, {transform_indices = @transform_1, window_bounds = array<i64: 1, 16, 128>}, {transform_indices = @transform_2, window_bounds = array<i64: 1, 16, 128>}, {transform_indices = @transform_3, window_bounds = array<i64: 1, 16, 4>}, {pipeline_mode = #tpu.pipeline_mode<synchronous>, transform_indices = @transform_4, window_bounds = array<i64: 128, 256>}, {pipeline_mode = #tpu.pipeline_mode<synchronous>, transform_indices = @transform_5, window_bounds = array<i64: 256, 128>}, {pipeline_mode = #tpu.pipeline_mode<synchronous>, transform_indices = @transform_6, window_bounds = array<i64: 384, 4>}, {transform_indices = @transform_7, window_bounds = array<i64: 1, 16, 128>}, {transform_indices = @transform_8, window_bounds = array<i64: 1, 16, 4>}]} {
    %c0 = arith.constant 0 : index
    %c0_0 = arith.constant 0 : index
    %c0_1 = arith.constant 0 : index
    %0 = vector.load %arg1[%c0, %c0_0, %c0_1] : memref<1x16x128xf32, #tpu.memory_space<vmem>>, vector<1x16x128xf32>
    %1 = vector.shape_cast %0 : vector<1x16x128xf32> to vector<16x128xf32>
    %c0_2 = arith.constant 0 : index
    %c0_3 = arith.constant 0 : index
    %c0_4 = arith.constant 0 : index
    %2 = vector.load %arg2[%c0_2, %c0_3, %c0_4] : memref<1x16x128xf32, #tpu.memory_space<vmem>>, vector<1x16x128xf32>
    %3 = vector.shape_cast %2 : vector<1x16x128xf32> to vector<16x128xf32>
    %4 = arith.addf %1, %3 : vector<16x128xf32>
    %5 = vector.extract_strided_slice %4 {offsets = [0, 0], sizes = [1, 128], strides = [1, 1]} : vector<16x128xf32> to vector<1x128xf32>
    %6 = vector.extract_strided_slice %4 {offsets = [15, 0], sizes = [1, 128], strides = [1, 1]} : vector<16x128xf32> to vector<1x128xf32>
    %7 = vector.extract_strided_slice %4 {offsets = [0, 0], sizes = [15, 128], strides = [1, 1]} : vector<16x128xf32> to vector<15x128xf32>
    %8 = tpu.concatenate %5, %7 in 0 : vector<1x128xf32>, vector<15x128xf32> -> vector<16x128xf32>
    %9 = arith.addf %4, %8 : vector<16x128xf32>
    %10 = vector.extract_strided_slice %4 {offsets = [1, 0], sizes = [15, 128], strides = [1, 1]} : vector<16x128xf32> to vector<15x128xf32>
    %11 = tpu.concatenate %10, %6 in 0 : vector<15x128xf32>, vector<1x128xf32> -> vector<16x128xf32>
    %12 = arith.addf %9, %11 : vector<16x128xf32>
    %13 = vector.extract_strided_slice %4 {offsets = [0, 0], sizes = [1, 128], strides = [1, 1]} : vector<16x128xf32> to vector<1x128xf32>
    %14 = vector.shape_cast %13 : vector<1x128xf32> to vector<1x128xf32>
    %15 = vector.broadcast %14 : vector<1x128xf32> to vector<2x128xf32>
    %16 = vector.extract_strided_slice %4 {offsets = [15, 0], sizes = [1, 128], strides = [1, 1]} : vector<16x128xf32> to vector<1x128xf32>
    %17 = vector.shape_cast %16 : vector<1x128xf32> to vector<1x128xf32>
    %18 = vector.broadcast %17 : vector<1x128xf32> to vector<2x128xf32>
    %19 = vector.extract_strided_slice %4 {offsets = [0, 0], sizes = [14, 128], strides = [1, 1]} : vector<16x128xf32> to vector<14x128xf32>
    %20 = tpu.concatenate %15, %19 in 0 : vector<2x128xf32>, vector<14x128xf32> -> vector<16x128xf32>
    %21 = arith.addf %12, %20 : vector<16x128xf32>
    %22 = vector.extract_strided_slice %4 {offsets = [2, 0], sizes = [14, 128], strides = [1, 1]} : vector<16x128xf32> to vector<14x128xf32>
    %23 = tpu.concatenate %22, %18 in 0 : vector<14x128xf32>, vector<2x128xf32> -> vector<16x128xf32>
    %24 = arith.addf %21, %23 : vector<16x128xf32>
    %cst = arith.constant 2.000000e-01 : f32
    %25 = vector.broadcast %cst : f32 to vector<16x128xf32>
    %26 = arith.mulf %24, %25 : vector<16x128xf32>
    %27 = arith.subf %4, %26 : vector<16x128xf32>
    %28 = arith.truncf %27 : vector<16x128xf32> to vector<16x128xbf16>
    %c0_5 = arith.constant 0 : index
    %c0_6 = arith.constant 0 : index
    %29 = vector.load %arg5[%c0_5, %c0_6] : memref<128x256xbf16, #tpu.memory_space<vmem>>, vector<128x256xbf16>
    %cst_7 = arith.constant dense<0.000000e+00> : vector<16x256xf32>
    %30 = tpu.matmul %28, %29, %cst_7 {dimension_numbers = #tpu.dot_dimension_numbers<[1], [0], [0], [1], [0, 0, 1, 1], [], []>} : vector<16x128xbf16>, vector<128x256xbf16>, vector<16x256xf32> -> vector<16x256xf32>
    %cst_8 = arith.constant 5.000000e-01 : f32
    %31 = vector.broadcast %cst_8 : f32 to vector<16x256xf32>
    %32 = arith.mulf %31, %30 : vector<16x256xf32>
    %cst_9 = arith.constant 0.707106769 : f32
    %33 = vector.broadcast %cst_9 : f32 to vector<16x256xf32>
    %34 = arith.mulf %30, %33 : vector<16x256xf32>
    %35 = math.erf %34 : vector<16x256xf32>
    %cst_10 = arith.constant 1.000000e+00 : f32
    %36 = vector.broadcast %cst_10 : f32 to vector<16x256xf32>
    %37 = arith.addf %36, %35 : vector<16x256xf32>
    %38 = arith.mulf %32, %37 : vector<16x256xf32>
    %39 = arith.truncf %38 : vector<16x256xf32> to vector<16x256xbf16>
    %c0_11 = arith.constant 0 : index
    %c0_12 = arith.constant 0 : index
    %40 = vector.load %arg6[%c0_11, %c0_12] : memref<256x128xbf16, #tpu.memory_space<vmem>>, vector<256x128xbf16>
    %cst_13 = arith.constant dense<0.000000e+00> : vector<16x128xf32>
    %41 = tpu.matmul %39, %40, %cst_13 {dimension_numbers = #tpu.dot_dimension_numbers<[1], [0], [0], [1], [0, 0, 1, 1], [], []>} : vector<16x256xbf16>, vector<256x128xbf16>, vector<16x128xf32> -> vector<16x128xf32>
    %42 = arith.addf %27, %41 : vector<16x128xf32>
    %43 = vector.extract_strided_slice %42 {offsets = [0, 0], sizes = [1, 128], strides = [1, 1]} : vector<16x128xf32> to vector<1x128xf32>
    %44 = vector.extract_strided_slice %42 {offsets = [15, 0], sizes = [1, 128], strides = [1, 1]} : vector<16x128xf32> to vector<1x128xf32>
    %45 = vector.extract_strided_slice %42 {offsets = [0, 0], sizes = [15, 128], strides = [1, 1]} : vector<16x128xf32> to vector<15x128xf32>
    %46 = tpu.concatenate %43, %45 in 0 : vector<1x128xf32>, vector<15x128xf32> -> vector<16x128xf32>
    %47 = arith.addf %42, %46 : vector<16x128xf32>
    %48 = vector.extract_strided_slice %42 {offsets = [1, 0], sizes = [15, 128], strides = [1, 1]} : vector<16x128xf32> to vector<15x128xf32>
    %49 = tpu.concatenate %48, %44 in 0 : vector<15x128xf32>, vector<1x128xf32> -> vector<16x128xf32>
    %50 = arith.addf %47, %49 : vector<16x128xf32>
    %51 = vector.extract_strided_slice %42 {offsets = [0, 0], sizes = [1, 128], strides = [1, 1]} : vector<16x128xf32> to vector<1x128xf32>
    %52 = vector.shape_cast %51 : vector<1x128xf32> to vector<1x128xf32>
    %53 = vector.broadcast %52 : vector<1x128xf32> to vector<2x128xf32>
    %54 = vector.extract_strided_slice %42 {offsets = [15, 0], sizes = [1, 128], strides = [1, 1]} : vector<16x128xf32> to vector<1x128xf32>
    %55 = vector.shape_cast %54 : vector<1x128xf32> to vector<1x128xf32>
    %56 = vector.broadcast %55 : vector<1x128xf32> to vector<2x128xf32>
    %57 = vector.extract_strided_slice %42 {offsets = [0, 0], sizes = [14, 128], strides = [1, 1]} : vector<16x128xf32> to vector<14x128xf32>
    %58 = tpu.concatenate %53, %57 in 0 : vector<2x128xf32>, vector<14x128xf32> -> vector<16x128xf32>
    %59 = arith.addf %50, %58 : vector<16x128xf32>
    %60 = vector.extract_strided_slice %42 {offsets = [2, 0], sizes = [14, 128], strides = [1, 1]} : vector<16x128xf32> to vector<14x128xf32>
    %61 = tpu.concatenate %60, %56 in 0 : vector<14x128xf32>, vector<2x128xf32> -> vector<16x128xf32>
    %62 = arith.addf %59, %61 : vector<16x128xf32>
    %cst_14 = arith.constant 2.000000e-01 : f32
    %63 = vector.broadcast %cst_14 : f32 to vector<16x128xf32>
    %64 = arith.mulf %62, %63 : vector<16x128xf32>
    %65 = arith.subf %42, %64 : vector<16x128xf32>
    %c0_15 = arith.constant 0 : index
    %c0_16 = arith.constant 0 : index
    %c0_17 = arith.constant 0 : index
    %66 = vector.load %arg3[%c0_15, %c0_16, %c0_17] : memref<1x16x128xf32, #tpu.memory_space<vmem>>, vector<1x16x128xf32>
    %67 = vector.shape_cast %66 : vector<1x16x128xf32> to vector<16x128xf32>
    %68 = arith.addf %67, %26 : vector<16x128xf32>
    %69 = arith.addf %68, %64 : vector<16x128xf32>
    %70 = vector.extract_strided_slice %69 {offsets = [15, 0], sizes = [1, 128], strides = [1, 1]} : vector<16x128xf32> to vector<1x128xf32>
    %71 = vector.extract_strided_slice %69 {offsets = [0, 0], sizes = [15, 128], strides = [1, 1]} : vector<16x128xf32> to vector<15x128xf32>
    %72 = tpu.concatenate %70, %71 in 0 : vector<1x128xf32>, vector<15x128xf32> -> vector<16x128xf32>
    %73 = vector.extract_strided_slice %69 {offsets = [1, 0], sizes = [15, 128], strides = [1, 1]} : vector<16x128xf32> to vector<15x128xf32>
    %74 = vector.extract_strided_slice %69 {offsets = [0, 0], sizes = [1, 128], strides = [1, 1]} : vector<16x128xf32> to vector<1x128xf32>
    %75 = tpu.concatenate %73, %74 in 0 : vector<15x128xf32>, vector<1x128xf32> -> vector<16x128xf32>
    %76 = tpu.concatenate %72, %69, %75 in 1 : vector<16x128xf32>, vector<16x128xf32>, vector<16x128xf32> -> vector<16x384xf32>
    %77 = arith.truncf %76 : vector<16x384xf32> to vector<16x384xbf16>
    %c0_18 = arith.constant 0 : index
    %c0_19 = arith.constant 0 : index
    %78 = vector.load %arg7[%c0_18, %c0_19] : memref<384x4xbf16, #tpu.memory_space<vmem>>, vector<384x4xbf16>
    %cst_20 = arith.constant dense<0.000000e+00> : vector<16x4xf32>
    %79 = tpu.matmul %77, %78, %cst_20 {dimension_numbers = #tpu.dot_dimension_numbers<[1], [0], [0], [1], [0, 0, 1, 1], [], []>} : vector<16x384xbf16>, vector<384x4xbf16>, vector<16x4xf32> -> vector<16x4xf32>
    %c0_21 = arith.constant 0 : index
    %c0_22 = arith.constant 0 : index
    %c0_23 = arith.constant 0 : index
    %80 = vector.load %arg8[%c0_21, %c0_22, %c0_23] : memref<1x16x128xf32, #tpu.memory_space<vmem>>, vector<1x16x128xf32>
    %81 = vector.shape_cast %80 : vector<1x16x128xf32> to vector<16x128xf32>
    %82 = vector.shape_cast %65 : vector<16x128xf32> to vector<1x16x128xf32>
    tpu.vector_store %arg8[%c0_21, %c0_22, %c0_23], %82 {strides = array<i32>} : memref<1x16x128xf32, #tpu.memory_space<vmem>>, vector<1x16x128xf32>,
    %c0_24 = arith.constant 0 : index
    %c0_25 = arith.constant 0 : index
    %c0_26 = arith.constant 0 : index
    %83 = vector.load %arg4[%c0_24, %c0_25, %c0_26] : memref<1x16x4xf32, #tpu.memory_space<vmem>>, vector<1x16x4xf32>
    %84 = vector.shape_cast %83 : vector<1x16x4xf32> to vector<16x4xf32>
    %85 = arith.addf %84, %79 : vector<16x4xf32>
    %c0_27 = arith.constant 0 : index
    %c0_28 = arith.constant 0 : index
    %c0_29 = arith.constant 0 : index
    %86 = vector.load %arg9[%c0_27, %c0_28, %c0_29] : memref<1x16x4xf32, #tpu.memory_space<vmem>>, vector<1x16x4xf32>
    %87 = vector.shape_cast %86 : vector<1x16x4xf32> to vector<16x4xf32>
    %88 = vector.shape_cast %85 : vector<16x4xf32> to vector<1x16x4xf32>
    tpu.vector_store %arg9[%c0_27, %c0_28, %c0_29], %88 {strides = array<i32>} : memref<1x16x4xf32, #tpu.memory_space<vmem>>, vector<1x16x4xf32>,
    return
  }
  func.func @transform_0(%arg0: i32) -> (i32, i32, i32) {
    %c0_i32 = arith.constant 0 : i32
    %c0_i32_0 = arith.constant 0 : i32
    %c0_i32_1 = arith.constant 0 : i32
    return %arg0, %c0_i32, %c0_i32_0 : i32, i32, i32
  }
  func.func @transform_1(%arg0: i32) -> (i32, i32, i32) {
    %c0_i32 = arith.constant 0 : i32
    %c0_i32_0 = arith.constant 0 : i32
    %c0_i32_1 = arith.constant 0 : i32
    return %arg0, %c0_i32, %c0_i32_0 : i32, i32, i32
  }
  func.func @transform_2(%arg0: i32) -> (i32, i32, i32) {
    %c0_i32 = arith.constant 0 : i32
    %c0_i32_0 = arith.constant 0 : i32
    %c0_i32_1 = arith.constant 0 : i32
    return %arg0, %c0_i32, %c0_i32_0 : i32, i32, i32
  }
  func.func @transform_3(%arg0: i32) -> (i32, i32, i32) {
    %c0_i32 = arith.constant 0 : i32
    %c0_i32_0 = arith.constant 0 : i32
    %c0_i32_1 = arith.constant 0 : i32
    return %arg0, %c0_i32, %c0_i32_0 : i32, i32, i32
  }
  func.func @transform_4(%arg0: i32) -> (i32, i32) {
    %c0_i32 = arith.constant 0 : i32
    %c0_i32_0 = arith.constant 0 : i32
    %c0_i32_1 = arith.constant 0 : i32
    return %c0_i32, %c0_i32_0 : i32, i32
  }
  func.func @transform_5(%arg0: i32) -> (i32, i32) {
    %c0_i32 = arith.constant 0 : i32
    %c0_i32_0 = arith.constant 0 : i32
    %c0_i32_1 = arith.constant 0 : i32
    return %c0_i32, %c0_i32_0 : i32, i32
  }
  func.func @transform_6(%arg0: i32) -> (i32, i32) {
    %c0_i32 = arith.constant 0 : i32
    %c0_i32_0 = arith.constant 0 : i32
    %c0_i32_1 = arith.constant 0 : i32
    return %c0_i32, %c0_i32_0 : i32, i32
  }
  func.func @transform_7(%arg0: i32) -> (i32, i32, i32) {
    %c0_i32 = arith.constant 0 : i32
    %c0_i32_0 = arith.constant 0 : i32
    %c0_i32_1 = arith.constant 0 : i32
    return %arg0, %c0_i32, %c0_i32_0 : i32, i32, i32
  }
  func.func @transform_8(%arg0: i32) -> (i32, i32, i32) {
    %c0_i32 = arith.constant 0 : i32
    %c0_i32_0 = arith.constant 0 : i32
    %c0_i32_1 = arith.constant 0 : i32
    return %arg0, %c0_i32, %c0_i32_0 : i32, i32, i32
  }
}

module attributes {stable_mosaic.version = 11 : i64} {
  func.func @_dec_final_kernel(%arg0: i32, %arg1: memref<1x16x128xf32, #tpu.memory_space<vmem>>, %arg2: memref<1x16x4xf32, #tpu.memory_space<vmem>>, %arg3: memref<1x128xf32, #tpu.memory_space<vmem>>, %arg4: memref<1x128xf32, #tpu.memory_space<vmem>>, %arg5: memref<128x4xbf16, #tpu.memory_space<vmem>>, %arg6: memref<1x4xf32, #tpu.memory_space<vmem>>, %arg7: memref<1x8x4xf32, #tpu.memory_space<vmem>>) attributes {dimension_semantics = [#tpu.dimension_semantics<parallel>], iteration_bounds = array<i64: 2>, scalar_prefetch = 0 : i64, scratch_operands = 0 : i64, tpu.core_type = #tpu.core_type<tc>, window_params = [{transform_indices = @transform_0, window_bounds = array<i64: 1, 16, 128>}, {transform_indices = @transform_1, window_bounds = array<i64: 1, 16, 4>}, {pipeline_mode = #tpu.pipeline_mode<synchronous>, transform_indices = @transform_2, window_bounds = array<i64: 1, 128>}, {pipeline_mode = #tpu.pipeline_mode<synchronous>, transform_indices = @transform_3, window_bounds = array<i64: 1, 128>}, {pipeline_mode = #tpu.pipeline_mode<synchronous>, transform_indices = @transform_4, window_bounds = array<i64: 128, 4>}, {pipeline_mode = #tpu.pipeline_mode<synchronous>, transform_indices = @transform_5, window_bounds = array<i64: 1, 4>}, {transform_indices = @transform_6, window_bounds = array<i64: 1, 8, 4>}]} {
    %c0 = arith.constant 0 : index
    %c0_0 = arith.constant 0 : index
    %c0_1 = arith.constant 0 : index
    %0 = vector.load %arg1[%c0, %c0_0, %c0_1] : memref<1x16x128xf32, #tpu.memory_space<vmem>>, vector<1x16x128xf32>
    %1 = vector.shape_cast %0 : vector<1x16x128xf32> to vector<16x128xf32>
    %c0_2 = arith.constant 0 : index
    %c0_3 = arith.constant 0 : index
    %2 = vector.load %arg3[%c0_2, %c0_3] : memref<1x128xf32, #tpu.memory_space<vmem>>, vector<1x128xf32>
    %c0_4 = arith.constant 0 : index
    %c0_5 = arith.constant 0 : index
    %3 = vector.load %arg4[%c0_4, %c0_5] : memref<1x128xf32, #tpu.memory_space<vmem>>, vector<1x128xf32>
    %cst = arith.constant dense<0.000000e+00> : vector<16xf32>
    %4 = vector.multi_reduction <add>, %1, %cst [1] : vector<16x128xf32> to vector<16xf32>
    %5 = vector.shape_cast %4 : vector<16xf32> to vector<16x1xf32>
    %cst_6 = arith.constant 1.280000e+02 : f32
    %6 = vector.broadcast %cst_6 : f32 to vector<16x1xf32>
    %7 = arith.divf %5, %6 : vector<16x1xf32>
    %8 = vector.broadcast %7 : vector<16x1xf32> to vector<16x128xf32>
    %9 = arith.subf %1, %8 : vector<16x128xf32>
    %10 = arith.mulf %9, %9 : vector<16x128xf32>
    %cst_7 = arith.constant dense<0.000000e+00> : vector<16xf32>
    %11 = vector.multi_reduction <add>, %10, %cst_7 [1] : vector<16x128xf32> to vector<16xf32>
    %12 = vector.shape_cast %11 : vector<16xf32> to vector<16x1xf32>
    %cst_8 = arith.constant 1.280000e+02 : f32
    %13 = vector.broadcast %cst_8 : f32 to vector<16x1xf32>
    %14 = arith.divf %12, %13 : vector<16x1xf32>
    %15 = vector.broadcast %7 : vector<16x1xf32> to vector<16x128xf32>
    %16 = arith.subf %1, %15 : vector<16x128xf32>
    %cst_9 = arith.constant 9.99999974E-6 : f32
    %17 = vector.broadcast %cst_9 : f32 to vector<16x1xf32>
    %18 = arith.addf %14, %17 : vector<16x1xf32>
    %19 = math.rsqrt %18 : vector<16x1xf32>
    %20 = vector.broadcast %19 : vector<16x1xf32> to vector<16x128xf32>
    %21 = arith.mulf %16, %20 : vector<16x128xf32>
    %22 = vector.broadcast %2 : vector<1x128xf32> to vector<16x128xf32>
    %23 = arith.mulf %21, %22 : vector<16x128xf32>
    %24 = vector.broadcast %3 : vector<1x128xf32> to vector<16x128xf32>
    %25 = arith.addf %23, %24 : vector<16x128xf32>
    %cst_10 = arith.constant dense<0.000000e+00> : vector<128xf32>
    %26 = vector.multi_reduction <add>, %25, %cst_10 [0] : vector<16x128xf32> to vector<128xf32>
    %27 = vector.shape_cast %26 : vector<128xf32> to vector<1x128xf32>
    %cst_11 = arith.constant 1.600000e+01 : f32
    %28 = vector.broadcast %cst_11 : f32 to vector<1x128xf32>
    %29 = arith.divf %27, %28 : vector<1x128xf32>
    %30 = vector.broadcast %29 : vector<1x128xf32> to vector<16x128xf32>
    %31 = arith.subf %25, %30 : vector<16x128xf32>
    %32 = arith.truncf %31 : vector<16x128xf32> to vector<16x128xbf16>
    %c0_12 = arith.constant 0 : index
    %c0_13 = arith.constant 0 : index
    %33 = vector.load %arg5[%c0_12, %c0_13] : memref<128x4xbf16, #tpu.memory_space<vmem>>, vector<128x4xbf16>
    %cst_14 = arith.constant dense<0.000000e+00> : vector<16x4xf32>
    %34 = tpu.matmul %32, %33, %cst_14 {dimension_numbers = #tpu.dot_dimension_numbers<[1], [0], [0], [1], [0, 0, 1, 1], [], []>} : vector<16x128xbf16>, vector<128x4xbf16>, vector<16x4xf32> -> vector<16x4xf32>
    %c0_15 = arith.constant 0 : index
    %c0_16 = arith.constant 0 : index
    %35 = vector.load %arg6[%c0_15, %c0_16] : memref<1x4xf32, #tpu.memory_space<vmem>>, vector<1x4xf32>
    %36 = vector.broadcast %35 : vector<1x4xf32> to vector<16x4xf32>
    %37 = arith.addf %34, %36 : vector<16x4xf32>
    %c0_17 = arith.constant 0 : index
    %c0_18 = arith.constant 0 : index
    %c0_19 = arith.constant 0 : index
    %38 = vector.load %arg2[%c0_17, %c0_18, %c0_19] : memref<1x16x4xf32, #tpu.memory_space<vmem>>, vector<1x16x4xf32>
    %39 = vector.shape_cast %38 : vector<1x16x4xf32> to vector<16x4xf32>
    %40 = arith.addf %39, %37 : vector<16x4xf32>
    %41 = vector.extract_strided_slice %40 {offsets = [8, 0], sizes = [8, 4], strides = [1, 1]} : vector<16x4xf32> to vector<8x4xf32>
    %c0_20 = arith.constant 0 : index
    %c0_21 = arith.constant 0 : index
    %c0_22 = arith.constant 0 : index
    %42 = vector.load %arg7[%c0_20, %c0_21, %c0_22] : memref<1x8x4xf32, #tpu.memory_space<vmem>>, vector<1x8x4xf32>
    %43 = vector.shape_cast %42 : vector<1x8x4xf32> to vector<8x4xf32>
    %44 = vector.shape_cast %41 : vector<8x4xf32> to vector<1x8x4xf32>
    tpu.vector_store %arg7[%c0_20, %c0_21, %c0_22], %44 {strides = array<i32>} : memref<1x8x4xf32, #tpu.memory_space<vmem>>, vector<1x8x4xf32>,
    return
  }
  func.func @transform_0(%arg0: i32) -> (i32, i32, i32) {
    %c0_i32 = arith.constant 0 : i32
    %c0_i32_0 = arith.constant 0 : i32
    %c0_i32_1 = arith.constant 0 : i32
    return %arg0, %c0_i32, %c0_i32_0 : i32, i32, i32
  }
  func.func @transform_1(%arg0: i32) -> (i32, i32, i32) {
    %c0_i32 = arith.constant 0 : i32
    %c0_i32_0 = arith.constant 0 : i32
    %c0_i32_1 = arith.constant 0 : i32
    return %arg0, %c0_i32, %c0_i32_0 : i32, i32, i32
  }
  func.func @transform_2(%arg0: i32) -> (i32, i32) {
    %c0_i32 = arith.constant 0 : i32
    %c0_i32_0 = arith.constant 0 : i32
    %c0_i32_1 = arith.constant 0 : i32
    return %c0_i32, %c0_i32_0 : i32, i32
  }
  func.func @transform_3(%arg0: i32) -> (i32, i32) {
    %c0_i32 = arith.constant 0 : i32
    %c0_i32_0 = arith.constant 0 : i32
    %c0_i32_1 = arith.constant 0 : i32
    return %c0_i32, %c0_i32_0 : i32, i32
  }
  func.func @transform_4(%arg0: i32) -> (i32, i32) {
    %c0_i32 = arith.constant 0 : i32
    %c0_i32_0 = arith.constant 0 : i32
    %c0_i32_1 = arith.constant 0 : i32
    return %c0_i32, %c0_i32_0 : i32, i32
  }
  func.func @transform_5(%arg0: i32) -> (i32, i32) {
    %c0_i32 = arith.constant 0 : i32
    %c0_i32_0 = arith.constant 0 : i32
    %c0_i32_1 = arith.constant 0 : i32
    return %c0_i32, %c0_i32_0 : i32, i32
  }
  func.func @transform_6(%arg0: i32) -> (i32, i32, i32) {
    %c0_i32 = arith.constant 0 : i32
    %c0_i32_0 = arith.constant 0 : i32
    %c0_i32_1 = arith.constant 0 : i32
    return %arg0, %c0_i32, %c0_i32_0 : i32, i32, i32
  }
}

</mosaic_0001>

<bundles_post_ra>
// kernel: autoformer_forward.19
= control target key start
LH: loop header
LB: loop body
LE: loop exit
PB: predicated region body
PF: predicated region fallthrough
CT: control target
= control target key end

     0   :  { %s454_s12 = smov 0   ;;  %s482_s0 = inlined_call_operand.vmem [shape: f32[2,16,4], index: 0, kind: input, shape index: {}]   ;;  %s483_s1 = inlined_call_operand.vmem [shape: f32[2,16,4], index: 1, kind: input, shape index: {}]   ;;  %s484_s2 = inlined_call_operand.vmem [shape: bf16[16,128], index: 2, kind: input, shape index: {}]   ;;  %s485_s3 = inlined_call_operand.vmem [shape: f32[2,16,128], index: 3, kind: output, shape index: {}]  }
   0x1 LB: > { %s366_s13 = sadd.s32 4294967295, %s427_s12   ;;  %p370_p0 = scmp.ge.s32.totalorder %s427_s12, 1  ;;  %s427_s12 = sphi %s454_s12, %s13_s12  }
   0x2   : > { %p147_p1 = scmp.lt.s32.totalorder %s427_s12, 3 }
   0x4   : > { %p148_p2 = pnand %p370_p0, %p147_p1 }
   0x5   : > { %p176_p3 = scmp.lt.s32.totalorder (!%p148_p2), %s366_s13, 1  ;;  %v420_v0 = vld [vmem:[%s484_s2] sm:$0xff] (!%p148_p2)   ;;  %v429_v1 = vmov (!%p148_p2), 0.0   ;;  %vm430_vm0 = vmmov (!%p148_p2), 0   ;;  %vm204_vm1 = vcmask (!%p148_p2), 1046528   ;;  %vm198_vm2 = vcmask (!%p148_p2), 1040384  }
   0x6   : > { %151 = sbr.rel (%p148_p2) target bundleno = 359 (0x167), region = 32  ;;  %386 = vmatprep.subr.bf16.mxu0 (!%p148_p2), %v429_v1  ;;  %388 = vmatprep.mubr.msk.bf16.mxu0 (!%p148_p2), %vm430_vm0, %v429_v1  ;;  %s431_s23 = smov (!%p148_p2), 4   ;;  %vm224_vm3 = vcmask (!%p148_p2), 31744   ;;  %vm227_vm4 = vcmask (!%p148_p2), 64512   ;;  %vm240_vm5 = vcmask (!%p148_p2), 97280   ;;  %vm252_vm6 = vcmask (!%p148_p2), 130048  }
   0x7   : > { %387 = vmatpush3.bf16.msra.mxu0 (!%p148_p2), %v420_v0  ;;  %s432_s24 = smov (!%p148_p2), 12   ;;  %s433_s25 = smov (!%p148_p2), 8  }
   0xd   : > { %s487_s13 = smov (!%p176_p3, %s366_s13), 1 }
   0xe   : > { %s465_s16 = sshll.u32 %s487_s13, 4 }
   0xf   : > { %s180_s19 = scalar_lea.vmem %s482_s0, %s465_s16  ;;  %s185_s22 = scalar_lea.vmem %s483_s1, %s465_s16 }
  0x10   : > { %v192_v2 = vld [vmem:[%s180_s19] sm:$0xff]  ;;  %v193_v3 = vld [vmem:[%s180_s19 + $0x8] sm:$0xff]  ;;  %s190_s28 = scalar_lea.vmem %s485_s3, %s465_s16 }
  0x11   : > { %v230_v4 = vld [vmem:[%s185_s22] sm:$0xff]  ;;  %v195_v5 = vrot.slane %v193_v3, 7  ;;  %v206_v6 = vrot.slane %v193_v3, 1  ;;  %v405_v7 = vpack.i.bf16 %v193_v3, %v192_v2  ;;  %v199_v8 = vrot.slane %v192_v2, 7  ;;  %v231_v9 = vld [vmem:[%s185_s22 + $0x8] sm:$0xff] }
  0x12   : > { %v205_v10 = vrot.slane %v192_v2, 1  ;;  %v415_v11 = vpack.i.bf16 %v231_v9, %v230_v4 }
  0x13   : > { %406 = vrot.lane.b32.xlu0 %v405_v7, %s431_s23  ;;  %v200_v12 = vsel %vm198_vm2, %v199_v8, %v195_v5  ;;  %v203_v13 = vsel %vm198_vm2, %v195_v5, %v199_v8 }
  0x14   : > { %v207_v14 = vsel %vm204_vm1, %v205_v10, %v206_v6  ;;  %v210_v15 = vsel %vm204_vm1, %v206_v6, %v205_v10  ;;  %416 = vrot.lane.b32.xlu1 %v415_v11, %s432_s24 }
  0x15   : > { %v410_v16 = vpack.i.bf16 %v210_v15, %v207_v14 }
  0x17   : > { %411 = vrot.lane.b32.xlu0 %v410_v16, %s433_s25 }
  0x85   : > { %v407_v17 = vpop.permute.xlu0 %406 }
  0x86   : > { %v417_v18 = vpop.permute.xlu1 %416  ;;  %v409_v19 = vunpack.i.h.bf16 %v407_v17  ;;  %v408_v20 = vunpack.i.l.bf16 %v407_v17 }
  0x87   : > { %v419_v22 = vunpack.i.h.bf16 %v417_v18  ;;  %v418_v23 = vunpack.i.l.bf16 %v417_v18 }
  0x88   : > { %v225_v26 = vsel %vm224_vm3, %v203_v13, %v408_v20  ;;  %v226_v27 = vsel %vm224_vm3, %v200_v12, %v409_v19 }
  0x89   : > { %v412_v21 = vpop.permute.xlu0 %411 }
  0x8a   : > { %v414_v24 = vunpack.i.h.bf16 %v412_v21  ;;  %v413_v25 = vunpack.i.l.bf16 %v412_v21 }
  0x8c   : > { %v228_v28 = vsel %vm227_vm4, %v225_v26, %v413_v25  ;;  %v229_v29 = vsel %vm227_vm4, %v226_v27, %v414_v24 }
  0x8d   : > { %v241_v30 = vsel %vm240_vm5, %v228_v28, %v418_v23  ;;  %v242_v31 = vsel %vm240_vm5, %v229_v29, %v419_v22 }
  0x8e   : > { %v243_v32 = vpack.c.bf16 %v242_v31, %v241_v30 }
  0x90   : > { %389 = vmatmul.mubr.msk.bf16.vlgmr.msra.gmra.mrb[0].mxu0 %vm252_vm6, %v243_v32 }
 0x163   : > { %v290_v33 = vpop.f32.mrb[0].mxu0 }
 0x164   : > { %297 = vst [vmem:[%s190_s28] sm:$0xff] %v290_v33  ;;  %v390_v34 = vpop.f32.mrb[1].mxu0 }
 0x165   : > { %v293_v35 = vpop.f32.mrb[2].mxu0 }
 0x166   : > { %298 = vst [vmem:[%s190_s28 + $0x8] sm:$0xff] %v293_v35  ;;  %v391_v36 = vpop.f32.mrb[3].mxu0 }
 0x167 PF: > { %s13_s12 = sadd.s32 1, %s427_s12  }
 0x168   : > { %p10_p4 = scmp.ge.s32.totalorder %s13_s12, 4  }
 0x16a   :  { %12 = sbr.rel (!%p10_p4) target bundleno = 1 (0x1), region = 65 }

// kernel: autoformer_forward.18
= control target key start
LH: loop header
LB: loop body
LE: loop exit
PB: predicated region body
PF: predicated region fallthrough
CT: control target
= control target key end

     0   :  { %s349_s9 = smov 0   ;;  %s382_s0 = inlined_call_operand.vmem [shape: f32[2,16,4], index: 0, kind: input, shape index: {}]   ;;  %s383_s1 = inlined_call_operand.vmem [shape: f32[2,16,4], index: 1, kind: output, shape index: {0}]   ;;  %s384_s2 = inlined_call_operand.vmem [shape: f32[2,16,4], index: 2, kind: output, shape index: {1}]  }
   0x1 LB: > { %s302_s10 = sadd.s32 4294967295, %s332_s9   ;;  %p306_p0 = scmp.ge.s32.totalorder %s332_s9, 1  ;;  %s332_s9 = sphi %s349_s9, %s13_s9  }
   0x2   : > { %p115_p1 = scmp.lt.s32.totalorder %s332_s9, 3 }
   0x4   : > { %p116_p2 = pnand %p306_p0, %p115_p1 }
   0x5   : > { %p142_p3 = scmp.lt.s32.totalorder (!%p116_p2), %s302_s10, 1  ;;  %v179_v0 = vlaneseq (!%p116_p2)  ;;  %vm161_vm0 = vcmask (!%p116_p2), 1040384   ;;  %vm170_vm1 = vcmask (!%p116_p2), 1046528   ;;  %vm187_vm2 = vcmask (!%p116_p2), 1041408  }
   0x6   : > { %119 = sbr.rel (%p116_p2) target bundleno = 34 (0x22), region = 24  ;;  %vm196_vm3 = vcmask (!%p116_p2), 1045504   ;;  %vm209_vm4 = vcmask (!%p116_p2), 31744  }
   0x7   : > { %v180_v1 = vshrl.u32 (!%p116_p2), %v179_v0, 7 }
   0x9   : > { %v181_v2 = vsub.s32 (!%p116_p2), 0, %v180_v1  ;;  %v185_v5 = vsub.s32 (!%p116_p2), 7, %v180_v1 }
   0xd   : > { %s386_s10 = smov (!%p142_p3, %s302_s10), 1 }
   0xe   : > { %s357_s11 = sshll.u32 %s386_s10, 4 }
   0xf   : > { %s146_s14 = scalar_lea.vmem %s382_s0, %s357_s11  ;;  %s156_s17 = scalar_lea.vmem %s384_s2, %s357_s11 }
  0x10   : > { %v157_v3 = vld [vmem:[%s146_s14] sm:$0xff]  ;;  %v158_v4 = vld [vmem:[%s146_s14 + $0x8] sm:$0xff]  ;;  %s151_s20 = scalar_lea.vmem %s383_s1, %s357_s11 }
  0x11   : > { %v162_v6 = vrot.slane %v157_v3, 7  ;;  %v171_v7 = vrot.slane %v157_v3, 1  ;;  %v172_v8 = vrot.slane %v158_v4, 1  ;;  %v182_v9 = vrot.slane %v157_v3, %v181_v2 }
  0x12   : > { %v188_v10 = vrot.slane %v157_v3, 6  ;;  %v163_v11 = vrot.slane %v158_v4, 7  ;;  %v197_v14 = vrot.slane %v157_v3, 2  ;;  %v198_v15 = vrot.slane %v158_v4, 2 }
  0x13   : > { %v167_v12 = vsel %vm161_vm0, %v157_v3, %v162_v6  ;;  %v173_v13 = vsel %vm170_vm1, %v171_v7, %v172_v8  ;;  %v176_v18 = vsel %vm170_vm1, %v172_v8, %v158_v4  ;;  %v186_v19 = vrot.slane %v158_v4, %v185_v5 }
  0x14   : > { %v168_v16 = vadd.f32 %v167_v12, %v157_v3  ;;  %v164_v17 = vsel %vm161_vm0, %v162_v6, %v163_v11  ;;  %v193_v20 = vsel %vm187_vm2, %v182_v9, %v188_v10  ;;  %v189_v22 = vrot.slane %v158_v4, 6 }
  0x15   : > { %v169_v21 = vadd.f32 %v164_v17, %v158_v4  ;;  %v199_v24 = vsel %vm196_vm3, %v197_v14, %v198_v15  ;;  %v202_v28 = vsel %vm196_vm3, %v198_v15, %v186_v19 }
  0x16   : > { %v177_v23 = vadd.f32 %v173_v13, %v168_v16  ;;  %v190_v26 = vsel %vm187_vm2, %v188_v10, %v189_v22 }
  0x17   : > { %v178_v25 = vadd.f32 %v176_v18, %v169_v21 }
  0x18   : > { %v194_v27 = vadd.f32 %v193_v20, %v177_v23 }
  0x19   : > { %v195_v29 = vadd.f32 %v190_v26, %v178_v25 }
  0x1a   : > { %v203_v30 = vadd.f32 %v199_v24, %v194_v27 }
  0x1b   : > { %v204_v31 = vadd.f32 %v202_v28, %v195_v29 }
  0x1c   : > { %v205_v32 = vmul.f32 0.2, %v203_v30 }
  0x1d   : > { %v206_v33 = vmul.f32 0.2, %v204_v31 }
  0x1e   : > { %v207_v34 = vsub.f32 %v157_v3, %v205_v32  ;;  %212 = vst.msk [vmem:[%s156_s17] sm:$0xff] %vm209_vm4, %v205_v32 }
  0x1f   : > { %v208_v35 = vsub.f32 %v158_v4, %v206_v33  ;;  %213 = vst.msk [vmem:[%s156_s17 + $0x8] sm:$0xff] %vm209_vm4, %v206_v33 }
  0x20   : > { %210 = vst.msk [vmem:[%s151_s20] sm:$0xff] %vm209_vm4, %v207_v34 }
  0x21   : > { %211 = vst.msk [vmem:[%s151_s20 + $0x8] sm:$0xff] %vm209_vm4, %v208_v35 }
  0x22 PF: > { %s13_s9 = sadd.s32 1, %s332_s9  }
  0x23   : > { %p10_p4 = scmp.ge.s32.totalorder %s13_s9, 4  }
  0x25   :  { %12 = sbr.rel (!%p10_p4) target bundleno = 1 (0x1), region = 66 }

// kernel: autoformer_forward.20
= control target key start
LH: loop header
LB: loop body
LE: loop exit
PB: predicated region body
PF: predicated region fallthrough
CT: control target
= control target key end

     0   :  { %v403_v1 = vmov 0   ;;  %v55_v31 = vlaneseq  ;;  %s549_s1 = inlined_call_operand.vmem [shape: bf16[128,384], index: 1, kind: input, shape index: {}]   ;;  %s550_s0 = inlined_call_operand.vmem [shape: f32[32,128], index: 0, kind: input, shape index: {}]   ;;  %s551_s2 = inlined_call_operand.vmem [shape: f32[1,384], index: 2, kind: input, shape index: {}]   ;;  %s552_s3 = inlined_call_operand.vmem [shape: f32[32,384], index: 3, kind: output, shape index: {}]  }
   0x1   :  { %v371_v0 = vld [vmem:[%s549_s1 + $0x4] ss:$12 sps:$4 sm:$0xff]   ;;  %230 = vmatprep.mubr.bf16.mxu0 %v403_v1  ;;  %v373_v2 = vld [vmem:[%s549_s1] ss:$12 sps:$4 sm:$0xff]   ;;  %v374_v3 = vld [vmem:[%s549_s1 + $0x1c] ss:$12 sps:$4 sm:$0xff]  }
   0x2   :  { %198 = vmatprep.subr.bf16.mxu0 %v371_v0  ;;  %v376_v4 = vld [vmem:[%s549_s1 + $0x18] ss:$12 sps:$4 sm:$0xff]   ;;  %v377_v5 = vld [vmem:[%s549_s1 + $0x8] ss:$12 sps:$4 sm:$0xff]   ;;  %v381_v7 = vld [vmem:[%s549_s1 + $0x20] ss:$12 sps:$4 sm:$0xff]  }
   0x3   :  { %199 = vmatpush1.bf16.msra.mxu0 %v373_v2  ;;  %v378_v6 = vld [vmem:[%s549_s1 + $0x34] ss:$12 sps:$4 sm:$0xff]   ;;  %350 = vmatprep.subr.bf16.mxu1 %v377_v5  ;;  %v380_v8 = vld [vmem:[%s549_s1 + $0x30] ss:$12 sps:$4 sm:$0xff]   ;;  %v382_v9 = vld [vmem:[%s549_s1 + $0x4c] ss:$12 sps:$4 sm:$0xff]  }
   0x4   :  { %200 = vmatprep.subr.bf16.mxu0 %v374_v3  ;;  %351 = vmatpush3.bf16.msra.mxu1 %v377_v5  ;;  %v385_v10 = vld [vmem:[%s549_s1 + $0x38] ss:$12 sps:$4 sm:$0xff]   ;;  %v384_v11 = vld [vmem:[%s549_s1 + $0x48] ss:$12 sps:$4 sm:$0xff]   ;;  %v389_v12 = vld [vmem:[%s549_s1 + $0x50] ss:$12 sps:$4 sm:$0xff]  }
   0x5   :  { %352 = vmatprep.subr.bf16.mxu1 %v381_v7  ;;  %v386_v13 = vld [vmem:[%s549_s1 + $0x64] ss:$12 sps:$4 sm:$0xff]   ;;  %v388_v14 = vld [vmem:[%s549_s1 + $0x60] ss:$12 sps:$4 sm:$0xff]   ;;  %v393_v15 = vld [vmem:[%s549_s1 + $0x68] ss:$12 sps:$4 sm:$0xff]  }
   0x6   :  { %v390_v16 = vld [vmem:[%s549_s1 + $0x7c] ss:$12 sps:$4 sm:$0xff]   ;;  %v15_v17 = vld [vmem:[%s550_s0] sm:$0xff]  ;;  %v398_v25 = vld [vmem:[%s549_s1 + $0xac] ss:$12 sps:$4 sm:$0xff]   ;;  %v56_v32 = vshrl.u32 %v55_v31, 7 }
   0x7   :  { %201 = vmatpush1.bf16.msra.mxu0 %v376_v4  ;;  %v16_v18 = vld [vmem:[%s550_s0 + $0x8] sm:$0xff]  ;;  %v392_v19 = vld [vmem:[%s549_s1 + $0x78] ss:$12 sps:$4 sm:$0xff]   ;;  %v394_v22 = vld [vmem:[%s549_s1 + $0x94] ss:$12 sps:$4 sm:$0xff]  }
   0x8   :  { %202 = vmatprep.subr.bf16.mxu0 %v378_v6  ;;  %353 = vmatpush3.bf16.msra.mxu1 %v381_v7  ;;  %v397_v20 = vld [vmem:[%s549_s1 + $0x80] ss:$12 sps:$4 sm:$0xff]   ;;  %v19_v21 = vpack.c.bf16 %v16_v18, %v15_v17  ;;  %v396_v23 = vld [vmem:[%s549_s1 + $0x90] ss:$12 sps:$4 sm:$0xff]   ;;  %v401_v24 = vld [vmem:[%s549_s1 + $0x98] ss:$12 sps:$4 sm:$0xff]  }
   0x9   :  { %354 = vmatprep.subr.bf16.mxu1 %v385_v10  ;;  %v400_v26 = vld [vmem:[%s549_s1 + $0xa8] ss:$12 sps:$4 sm:$0xff]   ;;  %v402_v27 = vld [vmem:[%s549_s1 + $0xb0] ss:$12 sps:$4 sm:$0xff]   ;;  %v57_v33 = vsub.s32 0, %v56_v32  ;;  %v61_v35 = vsub.s32 1, %v56_v32 }
   0xa   :  { %366 = vmatprep.mubr.bf16.mxu1 %v19_v21  ;;  %v17_v28 = vld [vmem:[%s550_s0 + $0x10] sm:$0xff]  ;;  %v18_v29 = vld [vmem:[%s550_s0 + $0x18] sm:$0xff]  ;;  %v53_v34 = vld [vmem:[%s551_s2] sm:$0x7]  ;;  %v65_v36 = vsub.s32 2, %v56_v32 }
   0xb   :  { %203 = vmatpush1.bf16.msra.mxu0 %v380_v8  ;;  %v20_v30 = vpack.c.bf16 %v18_v29, %v17_v28  ;;  %v58_v37 = vrot.slane %v53_v34, %v57_v33  ;;  %v62_v38 = vrot.slane %v53_v34, %v61_v35 }
   0xc   :  { %204 = vmatprep.subr.bf16.mxu0 %v382_v9  ;;  %355 = vmatpush3.bf16.msra.mxu1 %v385_v10  ;;  %v66_v40 = vrot.slane %v53_v34, %v65_v36 }
   0xd   :  { %356 = vmatprep.subr.bf16.mxu1 %v389_v12 }
   0xf   :  { %205 = vmatpush1.bf16.msra.mxu0 %v384_v11 }
  0x10   :  { %206 = vmatprep.subr.bf16.mxu0 %v386_v13  ;;  %357 = vmatpush3.bf16.msra.mxu1 %v389_v12 }
  0x11   :  { %358 = vmatprep.subr.bf16.mxu1 %v393_v15 }
  0x13   :  { %207 = vmatpush1.bf16.msra.mxu0 %v388_v14 }
  0x14   :  { %208 = vmatprep.subr.bf16.mxu0 %v390_v16  ;;  %359 = vmatpush3.bf16.msra.mxu1 %v393_v15 }
  0x15   :  { %360 = vmatprep.subr.bf16.mxu1 %v397_v20 }
  0x17   :  { %209 = vmatpush1.bf16.msra.mxu0 %v392_v19 }
  0x18   :  { %210 = vmatprep.subr.bf16.mxu0 %v394_v22  ;;  %361 = vmatpush3.bf16.msra.mxu1 %v397_v20 }
  0x19   :  { %362 = vmatprep.subr.bf16.mxu1 %v401_v24 }
  0x1b   :  { %211 = vmatpush1.bf16.msra.mxu0 %v396_v23 }
  0x1c   :  { %212 = vmatprep.subr.bf16.mxu0 %v398_v25  ;;  %363 = vmatpush3.bf16.msra.mxu1 %v401_v24 }
  0x1d   :  { %364 = vmatprep.subr.bf16.mxu1 %v402_v27 }
  0x1f   :  { %213 = vmatpush1.bf16.msra.mxu0 %v400_v26 }
  0x20   :  { %365 = vmatpush3.bf16.msra.mxu1 %v402_v27 }
  0x22   :  { %231 = vmatmul.mubr.bf16.vlgmr.msra.gmra.mrb[0].mxu0 %v19_v21 }
  0x23   :  { %240 = vmatprep.mubr.bf16.mxu0 %v403_v1  ;;  %367 = vmatmul.mubr.bf16.vlgmr.msra.gmra.mrb[0].mxu1 %v20_v30 }
  0x2a   :  { %241 = vmatmul.mubr.bf16.gmra.mrb[4].mxu0 %v20_v30 }
  0xf5   :  { %v232_v39 = vpop.f32.mrb[0].mxu0 }
  0xf6   :  { %v233_v41 = vadd.f32 %v232_v39, %v58_v37  ;;  %v234_v42 = vpop.f32.mrb[1].mxu0  ;;  %v368_v47 = vpop.f32.mrb[0].mxu1 }
  0xf7   :  { %v235_v43 = vadd.f32 %v234_v42, %v62_v38  ;;  %v236_v44 = vpop.f32.mrb[2].mxu0  ;;  %v294_v49 = vadd.f32 %v368_v47, %v66_v40  ;;  %v285_v50 = vpop.f32.mrb[1].mxu1 }
  0xf8   :  { %300 = vst [vmem:[%s552_s3] sm:$0xff] %v233_v41  ;;  %v237_v45 = vadd.f32 %v236_v44, %v58_v37  ;;  %v238_v46 = vpop.f32.mrb[3].mxu0  ;;  %v286_v51 = vadd.f32 %v285_v50, %v66_v40  ;;  %v369_v52 = vpop.f32.mrb[2].mxu1 }
  0xf9   :  { %301 = vst [vmem:[%s552_s3 + $0x8] sm:$0xff] %v235_v43  ;;  %v239_v48 = vadd.f32 %v238_v46, %v62_v38  ;;  %308 = vst [vmem:[%s552_s3 + $0x40] sm:$0xff] %v294_v49  ;;  %v297_v53 = vadd.f32 %v369_v52, %v66_v40  ;;  %v288_v54 = vpop.f32.mrb[3].mxu1 }
  0xfa   :  { %303 = vst [vmem:[%s552_s3 + $0x18] sm:$0xff] %v237_v45  ;;  %302 = vst [vmem:[%s552_s3 + $0x10] sm:$0xff] %v286_v51  ;;  %v289_v55 = vadd.f32 %v288_v54, %v66_v40 }
  0xfb   :  { %304 = vst [vmem:[%s552_s3 + $0x20] sm:$0xff] %v239_v48  ;;  %311 = vst [vmem:[%s552_s3 + $0x58] sm:$0xff] %v297_v53 }
  0xfc   :  { %305 = vst [vmem:[%s552_s3 + $0x28] sm:$0xff] %v289_v55 }
  0xfd   :  { %v242_v56 = vpop.f32.mrb[4].mxu0 }
  0xfe   :  { %v243_v57 = vadd.f32 %v242_v56, %v58_v37  ;;  %v244_v58 = vpop.f32.mrb[5].mxu0 }
  0xff   :  { %v245_v59 = vadd.f32 %v244_v58, %v62_v38  ;;  %v246_v60 = vpop.f32.mrb[6].mxu0 }
 0x100   :  { %306 = vst [vmem:[%s552_s3 + $0x30] sm:$0xff] %v243_v57  ;;  %v247_v61 = vadd.f32 %v246_v60, %v58_v37  ;;  %v248_v62 = vpop.f32.mrb[7].mxu0 }
 0x101   :  { %307 = vst [vmem:[%s552_s3 + $0x38] sm:$0xff] %v245_v59  ;;  %v249_v63 = vadd.f32 %v248_v62, %v62_v38 }
 0x102   :  { %309 = vst [vmem:[%s552_s3 + $0x48] sm:$0xff] %v247_v61 }
 0x103   :  { %310 = vst [vmem:[%s552_s3 + $0x50] sm:$0xff] %v249_v63 }

// kernel: reverse.9
= control target key start
LH: loop header
LB: loop body
LE: loop exit
PB: predicated region body
PF: predicated region fallthrough
CT: control target
= control target key end

     0   :  { %v71_v3 = vlaneseq  ;;  %v64_v9 = vld [vmem:[#allocation0 + $0x7] ss:$-1 sm:$0xff]  ;;  %v78_v12 = vld [vmem:[#allocation0 + $0x17] ss:$-1 sm:$0xff]  ;;  %s329_s0 = inlined_call_operand.vmem [shape: f32[2,4,32,7], index: 0, kind: input, shape index: {}]   ;;  %s330_s1 = inlined_call_operand.vmem [shape: f32[2,4,32,7], index: 1, kind: output, shape index: {}]  }
   0x1   :  { %v44_v0 = vld [vmem:[%s329_s0] sm:$0xff]  ;;  %v46_v1 = vld [vmem:[%s329_s0 + $0x8] sm:$0xff]  ;;  %v48_v2 = vld [vmem:[%s329_s0 + $0x10] sm:$0xff]  ;;  %v65_v10 = vrot.slane %v64_v9, 1  ;;  %v79_v14 = vrot.slane %v78_v12, 1 }
   0x2   :  { %45 = vst [vmem:[#allocation0 + $0x8] sm:$0xff] %v44_v0  ;;  %47 = vst [vmem:[#allocation0 + $0x18] sm:$0xff] %v46_v1  ;;  %v50_v4 = vld [vmem:[%s329_s0 + $0x18] sm:$0xff]  ;;  %v52_v5 = vld [vmem:[%s329_s0 + $0x20] sm:$0xff]  ;;  %v72_v11 = vshrl.u32 %v71_v3, 7 }
   0x3   :  { %49 = vst [vmem:[#allocation0 + $0x28] sm:$0xff] %v48_v2  ;;  %v54_v6 = vld [vmem:[%s329_s0 + $0x28] sm:$0xff]  ;;  %51 = vst [vmem:[#allocation0 + $0x38] sm:$0xff] %v50_v4  ;;  %v56_v7 = vld [vmem:[%s329_s0 + $0x30] sm:$0xff] }
   0x4   :  { %53 = vst [vmem:[#allocation0 + $0x48] sm:$0xff] %v52_v5  ;;  %55 = vst [vmem:[#allocation0 + $0x58] sm:$0xff] %v54_v6  ;;  %v58_v8 = vld [vmem:[%s329_s0 + $0x38] sm:$0xff]  ;;  %v92_v13 = vld [vmem:[#allocation0 + $0x27] ss:$-1 sm:$0xff]  ;;  %vm73_vm0 = vcmp.lt.s32.totalorder %v72_v11, 7 }
   0x5   :  { %57 = vst [vmem:[#allocation0 + $0x68] sm:$0xff] %v56_v7  ;;  %59 = vst [vmem:[#allocation0 + $0x78] sm:$0xff] %v58_v8  ;;  %v93_v15 = vrot.slane %v92_v13, 1  ;;  %v106_v16 = vld [vmem:[#allocation0 + $0x37] ss:$-1 sm:$0xff] }
   0x6   :  { %66 = vst [vmem:[#allocation1] sm:$0xff] %v65_v10  ;;  %v107_v17 = vrot.slane %v106_v16, 1  ;;  %v120_v18 = vld [vmem:[#allocation0 + $0x47] ss:$-1 sm:$0xff]  ;;  %v134_v19 = vld [vmem:[#allocation0 + $0x57] ss:$-1 sm:$0xff] }
   0x7   :  { %80 = vst [vmem:[#allocation1 + $0x8] sm:$0xff] %v79_v14  ;;  %94 = vst [vmem:[#allocation1 + $0x10] sm:$0xff] %v93_v15  ;;  %v121_v20 = vrot.slane %v120_v18, 1  ;;  %v135_v21 = vrot.slane %v134_v19, 1  ;;  %v148_v22 = vld [vmem:[#allocation0 + $0x67] ss:$-1 sm:$0xff] }
   0x8   :  { %v162_v23 = vld [vmem:[#allocation0 + $0x77] ss:$-1 sm:$0xff]  ;;  %108 = vst [vmem:[#allocation1 + $0x18] sm:$0xff] %v107_v17  ;;  %v149_v24 = vrot.slane %v148_v22, 1 }
   0x9   :  { %v163_v25 = vrot.slane %v162_v23, 1  ;;  %v69_v26 = vld [vmem:[#allocation0 + $0xf] ss:$-1 sm:$0xff]  ;;  %v83_v27 = vld [vmem:[#allocation0 + $0x1f] ss:$-1 sm:$0xff]  ;;  %122 = vst [vmem:[#allocation1 + $0x20] sm:$0xff] %v121_v20 }
   0xa   :  { %v97_v28 = vld [vmem:[#allocation0 + $0x2f] ss:$-1 sm:$0xff]  ;;  %136 = vst [vmem:[#allocation1 + $0x28] sm:$0xff] %v135_v21  ;;  %v70_v29 = vrot.slane %v69_v26, 1  ;;  %v84_v30 = vrot.slane %v83_v27, 1  ;;  %150 = vst [vmem:[#allocation1 + $0x30] sm:$0xff] %v149_v24 }
   0xb   :  { %v98_v31 = vrot.slane %v97_v28, 1  ;;  %v111_v32 = vld [vmem:[#allocation0 + $0x3f] ss:$-1 sm:$0xff]  ;;  %164 = vst [vmem:[#allocation1 + $0x38] sm:$0xff] %v163_v25  ;;  %v125_v34 = vld [vmem:[#allocation0 + $0x4f] ss:$-1 sm:$0xff] }
   0xc   :  { %v112_v33 = vrot.slane %v111_v32, 1  ;;  %v139_v35 = vld [vmem:[#allocation0 + $0x5f] ss:$-1 sm:$0xff]  ;;  %74 = vst.msk [vmem:[#allocation1] sm:$0xff] %vm73_vm0, %v70_v29  ;;  %88 = vst.msk [vmem:[#allocation1 + $0x8] sm:$0xff] %vm73_vm0, %v84_v30  ;;  %v126_v36 = vrot.slane %v125_v34, 1 }
   0xd   :  { %102 = vst.msk [vmem:[#allocation1 + $0x10] sm:$0xff] %vm73_vm0, %v98_v31  ;;  %v140_v37 = vrot.slane %v139_v35, 1  ;;  %v153_v38 = vld [vmem:[#allocation0 + $0x6f] ss:$-1 sm:$0xff]  ;;  %v167_v39 = vld [vmem:[#allocation0 + $0x7f] ss:$-1 sm:$0xff] }
   0xe   :  { %116 = vst.msk [vmem:[#allocation1 + $0x18] sm:$0xff] %vm73_vm0, %v112_v33  ;;  %v154_v40 = vrot.slane %v153_v38, 1  ;;  %v168_v41 = vrot.slane %v167_v39, 1  ;;  %130 = vst.msk [vmem:[#allocation1 + $0x20] sm:$0xff] %vm73_vm0, %v126_v36 }
   0xf   :  { %144 = vst.msk [vmem:[#allocation1 + $0x28] sm:$0xff] %vm73_vm0, %v140_v37 }
  0x10   :  { %158 = vst.msk [vmem:[#allocation1 + $0x30] sm:$0xff] %vm73_vm0, %v154_v40  ;;  %172 = vst.msk [vmem:[#allocation1 + $0x38] sm:$0xff] %vm73_vm0, %v168_v41 }
  0x13   :  { %v214_v42 = vld [vmem:[#allocation1] sm:$0xff]  ;;  %v216_v43 = vld [vmem:[#allocation1 + $0x8] sm:$0xff] }
  0x14   :  { %v218_v44 = vld [vmem:[#allocation1 + $0x10] sm:$0xff]  ;;  %215 = vst [vmem:[%s330_s1] sm:$0xff] %v214_v42  ;;  %217 = vst [vmem:[%s330_s1 + $0x8] sm:$0xff] %v216_v43 }
  0x15   :  { %219 = vst [vmem:[%s330_s1 + $0x10] sm:$0xff] %v218_v44  ;;  %v220_v45 = vld [vmem:[#allocation1 + $0x18] sm:$0xff]  ;;  %v222_v46 = vld [vmem:[#allocation1 + $0x20] sm:$0xff] }
  0x16   :  { %221 = vst [vmem:[%s330_s1 + $0x18] sm:$0xff] %v220_v45  ;;  %v224_v47 = vld [vmem:[#allocation1 + $0x28] sm:$0xff]  ;;  %223 = vst [vmem:[%s330_s1 + $0x20] sm:$0xff] %v222_v46 }
  0x17   :  { %225 = vst [vmem:[%s330_s1 + $0x28] sm:$0xff] %v224_v47  ;;  %v226_v48 = vld [vmem:[#allocation1 + $0x30] sm:$0xff]  ;;  %v228_v49 = vld [vmem:[#allocation1 + $0x38] sm:$0xff] }
  0x18   :  { %227 = vst [vmem:[%s330_s1 + $0x30] sm:$0xff] %v226_v48  ;;  %229 = vst [vmem:[%s330_s1 + $0x38] sm:$0xff] %v228_v49 }

// kernel: autoformer_forward.31
= control target key start
LH: loop header
LB: loop body
LE: loop exit
PB: predicated region body
PF: predicated region fallthrough
CT: control target
= control target key end

     0   :  { %s337_s12 = smov 0   ;;  %s367_s0 = inlined_call_operand.vmem [shape: f32[2,16,128], index: 0, kind: input, shape index: {}]   ;;  %s368_s1 = inlined_call_operand.vmem [shape: f32[1,128], index: 1, kind: input, shape index: {}]   ;;  %s369_s2 = inlined_call_operand.vmem [shape: f32[1,128], index: 2, kind: input, shape index: {}]   ;;  %s370_s3 = inlined_call_operand.vmem [shape: f32[2,16,128], index: 3, kind: output, shape index: {}]  }
   0x1 LB: > { %s282_s13 = sadd.s32 4294967295, %s315_s12   ;;  %p286_p0 = scmp.ge.s32.totalorder %s315_s12, 1  ;;  %s315_s12 = sphi %s337_s12, %s13_s12  }
   0x2   : > { %p137_p1 = scmp.lt.s32.totalorder %s315_s12, 3 }
   0x4   : > { %p138_p2 = pnand %p286_p0, %p137_p1 }
   0x5   : > { %p161_p3 = scmp.lt.s32.totalorder (!%p138_p2), %s282_s13, 1  ;;  %v291_v18 = vld [vmem:[%s368_s1] ss:$0 sm:$0xff] (!%p138_p2) }
   0x6   : > { %141 = sbr.rel (%p138_p2) target bundleno = 351 (0x15f), region = 32  ;;  %v292_v22 = vld [vmem:[%s369_s2] ss:$0 sm:$0xff] (!%p138_p2) }
   0xd   : > { %s372_s13 = smov (!%p161_p3, %s282_s13), 1 }
   0xe   : > { %s295_s14 = sshll.u32 %s372_s13, 4 }
   0xf   : > { %s165_s17 = scalar_lea.vmem %s367_s0, %s295_s14  ;;  %s170_s24 = scalar_lea.vmem %s370_s3, %s295_s14 }
  0x10   : > { %v171_v0 = vld [vmem:[%s165_s17] sm:$0xff]  ;;  %v172_v1 = vld [vmem:[%s165_s17 + $0x8] sm:$0xff] }
  0x11   : > { %175 = vadd.xlane.f32.xlu0 %v171_v0 }
  0x15   : > { %177 = vadd.xlane.f32.xlu0 %v172_v1 }
  0x9e   : > { %v176_v2 = vpop.xlane.xlu0 %175 }
  0x9f   : > { %v180_v3 = vmul.f32 0.0078125, %v176_v2 }
  0xa1   : > { %v182_v4 = vsub.f32 %v171_v0, %v180_v3 }
  0xa2   : > { %v178_v5 = vpop.xlane.xlu0 %177 }
  0xa3   : > { %v181_v6 = vmul.f32 0.0078125, %v178_v5  ;;  %v184_v7 = vmul.f32 %v182_v4, %v182_v4 }
  0xa5   : > { %v183_v8 = vsub.f32 %v172_v1, %v181_v6  ;;  %186 = vadd.xlane.f32.xlu1 %v184_v7 }
  0xa7   : > { %v185_v9 = vmul.f32 %v183_v8, %v183_v8 }
  0xa9   : > { %188 = vadd.xlane.f32.xlu1 %v185_v9 }
 0x132   : > { %v187_v10 = vpop.xlane.xlu1 %186 }
 0x133   : > { %v190_v11 = vmul.f32 0.0078125, %v187_v10 }
 0x135   : > { %v192_v12 = vadd.f32 1e-05, %v190_v11 }
 0x136   : > { %v189_v13 = vpop.xlane.xlu1 %188 }
 0x137   : > { %305 = vrsqrt.f32 %v192_v12  ;;  %v191_v14 = vmul.f32 0.0078125, %v189_v13 }
 0x139   : > { %v193_v15 = vadd.f32 1e-05, %v191_v14 }
 0x13b   : > { %307 = vrsqrt.f32 %v193_v15 }
 0x141   : > { %v306_v16 = vpop.eup %305 }
 0x142   : > { %v196_v17 = vmul.f32 %v306_v16, %v182_v4 }
 0x144   : > { %v204_v20 = vmul.f32 %v291_v18, %v196_v17 }
 0x145   : > { %v308_v19 = vpop.eup %307 }
 0x146   : > { %v197_v21 = vmul.f32 %v308_v19, %v183_v8  ;;  %v212_v24 = vadd.f32 %v292_v22, %v204_v20 }
 0x148   : > { %v205_v23 = vmul.f32 %v291_v18, %v197_v21 }
 0x14a   : > { %v213_v25 = vadd.f32 %v292_v22, %v205_v23 }
 0x14c   : > { %v214_v26 = vadd.f32 %v213_v25, %v212_v24 }
 0x14e   : > { %v215_v27 = vrot.slane %v214_v26, 4 }
 0x150   : > { %v216_v28 = vadd.f32 %v215_v27, %v214_v26 }
 0x152   : > { %v217_v29 = vrot.slane %v216_v28, 2 }
 0x154   : > { %v218_v30 = vadd.f32 %v217_v29, %v216_v28 }
 0x156   : > { %v219_v31 = vrot.slane %v218_v30, 1 }
 0x158   : > { %v220_v32 = vadd.f32 %v219_v31, %v218_v30 }
 0x15a   : > { %v222_v33 = vmul.f32 0.0625, %v220_v32 }
 0x15c   : > { %v223_v34 = vsub.f32 %v212_v24, %v222_v33  ;;  %v224_v35 = vsub.f32 %v213_v25, %v222_v33 }
 0x15e   : > { %225 = vst [vmem:[%s170_s24] sm:$0xff] %v223_v34  ;;  %226 = vst [vmem:[%s170_s24 + $0x8] sm:$0xff] %v224_v35 }
 0x15f PF: > { %s13_s12 = sadd.s32 1, %s315_s12  }
 0x160   : > { %p10_p4 = scmp.ge.s32.totalorder %s13_s12, 4  }
 0x162   :  { %12 = sbr.rel (!%p10_p4) target bundleno = 1 (0x1), region = 62 }

// kernel: autoformer_forward.26
= control target key start
LH: loop header
LB: loop body
LE: loop exit
PB: predicated region body
PF: predicated region fallthrough
CT: control target
= control target key end

     0   :  { %10 = vsyncpa [#allocation3], 0  ;;  %s885_s0 = inlined_call_operand.vmem [shape: s32[2], index: 0, kind: input, shape index: {}]   ;;  %s886_s1 = inlined_call_operand.vmem [shape: f32[2,2], index: 1, kind: input, shape index: {}]   ;;  %s887_s2 = inlined_call_operand.vmem [shape: f32[2,16,128], index: 2, kind: input, shape index: {}]   ;;  %s888_s3 = inlined_call_operand.vmem [shape: bf16[128,128], index: 3, kind: input, shape index: {}]   ;;  %s889_s4 = inlined_call_operand.vmem [shape: f32[1,128], index: 4, kind: input, shape index: {}]   ;;  %s890_s5 = inlined_call_operand.vmem [shape: f32[2,16,128], index: 5, kind: output, shape index: {}]  }
   0x1   :  { %11 = vsyncpa [#allocation5], 0  ;;  %s765_s18 = smov 0  }
   0x2 LB: > { %s771_s19 = sadd.s32 4294967295, %s729_s18   ;;  %p572_p0 = scmp.ge.s32.totalorder %s729_s18, 1  ;;  %s729_s18 = sphi %s765_s18, %s17_s18  }
   0x3   : > { %p158_p1 = scmp.lt.s32.totalorder %s729_s18, 3  ;;  %s171_s22 = sshll.u32 %s885_s0, 4  ;;  %s172_s22 = int_to_ptr.vmem [resolvable:$true] %s171_s22 }
   0x4   : > { %p891_p3 = scmp.eq.s32.totalorder %s771_s19, 0  ;;  %s182_s26 = sshll.u32 %s886_s1, 4  ;;  %s183_s26 = int_to_ptr.vmem [resolvable:$true] %s182_s26 }
   0x5   : > { %p778_p2 = pnand %p572_p0, %p158_p1  ;;  %s685_s28 = scalar_lea.vmem %s172_s22, 16 }
   0x6   : > { %p686_p6 = scmp.ne.s32.totalorder %s172_s22, %s685_s28  ;;  %p693_p10 = scmp.lt.s32.totalorder %s172_s22, %s172_s22 }
   0x7   : > { %s893_s23 = scalar_select %p778_p2, 1, 0 }
   0x8   : > { %p654_p4 = pneg %p778_p2  ;;  %p694_p11 = scmp.lt.s32.totalorder %s685_s28, %s685_s28 }
   0xa   : > { %p790_p5 = pnand %p891_p3, %p654_p4  ;;  %p695_p12 = por %p694_p11, %p693_p10 }
   0xc   : > { %p687_p7 = pneg %p790_p5 }
   0xe   : > { %p688_p8 = pnand %p687_p7, %p686_p6 }
  0x10   : > { %p689_p9 = pneg %p688_p8 }
  0x12   : > { %p696_p13 = pnand %p695_p12, %p689_p9 }
  0x14   : > { %699 = shalt.err (!%p696_p13)
}
  0x15   : > { %s731_s29 = smov [#allocation2]   ;;  %s700_s30 = scalar_lea.vmem %s183_s26, 32 }
  0x16   : > { %657 = dma.vmem_to_smem (!%p790_p5), %s172_s22, 16, %s731_s29, [#allocation3]  }
  0x17   : > { %p701_p0 = scmp.ne.s32.totalorder %s183_s26, %s700_s30  ;;  %p708_p3 = scmp.lt.s32.totalorder %s183_s26, %s183_s26 }
  0x18   : > { %p709_p2 = scmp.lt.s32.totalorder %s700_s30, %s700_s30 }
  0x19   : > { %p703_p1 = pnand %p701_p0, %p687_p7 }
  0x1a   : > { %p710_p6 = por %p709_p2, %p708_p3 }
  0x1b   : > { %p704_p4 = pneg %p703_p1 }
  0x1d   : > { %p711_p8 = pnand %p710_p6, %p704_p4 }
  0x1f   : > { %714 = shalt.err (!%p711_p8)
}
  0x20   : > { %s732_s6 = smov [#allocation4]   ;;  %p895_p9 = scmp.ne.s32.totalorder %s893_s23, 0 }
  0x21   : > { %660 = dma.vmem_to_smem (!%p790_p5), %s183_s26, 32, %s732_s6, [#allocation5]  }
  0x22   : > { %209 = sbr.rel (%p895_p9) target bundleno = 496 (0x1f0), region = 40  ;;  %p896_p10 = scmp.eq.s32.totalorder (!%p895_p9), %s771_s19, 0 }
  0x29   : > { %720 = dma.done.wait (%p896_p10), [#allocation3], 16   ;;  %p897_p11 = pmov %p896_p10 }
  0x2a   : > { %p898_p7 = pmov %p896_p10 }
  0x2b   : > { %722 = vsyncadd (%p897_p11), [#allocation3], 4294967280 }
  0x2c   : > { %724 = dma.done.wait (%p898_p7), [#allocation5], 32   ;;  %p899_p2 = pmov %p898_p7 }
  0x2e   : > { %726 = vsyncadd (%p899_p2), [#allocation5], 4294967264 }
  0x2f   : > { %219 = sfence }
  0x30   : > { %p242_p3 = scmp.lt.s32.totalorder %s771_s19, 1  ;;  %v253_v0 = vlaneseq  ;;  %s811_s7 = sld [smem:[#allocation2]]  ;;  %v677_v1 = vld [vmem:[%s888_s3] sm:$0xff]   ;;  %v733_v2 = vmov 0.0   ;;  %v678_v5 = vld [vmem:[%s888_s3 + $0x8] sm:$0xff]   ;;  %v679_v8 = vld [vmem:[%s888_s3 + $0x10] sm:$0xff]  }
  0x31   : > { %s583_s10 = sshll.u32 %s771_s19, 7  ;;  %s817_s11 = sld [smem:[#allocation2 + $0x1]]  ;;  %622 = vmatprep.subr.bf16.mxu1 %v733_v2  ;;  %v680_v21 = vld [vmem:[%s888_s3 + $0x18] sm:$0xff]   ;;  %vm296_vm12 = vcmask 130048   ;;  %v681_v27 = vld [vmem:[%s888_s3 + $0x20] sm:$0xff]   ;;  %v682_v28 = vld [vmem:[%s888_s3 + $0x28] sm:$0xff]  }
  0x32   : > { %s903_s19 = smov (!%p242_p3, %s771_s19), 1  ;;  %v254_v3 = vshrl.u32 %v253_v0, 7  ;;  %v257_v4 = vand.u32 127, %v253_v0  ;;  %623 = vmatpush3.bf16.msra.mxu1 %v677_v1  ;;  %s826_s14 = sld [smem:[#allocation4 + %s583_s10]]  ;;  %v683_v29 = vld [vmem:[%s888_s3 + $0x30] sm:$0xff]   ;;  %v684_v30 = vld [vmem:[%s888_s3 + $0x38] sm:$0xff]  }
  0x33   : > { %s278_s15 = sadd.s32 1, %s583_s10  ;;  %624 = vmatprep.subr.bf16.mxu1 %v733_v2  ;;  %s600_s16 = sshll.u32 %s903_s19, 4  ;;  %vm734_vm13 = vmmov 0   ;;  %v589_v34 = vld [vmem:[%s889_s4] ss:$0 sm:$0xff] }
  0x34   : > { %v255_v6 = vadd.s32 8, %v254_v3  ;;  %v258_v7 = vsub.s32 %v257_v4, %v254_v3  ;;  %s830_s17 = sld [smem:[#allocation4 + %s278_s15]]  ;;  %s246_s24 = scalar_lea.vmem %s887_s2, %s600_s16  ;;  %638 = vmatprep.mubr.msk.bf16.mxu1 %vm734_vm13, %v733_v2 }
  0x35   : > { %v294_v9 = vld [vmem:[%s246_s24] sm:$0xff]  ;;  %v295_v10 = vld [vmem:[%s246_s24 + $0x8] sm:$0xff] }
  0x36   : > { %v259_v11 = vsub.s32 %v257_v4, %v255_v6  ;;  %v263_v12 = vstv %s811_s7  ;;  %s584_s25 = sadd.s32 4294967280, %s811_s7  ;;  %625 = vmatpush3.bf16.msra.mxu1 %v678_v5  ;;  %v642_v13 = vpack.c.bf16 %v295_v10, %v294_v9 }
  0x37   : > { %vm264_vm0 = vcmp.eq.s32.totalorder %v258_v7, %v263_v12  ;;  %v267_v14 = vstv %s584_s25  ;;  %v280_v15 = vstv %s817_s11  ;;  %s586_s26 = sadd.s32 4294967280, %s817_s11  ;;  %626 = vmatprep.subr.bf16.mxu1 %v733_v2 }
  0x38   : > { %vm265_vm1 = vcmp.eq.s32.totalorder %v259_v11, %v263_v12  ;;  %vm268_vm2 = vcmp.eq.s32.totalorder %v258_v7, %v267_v14  ;;  %vm269_vm3 = vcmp.eq.s32.totalorder %v259_v11, %v267_v14  ;;  %vm845_vm4 = vcmp.eq.s32.totalorder %v258_v7, %v280_v15  ;;  %643 = vmatprep.subr.bf16.mxu0 %v642_v13 }
  0x39   : > { %vm270_vm5 = vmor %vm264_vm0, %vm268_vm2  ;;  %v272_v17 = vstv %s826_s14  ;;  %vm282_vm6 = vcmp.eq.s32.totalorder %v259_v11, %v280_v15  ;;  %v284_v18 = vstv %s586_s26  ;;  %645 = vmatpush3.bf16.msra.mxu0 %v642_v13 }
  0x3a   : > { %vm271_vm7 = vmor %vm265_vm1, %vm269_vm3  ;;  %v273_v19 = vsel %vm270_vm5, %v272_v17, 0.0  ;;  %vm285_vm8 = vcmp.eq.s32.totalorder %v258_v7, %v284_v18  ;;  %vm286_vm9 = vcmp.eq.s32.totalorder %v259_v11, %v284_v18  ;;  %v289_v20 = vstv %s830_s17  ;;  %627 = vmatpush3.bf16.msra.mxu1 %v679_v8  ;;  %s251_s17 = scalar_lea.vmem %s890_s5, %s600_s16 }
  0x3b   : > { %v274_v22 = vsel %vm271_vm7, %v272_v17, 0.0  ;;  %vm287_vm10 = vmor %vm845_vm4, %vm285_vm8  ;;  %628 = vmatprep.subr.bf16.mxu1 %v733_v2 }
  0x3c   : > { %vm288_vm11 = vmor %vm282_vm6, %vm286_vm9  ;;  %v290_v23 = vsel %vm287_vm10, %v289_v20, 0.0 }
  0x3d   : > { %v291_v24 = vsel %vm288_vm11, %v289_v20, 0.0  ;;  %v292_v25 = vadd.f32 %v290_v23, %v273_v19 }
  0x3e   : > { %v293_v26 = vadd.f32 %v291_v24, %v274_v22  ;;  %629 = vmatpush3.bf16.msra.mxu1 %v680_v21 }
  0x3f   : > { %619 = vmatprep.mubr.msk.f32.mxu0 %vm296_vm12, %v292_v25  ;;  %630 = vmatprep.subr.bf16.mxu1 %v733_v2 }
  0x40   : > { %620 = vmatmul.mubr.msk.f32.vlgmr.msra.gmra.mrb[0].mxu0 %vm296_vm12, %v293_v26 }
  0x42   : > { %631 = vmatpush3.bf16.msra.mxu1 %v681_v27 }
  0x43   : > { %632 = vmatprep.subr.bf16.mxu1 %v733_v2 }
  0x46   : > { %633 = vmatpush3.bf16.msra.mxu1 %v682_v28 }
  0x47   : > { %634 = vmatprep.subr.bf16.mxu1 %v733_v2 }
  0x4a   : > { %635 = vmatpush3.bf16.msra.mxu1 %v683_v29 }
  0x4b   : > { %636 = vmatprep.subr.bf16.mxu1 %v733_v2 }
  0x4e   : > { %637 = vmatpush3.bf16.msra.mxu1 %v684_v30 }
 0x113   : > { %v621_v31 = vpop.f32.mrb[0].mxu0 }
 0x114   : > { %v369_v32 = vpop.f32.mrb[1].mxu0 }
 0x115   : > { %v378_v33 = vpack.c.bf16 %v621_v31, %v369_v32 }
 0x117   : > { %639 = vmatmul.mubr.bf16.vlgmr.msra.gmra.mrb[0].mxu1 %v378_v33 }
 0x1ea   : > { %v484_v35 = vpop.f32.mrb[0].mxu1 }
 0x1eb   : > { %v485_v36 = vadd.f32 %v589_v34, %v484_v35  ;;  %v640_v37 = vpop.f32.mrb[1].mxu1 }
 0x1ec   : > { %v487_v38 = vpop.f32.mrb[2].mxu1 }
 0x1ed   : > { %491 = vst [vmem:[%s251_s17] sm:$0xff] %v485_v36  ;;  %v488_v39 = vadd.f32 %v589_v34, %v487_v38  ;;  %v641_v40 = vpop.f32.mrb[3].mxu1 }
 0x1ef   : > { %492 = vst [vmem:[%s251_s17 + $0x8] sm:$0xff] %v488_v39 }
 0x1f0 PF: > { %s17_s18 = sadd.s32 1, %s729_s18  }
 0x1f1   : > { %p14_p5 = scmp.ge.s32.totalorder %s17_s18, 4  }
 0x1f3   :  { %16 = sbr.rel (!%p14_p5) target bundleno = 2 (0x2), region = 79 }
 0x1fa   :  { %514 = vsyncpa [#allocation3], 1 }
 0x1fb   :  { %516 = vsyncpa [#allocation3 + $0x1], 1 }
 0x1fc   :  { %517 = vsyncpa [#allocation5], 1 }

// kernel: autoformer_forward.32
= control target key start
LH: loop header
LB: loop body
LE: loop exit
PB: predicated region body
PF: predicated region fallthrough
CT: control target
= control target key end

     0   :  { %v251_v1 = vmov 0   ;;  %v39_v23 = vlaneseq  ;;  %s359_s1 = inlined_call_operand.vmem [shape: bf16[128,256], index: 1, kind: input, shape index: {}]   ;;  %s360_s0 = inlined_call_operand.vmem [shape: f32[32,128], index: 0, kind: input, shape index: {}]   ;;  %s361_s2 = inlined_call_operand.vmem [shape: f32[1,256], index: 2, kind: input, shape index: {}]   ;;  %s362_s3 = inlined_call_operand.vmem [shape: f32[32,256], index: 3, kind: output, shape index: {}]  }
   0x1   :  { %v227_v0 = vld [vmem:[%s359_s1 + $0x4] ss:$8 sps:$4 sm:$0xff]   ;;  %161 = vmatprep.mubr.bf16.mxu0 %v251_v1  ;;  %171 = vmatprep.mubr.bf16.mxu1 %v251_v1  ;;  %v229_v2 = vld [vmem:[%s359_s1] ss:$8 sps:$4 sm:$0xff]   ;;  %v230_v3 = vld [vmem:[%s359_s1 + $0x14] ss:$8 sps:$4 sm:$0xff]  }
   0x2   :  { %129 = vmatprep.subr.bf16.mxu0 %v227_v0  ;;  %210 = vmatprep.subr.bf16.mxu1 %v227_v0  ;;  %v232_v4 = vld [vmem:[%s359_s1 + $0x10] ss:$8 sps:$4 sm:$0xff]   ;;  %v233_v5 = vld [vmem:[%s359_s1 + $0x24] ss:$8 sps:$4 sm:$0xff]   ;;  %v235_v6 = vld [vmem:[%s359_s1 + $0x20] ss:$8 sps:$4 sm:$0xff]  }
   0x3   :  { %130 = vmatpush1.bf16.msra.mxu0 %v229_v2  ;;  %218 = vmatpush1.bf16.msra.mxu1 %v229_v2  ;;  %v236_v7 = vld [vmem:[%s359_s1 + $0x34] ss:$8 sps:$4 sm:$0xff]   ;;  %v238_v8 = vld [vmem:[%s359_s1 + $0x30] ss:$8 sps:$4 sm:$0xff]   ;;  %v239_v9 = vld [vmem:[%s359_s1 + $0x44] ss:$8 sps:$4 sm:$0xff]  }
   0x4   :  { %131 = vmatprep.subr.bf16.mxu0 %v230_v3  ;;  %211 = vmatprep.subr.bf16.mxu1 %v230_v3  ;;  %v241_v10 = vld [vmem:[%s359_s1 + $0x40] ss:$8 sps:$4 sm:$0xff]   ;;  %v242_v11 = vld [vmem:[%s359_s1 + $0x54] ss:$8 sps:$4 sm:$0xff]   ;;  %v244_v12 = vld [vmem:[%s359_s1 + $0x50] ss:$8 sps:$4 sm:$0xff]  }
   0x5   :  { %v245_v13 = vld [vmem:[%s359_s1 + $0x64] ss:$8 sps:$4 sm:$0xff]   ;;  %v247_v14 = vld [vmem:[%s359_s1 + $0x60] ss:$8 sps:$4 sm:$0xff]   ;;  %v248_v15 = vld [vmem:[%s359_s1 + $0x74] ss:$8 sps:$4 sm:$0xff]  }
   0x6   :  { %v250_v16 = vld [vmem:[%s359_s1 + $0x70] ss:$8 sps:$4 sm:$0xff]   ;;  %v15_v17 = vld [vmem:[%s360_s0] sm:$0xff]  ;;  %v16_v18 = vld [vmem:[%s360_s0 + $0x8] sm:$0xff]  ;;  %v40_v24 = vshrl.u32 %v39_v23, 7 }
   0x7   :  { %132 = vmatpush1.bf16.msra.mxu0 %v232_v4  ;;  %219 = vmatpush1.bf16.msra.mxu1 %v232_v4  ;;  %v17_v19 = vld [vmem:[%s360_s0 + $0x10] sm:$0xff]  ;;  %v18_v20 = vld [vmem:[%s360_s0 + $0x18] sm:$0xff]  ;;  %v19_v21 = vpack.c.bf16 %v16_v18, %v15_v17  ;;  %v37_v26 = vld [vmem:[%s361_s2] sm:$0x3] }
   0x8   :  { %133 = vmatprep.subr.bf16.mxu0 %v233_v5  ;;  %212 = vmatprep.subr.bf16.mxu1 %v233_v5  ;;  %v20_v22 = vpack.c.bf16 %v18_v20, %v17_v19  ;;  %v41_v25 = vsub.s32 0, %v40_v24  ;;  %v45_v27 = vsub.s32 1, %v40_v24 }
   0xa   :  { %v42_v28 = vrot.slane %v37_v26, %v41_v25  ;;  %v46_v29 = vrot.slane %v37_v26, %v45_v27 }
   0xb   :  { %134 = vmatpush1.bf16.msra.mxu0 %v235_v6  ;;  %220 = vmatpush1.bf16.msra.mxu1 %v235_v6 }
   0xc   :  { %135 = vmatprep.subr.bf16.mxu0 %v236_v7  ;;  %213 = vmatprep.subr.bf16.mxu1 %v236_v7 }
   0xf   :  { %136 = vmatpush1.bf16.msra.mxu0 %v238_v8  ;;  %221 = vmatpush1.bf16.msra.mxu1 %v238_v8 }
  0x10   :  { %137 = vmatprep.subr.bf16.mxu0 %v239_v9  ;;  %214 = vmatprep.subr.bf16.mxu1 %v239_v9 }
  0x13   :  { %138 = vmatpush1.bf16.msra.mxu0 %v241_v10  ;;  %222 = vmatpush1.bf16.msra.mxu1 %v241_v10 }
  0x14   :  { %139 = vmatprep.subr.bf16.mxu0 %v242_v11  ;;  %215 = vmatprep.subr.bf16.mxu1 %v242_v11 }
  0x17   :  { %140 = vmatpush1.bf16.msra.mxu0 %v244_v12  ;;  %223 = vmatpush1.bf16.msra.mxu1 %v244_v12 }
  0x18   :  { %141 = vmatprep.subr.bf16.mxu0 %v245_v13  ;;  %216 = vmatprep.subr.bf16.mxu1 %v245_v13 }
  0x1b   :  { %142 = vmatpush1.bf16.msra.mxu0 %v247_v14  ;;  %224 = vmatpush1.bf16.msra.mxu1 %v247_v14 }
  0x1c   :  { %143 = vmatprep.subr.bf16.mxu0 %v248_v15  ;;  %217 = vmatprep.subr.bf16.mxu1 %v248_v15 }
  0x1f   :  { %144 = vmatpush1.bf16.msra.mxu0 %v250_v16  ;;  %225 = vmatpush1.bf16.msra.mxu1 %v250_v16 }
  0x22   :  { %162 = vmatmul.mubr.bf16.vlgmr.msra.gmra.mrb[0].mxu0 %v19_v21  ;;  %172 = vmatmul.mubr.bf16.vlgmr.msra.gmra.mrb[0].mxu1 %v20_v22 }
  0xf5   :  { %v163_v30 = vpop.f32.mrb[0].mxu0  ;;  %v173_v31 = vpop.f32.mrb[0].mxu1 }
  0xf6   :  { %v164_v32 = vadd.f32 %v163_v30, %v42_v28  ;;  %v174_v33 = vadd.f32 %v173_v31, %v42_v28  ;;  %v165_v34 = vpop.f32.mrb[1].mxu0  ;;  %v175_v35 = vpop.f32.mrb[1].mxu1 }
  0xf7   :  { %v166_v36 = vadd.f32 %v165_v34, %v46_v29  ;;  %v176_v37 = vadd.f32 %v175_v35, %v46_v29  ;;  %v167_v38 = vpop.f32.mrb[2].mxu0  ;;  %v177_v39 = vpop.f32.mrb[2].mxu1 }
  0xf8   :  { %182 = vst [vmem:[%s362_s3] sm:$0xff] %v164_v32  ;;  %186 = vst [vmem:[%s362_s3 + $0x20] sm:$0xff] %v174_v33  ;;  %v168_v40 = vadd.f32 %v167_v38, %v42_v28  ;;  %v178_v41 = vadd.f32 %v177_v39, %v42_v28  ;;  %v169_v42 = vpop.f32.mrb[3].mxu0  ;;  %v179_v43 = vpop.f32.mrb[3].mxu1 }
  0xf9   :  { %183 = vst [vmem:[%s362_s3 + $0x8] sm:$0xff] %v166_v36  ;;  %187 = vst [vmem:[%s362_s3 + $0x28] sm:$0xff] %v176_v37  ;;  %v170_v44 = vadd.f32 %v169_v42, %v46_v29  ;;  %v180_v45 = vadd.f32 %v179_v43, %v46_v29 }
  0xfa   :  { %184 = vst [vmem:[%s362_s3 + $0x10] sm:$0xff] %v168_v40  ;;  %188 = vst [vmem:[%s362_s3 + $0x30] sm:$0xff] %v178_v41 }
  0xfb   :  { %185 = vst [vmem:[%s362_s3 + $0x18] sm:$0xff] %v170_v44  ;;  %189 = vst [vmem:[%s362_s3 + $0x38] sm:$0xff] %v180_v45 }

// kernel: autoformer_forward.27
= control target key start
LH: loop header
LB: loop body
LE: loop exit
PB: predicated region body
PF: predicated region fallthrough
CT: control target
= control target key end

     0   :  { %s884_s15 = smov 0   ;;  %s1041_s0 = inlined_call_operand.vmem [shape: f32[2,16,128], index: 0, kind: input, shape index: {}]   ;;  %s1042_s1 = inlined_call_operand.vmem [shape: f32[2,16,128], index: 1, kind: input, shape index: {}]   ;;  %s1043_s2 = inlined_call_operand.vmem [shape: bf16[128,256], index: 2, kind: input, shape index: {}]   ;;  %s1044_s3 = inlined_call_operand.vmem [shape: bf16[256,128], index: 3, kind: input, shape index: {}]   ;;  %s1045_s4 = inlined_call_operand.vmem [shape: f32[2,16,128], index: 4, kind: output, shape index: {}]  }
   0x1 LB: > { %s723_s16 = sadd.s32 4294967295, %s856_s15   ;;  %p727_p0 = scmp.ge.s32.totalorder %s856_s15, 1  ;;  %s856_s15 = sphi %s884_s15, %s14_s15  }
   0x2   : > { %p172_p1 = scmp.lt.s32.totalorder %s856_s15, 3 }
   0x4   : > { %p173_p2 = pnand %p727_p0, %p172_p1 }
   0x5   : > { %v802_v0 = vld [vmem:[%s1043_s2 + $0x4] ss:$8 sps:$4 sm:$0xff] (!%p173_p2)   ;;  %p203_p3 = scmp.lt.s32.totalorder (!%p173_p2), %s723_s16, 1  ;;  %v804_v1 = vld [vmem:[%s1043_s2] ss:$8 sps:$4 sm:$0xff] (!%p173_p2)   ;;  %v858_v2 = vmov (!%p173_p2), 0   ;;  %v245_v5 = vlaneseq (!%p173_p2) }
   0x6   : > { %176 = sbr.rel (%p173_p2) target bundleno = 508 (0x1fc), region = 36  ;;  %404 = vmatprep.mubr.bf16.mxu0 (!%p173_p2), %v858_v2  ;;  %372 = vmatprep.subr.bf16.mxu0 (!%p173_p2), %v802_v0  ;;  %v805_v3 = vld [vmem:[%s1043_s2 + $0x14] ss:$8 sps:$4 sm:$0xff] (!%p173_p2)   ;;  %v807_v4 = vld [vmem:[%s1043_s2 + $0x10] ss:$8 sps:$4 sm:$0xff] (!%p173_p2)   ;;  %vm227_vm0 = vcmask (!%p173_p2), 1040384  }
   0x7   : > { %373 = vmatpush1.bf16.msra.mxu0 (!%p173_p2), %v804_v1  ;;  %v808_v6 = vld [vmem:[%s1043_s2 + $0x24] ss:$8 sps:$4 sm:$0xff] (!%p173_p2)   ;;  %v810_v7 = vld [vmem:[%s1043_s2 + $0x20] ss:$8 sps:$4 sm:$0xff] (!%p173_p2)   ;;  %v916_v8 = vshrl.u32 (!%p173_p2), %v245_v5, 7  ;;  %vm236_vm1 = vcmask (!%p173_p2), 1046528  }
   0x8   : > { %374 = vmatprep.subr.bf16.mxu0 (!%p173_p2), %v805_v3  ;;  %v811_v9 = vld [vmem:[%s1043_s2 + $0x34] ss:$8 sps:$4 sm:$0xff] (!%p173_p2)   ;;  %v813_v10 = vld [vmem:[%s1043_s2 + $0x30] ss:$8 sps:$4 sm:$0xff] (!%p173_p2)   ;;  %v814_v11 = vld [vmem:[%s1043_s2 + $0x44] ss:$8 sps:$4 sm:$0xff] (!%p173_p2)  }
   0x9   : > { %v247_v16 = vsub.s32 (!%p173_p2), 0, %v916_v8  ;;  %v251_v17 = vsub.s32 (!%p173_p2), 7, %v916_v8  ;;  %vm253_vm2 = vcmask (!%p173_p2), 1041408   ;;  %v826_v20 = vld [vmem:[%s1044_s3 + $0x40] sm:$0xff] (!%p173_p2)   ;;  %vm262_vm3 = vcmask (!%p173_p2), 1045504   ;;  %v828_v32 = vld [vmem:[%s1044_s3 + $0x48] sm:$0xff] (!%p173_p2)  }
   0xa   : > { %v816_v21 = vld [vmem:[%s1043_s2 + $0x40] ss:$8 sps:$4 sm:$0xff] (!%p173_p2)   ;;  %v817_v23 = vld [vmem:[%s1043_s2 + $0x54] ss:$8 sps:$4 sm:$0xff] (!%p173_p2)   ;;  %771 = vmatprep.subr.bf16.mxu1 (!%p173_p2), %v826_v20  ;;  %v819_v38 = vld [vmem:[%s1043_s2 + $0x50] ss:$8 sps:$4 sm:$0xff] (!%p173_p2)  }
   0xb   : > { %375 = vmatpush1.bf16.msra.mxu0 (!%p173_p2), %v807_v4  ;;  %v827_v22 = vld [vmem:[%s1044_s3] sm:$0xff] (!%p173_p2)   ;;  %v829_v33 = vld [vmem:[%s1044_s3 + $0x8] sm:$0xff] (!%p173_p2)   ;;  %v823_v53 = vld [vmem:[%s1043_s2 + $0x74] ss:$8 sps:$4 sm:$0xff] (!%p173_p2)  }
   0xc   : > { %376 = vmatprep.subr.bf16.mxu0 (!%p173_p2), %v808_v6  ;;  %772 = vmatpush3.bf16.msra.mxu1 (!%p173_p2), %v827_v22  ;;  %v820_v41 = vld [vmem:[%s1043_s2 + $0x64] ss:$8 sps:$4 sm:$0xff] (!%p173_p2)   ;;  %v822_v50 = vld [vmem:[%s1043_s2 + $0x60] ss:$8 sps:$4 sm:$0xff] (!%p173_p2)   ;;  %v825_v58 = vld [vmem:[%s1043_s2 + $0x70] ss:$8 sps:$4 sm:$0xff] (!%p173_p2)  }
   0xd   : > { %s1047_s16 = smov (!%p203_p3, %s723_s16), 1  ;;  %773 = vmatprep.subr.bf16.mxu1 %v828_v32  ;;  %v830_v62 = vld [vmem:[%s1044_s3 + $0x50] sm:$0xff]   ;;  %v832_v0 = vld [vmem:[%s1044_s3 + $0x58] sm:$0xff]   ;;  %v834_v2 = vld [vmem:[%s1044_s3 + $0x60] sm:$0xff]  }
   0xe   : > { %s907_s27 = sshll.u32 %s1047_s16, 4  ;;  %v831_v63 = vld [vmem:[%s1044_s3 + $0x10] sm:$0xff]   ;;  %v833_v1 = vld [vmem:[%s1044_s3 + $0x18] sm:$0xff]   ;;  %v835_v3 = vld [vmem:[%s1044_s3 + $0x20] sm:$0xff]  }
   0xf   : > { %s207_s6 = scalar_lea.vmem %s1041_s0, %s907_s27  ;;  %s212_s11 = scalar_lea.vmem %s1042_s1, %s907_s27  ;;  %377 = vmatpush1.bf16.msra.mxu0 %v810_v7  ;;  %v836_v4 = vld [vmem:[%s1044_s3 + $0x68] sm:$0xff]   ;;  %v838_v6 = vld [vmem:[%s1044_s3 + $0x70] sm:$0xff]  }
  0x10   : > { %v219_v12 = vld [vmem:[%s207_s6] sm:$0xff]  ;;  %v220_v13 = vld [vmem:[%s207_s6 + $0x8] sm:$0xff]  ;;  %378 = vmatprep.subr.bf16.mxu0 %v811_v9  ;;  %774 = vmatpush3.bf16.msra.mxu1 %v829_v33  ;;  %v839_v7 = vld [vmem:[%s1044_s3 + $0x30] sm:$0xff]   ;;  %s217_s17 = scalar_lea.vmem %s1045_s4, %s907_s27 }
  0x11   : > { %v221_v14 = vld [vmem:[%s212_s11] sm:$0xff]  ;;  %v222_v15 = vld [vmem:[%s212_s11 + $0x8] sm:$0xff]  ;;  %775 = vmatprep.subr.bf16.mxu1 %v830_v62  ;;  %v840_v9 = vld [vmem:[%s1044_s3 + $0x78] sm:$0xff]  }
  0x12   : > { %v223_v18 = vadd.f32 %v221_v14, %v219_v12  ;;  %v224_v19 = vadd.f32 %v222_v15, %v220_v13  ;;  %v837_v5 = vld [vmem:[%s1044_s3 + $0x28] sm:$0xff]  }
  0x13   : > { %379 = vmatpush1.bf16.msra.mxu0 %v813_v10  ;;  %v841_v10 = vld [vmem:[%s1044_s3 + $0x38] sm:$0xff]  }
  0x14   : > { %v228_v24 = vrot.slane %v223_v18, 7  ;;  %v229_v25 = vrot.slane %v224_v19, 7  ;;  %v237_v26 = vrot.slane %v223_v18, 1  ;;  %v238_v27 = vrot.slane %v224_v19, 1  ;;  %380 = vmatprep.subr.bf16.mxu0 %v814_v11  ;;  %776 = vmatpush3.bf16.msra.mxu1 %v831_v63 }
  0x15   : > { %v248_v28 = vrot.slane %v223_v18, %v247_v16  ;;  %v252_v29 = vrot.slane %v224_v19, %v251_v17  ;;  %v254_v30 = vrot.slane %v223_v18, 6  ;;  %v255_v31 = vrot.slane %v224_v19, 6  ;;  %777 = vmatprep.subr.bf16.mxu1 %v832_v0 }
  0x16   : > { %v230_v34 = vsel %vm227_vm0, %v228_v24, %v229_v25  ;;  %v233_v35 = vsel %vm227_vm0, %v223_v18, %v228_v24  ;;  %v239_v36 = vsel %vm236_vm1, %v237_v26, %v238_v27  ;;  %v242_v37 = vsel %vm236_vm1, %v238_v27, %v224_v19 }
  0x17   : > { %v234_v39 = vadd.f32 %v233_v35, %v223_v18  ;;  %v235_v40 = vadd.f32 %v230_v34, %v224_v19  ;;  %v256_v42 = vsel %vm253_vm2, %v254_v30, %v255_v31  ;;  %v259_v43 = vsel %vm253_vm2, %v248_v28, %v254_v30  ;;  %381 = vmatpush1.bf16.msra.mxu0 %v816_v21 }
  0x18   : > { %v263_v44 = vrot.slane %v223_v18, 2  ;;  %v264_v45 = vrot.slane %v224_v19, 2  ;;  %382 = vmatprep.subr.bf16.mxu0 %v817_v23  ;;  %778 = vmatpush3.bf16.msra.mxu1 %v833_v1 }
  0x19   : > { %v243_v46 = vadd.f32 %v239_v36, %v234_v39  ;;  %v244_v47 = vadd.f32 %v242_v37, %v235_v40  ;;  %779 = vmatprep.subr.bf16.mxu1 %v834_v2 }
  0x1a   : > { %v265_v48 = vsel %vm262_vm3, %v263_v44, %v264_v45  ;;  %v268_v49 = vsel %vm262_vm3, %v264_v45, %v252_v29 }
  0x1b   : > { %v260_v51 = vadd.f32 %v259_v43, %v243_v46  ;;  %v261_v52 = vadd.f32 %v256_v42, %v244_v47  ;;  %383 = vmatpush1.bf16.msra.mxu0 %v819_v38 }
  0x1c   : > { %384 = vmatprep.subr.bf16.mxu0 %v820_v41  ;;  %780 = vmatpush3.bf16.msra.mxu1 %v835_v3 }
  0x1d   : > { %v269_v54 = vadd.f32 %v265_v48, %v260_v51  ;;  %v270_v55 = vadd.f32 %v268_v49, %v261_v52  ;;  %781 = vmatprep.subr.bf16.mxu1 %v836_v4 }
  0x1f   : > { %v271_v56 = vmul.f32 0.2, %v269_v54  ;;  %v272_v57 = vmul.f32 0.2, %v270_v55  ;;  %385 = vmatpush1.bf16.msra.mxu0 %v822_v50 }
  0x20   : > { %386 = vmatprep.subr.bf16.mxu0 %v823_v53  ;;  %782 = vmatpush3.bf16.msra.mxu1 %v837_v5 }
  0x21   : > { %v978_v59 = vsub.f32 %v223_v18, %v271_v56  ;;  %v980_v60 = vsub.f32 %v224_v19, %v272_v57  ;;  %783 = vmatprep.subr.bf16.mxu1 %v838_v6 }
  0x23   : > { %v275_v61 = vpack.c.bf16 %v980_v60, %v978_v59  ;;  %387 = vmatpush1.bf16.msra.mxu0 %v825_v58 }
  0x24   : > { %784 = vmatpush3.bf16.msra.mxu1 %v839_v7 }
  0x25   : > { %785 = vmatprep.subr.bf16.mxu1 %v840_v9 }
  0x26   : > { %405 = vmatmul.mubr.bf16.vlgmr.msra.gmra.mrb[0].mxu0 %v275_v61 }
  0x28   : > { %786 = vmatpush3.bf16.msra.mxu1 %v841_v10 }
  0xf9   : > { %v406_v11 = vpop.f32.mrb[0].mxu0 }
  0xfa   : > { %v419_v12 = vmul.f32 0.70710677, %v406_v11  ;;  %v408_v13 = vpop.f32.mrb[1].mxu0  ;;  %v415_v27 = vmul.f32 0.5, %v406_v11 }
  0xfb   : > { %v420_v14 = vmul.f32 0.70710677, %v408_v13  ;;  %v410_v15 = vpop.f32.mrb[2].mxu0  ;;  %v416_v30 = vmul.f32 0.5, %v408_v13 }
  0xfc   : > { %842 = verf.f32 %v419_v12  ;;  %v421_v18 = vmul.f32 0.70710677, %v410_v15  ;;  %v412_v19 = vpop.f32.mrb[3].mxu0  ;;  %v417_v28 = vmul.f32 0.5, %v410_v15 }
  0xfd   : > { %844 = verf.f32 %v420_v14  ;;  %v422_v20 = vmul.f32 0.70710677, %v412_v19  ;;  %v418_v31 = vmul.f32 0.5, %v412_v19 }
  0xfe   : > { %846 = verf.f32 %v421_v18 }
  0xff   : > { %848 = verf.f32 %v422_v20 }
 0x106   : > { %v843_v21 = vpop.eup %842 }
 0x107   : > { %v845_v22 = vpop.eup %844  ;;  %v427_v23 = vadd.f32 1.0, %v843_v21 }
 0x108   : > { %v847_v24 = vpop.eup %846  ;;  %v428_v25 = vadd.f32 1.0, %v845_v22 }
 0x109   : > { %v849_v26 = vpop.eup %848  ;;  %v429_v29 = vadd.f32 1.0, %v847_v24  ;;  %v431_v33 = vmul.f32 %v427_v23, %v415_v27 }
 0x10a   : > { %v430_v32 = vadd.f32 1.0, %v849_v26  ;;  %v432_v35 = vmul.f32 %v428_v25, %v416_v30 }
 0x10b   : > { %v433_v34 = vmul.f32 %v429_v29, %v417_v28 }
 0x10c   : > { %v434_v36 = vmul.f32 %v430_v32, %v418_v31 }
 0x10d   : > { %v435_v37 = vpack.c.bf16 %v433_v34, %v431_v33 }
 0x10e   : > { %v436_v38 = vpack.c.bf16 %v434_v36, %v432_v35 }
 0x110   : > { %597 = vmatprep.mubr.bf16.mxu1 %v436_v38 }
 0x111   : > { %598 = vmatmul.mubr.bf16.vlgmr.msra.gmra.mrb[0].mxu1 %v435_v37 }
 0x1e4   : > { %v787_v39 = vpop.f32.mrb[0].mxu1 }
 0x1e5   : > { %v788_v40 = vpop.f32.mrb[1].mxu1 }
 0x1e6   : > { %v789_v41 = vadd.f32 %v788_v40, %v787_v39  ;;  %v790_v42 = vpop.f32.mrb[2].mxu1 }
 0x1e7   : > { %v791_v43 = vpop.f32.mrb[3].mxu1 }
 0x1e8   : > { %v606_v44 = vadd.f32 %v789_v41, %v978_v59  ;;  %v792_v45 = vadd.f32 %v791_v43, %v790_v42 }
 0x1ea   : > { %v610_v46 = vrot.slane %v606_v44, 7  ;;  %v607_v47 = vadd.f32 %v792_v45, %v980_v60  ;;  %v618_v49 = vrot.slane %v606_v44, 1  ;;  %v629_v50 = vrot.slane %v606_v44, %v247_v16 }
 0x1eb   : > { %v634_v52 = vrot.slane %v606_v44, 6  ;;  %v642_v55 = vrot.slane %v606_v44, 2 }
 0x1ec   : > { %v615_v48 = vsel %vm227_vm0, %v606_v44, %v610_v46  ;;  %v611_v53 = vrot.slane %v607_v47, 7  ;;  %v619_v54 = vrot.slane %v607_v47, 1  ;;  %v635_v56 = vrot.slane %v607_v47, 6 }
 0x1ed   : > { %v616_v51 = vadd.f32 %v615_v48, %v606_v44  ;;  %v643_v57 = vrot.slane %v607_v47, 2  ;;  %v639_v16 = vsel %vm253_vm2, %v629_v50, %v634_v52  ;;  %v633_v1 = vrot.slane %v607_v47, %v251_v17 }
 0x1ee   : > { %v612_v58 = vsel %vm227_vm0, %v610_v46, %v611_v53  ;;  %v620_v59 = vsel %vm236_vm1, %v618_v49, %v619_v54  ;;  %v636_v62 = vsel %vm253_vm2, %v634_v52, %v635_v56  ;;  %v623_v0 = vsel %vm236_vm1, %v619_v54, %v607_v47 }
 0x1ef   : > { %v617_v61 = vadd.f32 %v612_v58, %v607_v47  ;;  %v624_v60 = vadd.f32 %v620_v59, %v616_v51  ;;  %v644_v63 = vsel %vm262_vm3, %v642_v55, %v643_v57  ;;  %v647_v6 = vsel %vm262_vm3, %v643_v57, %v633_v1 }
 0x1f1   : > { %v625_v2 = vadd.f32 %v623_v0, %v617_v61  ;;  %v640_v3 = vadd.f32 %v639_v16, %v624_v60 }
 0x1f3   : > { %v641_v4 = vadd.f32 %v636_v62, %v625_v2  ;;  %v648_v5 = vadd.f32 %v644_v63, %v640_v3 }
 0x1f5   : > { %v649_v7 = vadd.f32 %v647_v6, %v641_v4  ;;  %v650_v9 = vmul.f32 0.2, %v648_v5 }
 0x1f7   : > { %v651_v10 = vmul.f32 0.2, %v649_v7  ;;  %v652_v11 = vsub.f32 %v606_v44, %v650_v9 }
 0x1f9   : > { %v653_v12 = vsub.f32 %v607_v47, %v651_v10  ;;  %654 = vst [vmem:[%s217_s17] sm:$0xff] %v652_v11 }
 0x1fb   : > { %655 = vst [vmem:[%s217_s17 + $0x8] sm:$0xff] %v653_v12 }
 0x1fc PF: > { %s14_s15 = sadd.s32 1, %s856_s15  }
 0x1fd   : > { %p11_p4 = scmp.ge.s32.totalorder %s14_s15, 4  }
 0x1ff   :  { %13 = sbr.rel (!%p11_p4) target bundleno = 1 (0x1), region = 69 }

// kernel: autoformer_forward.23
= control target key start
LH: loop header
LB: loop body
LE: loop exit
PB: predicated region body
PF: predicated region fallthrough
CT: control target
= control target key end

     0   :  { %s267_s1 = inlined_call_operand.vmem [shape: bf16[128,128], index: 1, kind: input, shape index: {}]   ;;  %s268_s0 = inlined_call_operand.vmem [shape: f32[32,128], index: 0, kind: input, shape index: {}]   ;;  %s269_s2 = inlined_call_operand.vmem [shape: f32[1,128], index: 2, kind: input, shape index: {}]   ;;  %s270_s3 = inlined_call_operand.vmem [shape: f32[32,128], index: 3, kind: output, shape index: {}]  }
   0x1   :  { %v188_v0 = vld [vmem:[%s267_s1] sm:$0xff]   ;;  %v189_v1 = vld [vmem:[%s267_s1 + $0x8] sm:$0xff]   ;;  %v190_v2 = vld [vmem:[%s267_s1 + $0x10] sm:$0xff]  }
   0x2   :  { %168 = vmatprep.subr.bf16.mxu0 %v188_v0  ;;  %v191_v3 = vld [vmem:[%s267_s1 + $0x18] sm:$0xff]   ;;  %v15_v4 = vld [vmem:[%s268_s0] sm:$0xff]  ;;  %v16_v5 = vld [vmem:[%s268_s0 + $0x8] sm:$0xff] }
   0x3   :  { %169 = vmatpush3.bf16.msra.mxu0 %v188_v0  ;;  %v19_v6 = vpack.c.bf16 %v16_v5, %v15_v4  ;;  %v192_v7 = vld [vmem:[%s267_s1 + $0x20] sm:$0xff]   ;;  %v193_v8 = vld [vmem:[%s267_s1 + $0x28] sm:$0xff]   ;;  %v194_v9 = vld [vmem:[%s267_s1 + $0x30] sm:$0xff]  }
   0x4   :  { %170 = vmatprep.subr.bf16.mxu0 %v189_v1  ;;  %v195_v10 = vld [vmem:[%s267_s1 + $0x38] sm:$0xff]   ;;  %v17_v11 = vld [vmem:[%s268_s0 + $0x10] sm:$0xff]  ;;  %v149_v14 = vld [vmem:[%s269_s2] ss:$0 sm:$0xff] }
   0x5   :  { %184 = vmatprep.mubr.bf16.mxu0 %v19_v6  ;;  %v18_v12 = vld [vmem:[%s268_s0 + $0x18] sm:$0xff] }
   0x6   :  { %v20_v13 = vpack.c.bf16 %v18_v12, %v17_v11 }
   0x7   :  { %171 = vmatpush3.bf16.msra.mxu0 %v189_v1 }
   0x8   :  { %172 = vmatprep.subr.bf16.mxu0 %v190_v2 }
   0xb   :  { %173 = vmatpush3.bf16.msra.mxu0 %v190_v2 }
   0xc   :  { %174 = vmatprep.subr.bf16.mxu0 %v191_v3 }
   0xf   :  { %175 = vmatpush3.bf16.msra.mxu0 %v191_v3 }
  0x10   :  { %176 = vmatprep.subr.bf16.mxu0 %v192_v7 }
  0x13   :  { %177 = vmatpush3.bf16.msra.mxu0 %v192_v7 }
  0x14   :  { %178 = vmatprep.subr.bf16.mxu0 %v193_v8 }
  0x17   :  { %179 = vmatpush3.bf16.msra.mxu0 %v193_v8 }
  0x18   :  { %180 = vmatprep.subr.bf16.mxu0 %v194_v9 }
  0x1b   :  { %181 = vmatpush3.bf16.msra.mxu0 %v194_v9 }
  0x1c   :  { %182 = vmatprep.subr.bf16.mxu0 %v195_v10 }
  0x1f   :  { %183 = vmatpush3.bf16.msra.mxu0 %v195_v10 }
  0x22   :  { %185 = vmatmul.mubr.bf16.vlgmr.msra.gmra.mrb[0].mxu0 %v20_v13 }
  0xf5   :  { %v186_v15 = vpop.f32.mrb[0].mxu0 }
  0xf6   :  { %v135_v16 = vadd.f32 %v186_v15, %v149_v14  ;;  %v126_v17 = vpop.f32.mrb[1].mxu0 }
  0xf7   :  { %v127_v18 = vadd.f32 %v149_v14, %v126_v17  ;;  %v187_v19 = vpop.f32.mrb[2].mxu0 }
  0xf8   :  { %143 = vst [vmem:[%s270_s3 + $0x10] sm:$0xff] %v135_v16  ;;  %v138_v20 = vadd.f32 %v187_v19, %v149_v14  ;;  %v129_v21 = vpop.f32.mrb[3].mxu0 }
  0xf9   :  { %141 = vst [vmem:[%s270_s3] sm:$0xff] %v127_v18  ;;  %v130_v22 = vadd.f32 %v149_v14, %v129_v21 }
  0xfa   :  { %144 = vst [vmem:[%s270_s3 + $0x18] sm:$0xff] %v138_v20 }
  0xfb   :  { %142 = vst [vmem:[%s270_s3 + $0x8] sm:$0xff] %v130_v22 }

// kernel: autoformer_forward.22
= control target key start
LH: loop header
LB: loop body
LE: loop exit
PB: predicated region body
PF: predicated region fallthrough
CT: control target
= control target key end

     0   :  { %s419_s12 = smov 0   ;;  %s454_s0 = inlined_call_operand.vmem [shape: f32[2,16,128], index: 0, kind: input, shape index: {}]   ;;  %s455_s1 = inlined_call_operand.vmem [shape: f32[2,16,128], index: 1, kind: input, shape index: {}]   ;;  %s456_s2 = inlined_call_operand.vmem [shape: f32[2,16,128], index: 2, kind: output, shape index: {0}]   ;;  %s457_s3 = inlined_call_operand.vmem [shape: f32[2,16,128], index: 3, kind: output, shape index: {1}]  }
   0x1 LB: > { %s364_s13 = sadd.s32 4294967295, %s397_s12   ;;  %p368_p0 = scmp.ge.s32.totalorder %s397_s12, 1  ;;  %s397_s12 = sphi %s419_s12, %s14_s12  }
   0x2   : > { %p150_p1 = scmp.lt.s32.totalorder %s397_s12, 3 }
   0x4   : > { %p151_p2 = pnand %p368_p0, %p150_p1 }
   0x5   : > { %p184_p3 = scmp.lt.s32.totalorder (!%p151_p2), %s364_s13, 1  ;;  %v230_v0 = vlaneseq (!%p151_p2)  ;;  %vm212_vm0 = vcmask (!%p151_p2), 1040384   ;;  %vm221_vm1 = vcmask (!%p151_p2), 1046528   ;;  %vm238_vm2 = vcmask (!%p151_p2), 1041408  }
   0x6   : > { %154 = sbr.rel (%p151_p2) target bundleno = 37 (0x25), region = 28  ;;  %vm247_vm3 = vcmask (!%p151_p2), 1045504  }
   0x7   : > { %v231_v1 = vshrl.u32 (!%p151_p2), %v230_v0, 7 }
   0x9   : > { %v232_v2 = vsub.s32 (!%p151_p2), 0, %v231_v1  ;;  %v236_v9 = vsub.s32 (!%p151_p2), 7, %v231_v1 }
   0xd   : > { %s459_s13 = smov (!%p184_p3, %s364_s13), 1 }
   0xe   : > { %s427_s14 = sshll.u32 %s459_s13, 4 }
   0xf   : > { %s188_s17 = scalar_lea.vmem %s454_s0, %s427_s14  ;;  %s193_s20 = scalar_lea.vmem %s455_s1, %s427_s14 }
  0x10   : > { %v204_v3 = vld [vmem:[%s188_s17] sm:$0xff]  ;;  %v205_v4 = vld [vmem:[%s188_s17 + $0x8] sm:$0xff]  ;;  %s203_s23 = scalar_lea.vmem %s457_s3, %s427_s14  ;;  %s198_s26 = scalar_lea.vmem %s456_s2, %s427_s14 }
  0x11   : > { %v206_v5 = vld [vmem:[%s193_s20] sm:$0xff]  ;;  %v207_v6 = vld [vmem:[%s193_s20 + $0x8] sm:$0xff] }
  0x12   : > { %v208_v7 = vadd.f32 %v206_v5, %v204_v3  ;;  %v209_v8 = vadd.f32 %v207_v6, %v205_v4 }
  0x14   : > { %v213_v10 = vrot.slane %v208_v7, 7  ;;  %v222_v11 = vrot.slane %v208_v7, 1  ;;  %v233_v12 = vrot.slane %v208_v7, %v232_v2  ;;  %v239_v13 = vrot.slane %v208_v7, 6 }
  0x15   : > { %v223_v14 = vrot.slane %v209_v8, 1  ;;  %v214_v15 = vrot.slane %v209_v8, 7  ;;  %v248_v17 = vrot.slane %v208_v7, 2  ;;  %v249_v18 = vrot.slane %v209_v8, 2 }
  0x16   : > { %v218_v16 = vsel %vm212_vm0, %v208_v7, %v213_v10  ;;  %v240_v19 = vrot.slane %v209_v8, 6  ;;  %v237_v23 = vrot.slane %v209_v8, %v236_v9  ;;  %v244_v24 = vsel %vm238_vm2, %v233_v12, %v239_v13 }
  0x17   : > { %v219_v20 = vadd.f32 %v218_v16, %v208_v7  ;;  %v224_v21 = vsel %vm221_vm1, %v222_v11, %v223_v14  ;;  %v215_v22 = vsel %vm212_vm0, %v213_v10, %v214_v15  ;;  %v227_v26 = vsel %vm221_vm1, %v223_v14, %v209_v8 }
  0x18   : > { %v220_v25 = vadd.f32 %v215_v22, %v209_v8  ;;  %v241_v28 = vsel %vm238_vm2, %v239_v13, %v240_v19  ;;  %v250_v29 = vsel %vm247_vm3, %v248_v17, %v249_v18  ;;  %v253_v32 = vsel %vm247_vm3, %v249_v18, %v237_v23 }
  0x19   : > { %v228_v27 = vadd.f32 %v224_v21, %v219_v20 }
  0x1a   : > { %v229_v30 = vadd.f32 %v227_v26, %v220_v25 }
  0x1b   : > { %v245_v31 = vadd.f32 %v244_v24, %v228_v27 }
  0x1c   : > { %v246_v33 = vadd.f32 %v241_v28, %v229_v30 }
  0x1d   : > { %v254_v34 = vadd.f32 %v250_v29, %v245_v31 }
  0x1e   : > { %v255_v35 = vadd.f32 %v253_v32, %v246_v33 }
  0x1f   : > { %v256_v36 = vmul.f32 0.2, %v254_v34 }
  0x20   : > { %v257_v37 = vmul.f32 0.2, %v255_v35 }
  0x21   : > { %v258_v38 = vsub.f32 %v208_v7, %v256_v36  ;;  %262 = vst [vmem:[%s203_s23] sm:$0xff] %v256_v36 }
  0x22   : > { %v259_v39 = vsub.f32 %v209_v8, %v257_v37  ;;  %263 = vst [vmem:[%s203_s23 + $0x8] sm:$0xff] %v257_v37 }
  0x23   : > { %260 = vst [vmem:[%s198_s26] sm:$0xff] %v258_v38 }
  0x24   : > { %261 = vst [vmem:[%s198_s26 + $0x8] sm:$0xff] %v259_v39 }
  0x25 PF: > { %s14_s12 = sadd.s32 1, %s397_s12  }
  0x26   : > { %p11_p4 = scmp.ge.s32.totalorder %s14_s12, 4  }
  0x28   :  { %13 = sbr.rel (!%p11_p4) target bundleno = 1 (0x1), region = 73 }

// kernel: autoformer_forward.35
= control target key start
LH: loop header
LB: loop body
LE: loop exit
PB: predicated region body
PF: predicated region fallthrough
CT: control target
= control target key end

     0   :  { %s627_s21 = smov 0   ;;  %s688_s0 = inlined_call_operand.vmem [shape: f32[2,16,128], index: 0, kind: input, shape index: {}]   ;;  %s689_s1 = inlined_call_operand.vmem [shape: f32[2,16,4], index: 1, kind: input, shape index: {}]   ;;  %s690_s2 = inlined_call_operand.vmem [shape: f32[1,128], index: 2, kind: input, shape index: {}]   ;;  %s691_s3 = inlined_call_operand.vmem [shape: f32[1,128], index: 3, kind: input, shape index: {}]   ;;  %s692_s4 = inlined_call_operand.vmem [shape: bf16[128,4], index: 4, kind: input, shape index: {}]   ;;  %s693_s5 = inlined_call_operand.vmem [shape: f32[1,4], index: 5, kind: input, shape index: {}]   ;;  %s694_s6 = inlined_call_operand.vmem [shape: f32[2,8,4], index: 6, kind: output, shape index: {}]  }
   0x1 LB: > { %s506_s22 = sadd.s32 4294967295, %s588_s21   ;;  %p510_p0 = scmp.ge.s32.totalorder %s588_s21, 1  ;;  %s588_s21 = sphi %s627_s21, %s16_s21  }
   0x2   : > { %p222_p1 = scmp.lt.s32.totalorder %s588_s21, 3 }
   0x4   : > { %p223_p2 = pnand %p510_p0, %p222_p1 }
   0x5   : > { %p256_p3 = scmp.lt.s32.totalorder (!%p223_p2), %s506_s22, 1  ;;  %v570_v10 = vld [vmem:[%s692_s4] sm:$0xff] (!%p223_p2)   ;;  %v590_v11 = vmov (!%p223_p2), 0.0   ;;  %v571_v12 = vld [vmem:[%s692_s4 + $0x8] sm:$0xff] (!%p223_p2)   ;;  %v572_v13 = vld [vmem:[%s692_s4 + $0x10] sm:$0xff] (!%p223_p2)   ;;  %vm591_vm0 = vmmov (!%p223_p2), 0  }
   0x6   : > { %226 = sbr.rel (%p223_p2) target bundleno = 571 (0x23b), region = 44  ;;  %540 = vmatprep.subr.bf16.mxu0 (!%p223_p2), %v590_v11  ;;  %556 = vmatprep.mubr.msk.bf16.mxu0 (!%p223_p2), %vm591_vm0, %v590_v11  ;;  %v573_v14 = vld [vmem:[%s692_s4 + $0x18] sm:$0xff] (!%p223_p2)   ;;  %v574_v15 = vld [vmem:[%s692_s4 + $0x20] sm:$0xff] (!%p223_p2)   ;;  %v575_v16 = vld [vmem:[%s692_s4 + $0x28] sm:$0xff] (!%p223_p2)   ;;  %vm439_vm1 = vcmask (!%p223_p2), 31744  }
   0x7   : > { %541 = vmatpush3.bf16.msra.mxu0 (!%p223_p2), %v570_v10  ;;  %v576_v17 = vld [vmem:[%s692_s4 + $0x30] sm:$0xff] (!%p223_p2)   ;;  %v577_v18 = vld [vmem:[%s692_s4 + $0x38] sm:$0xff] (!%p223_p2)   ;;  %v516_v27 = vld [vmem:[%s690_s2] ss:$0 sm:$0xff] (!%p223_p2) }
   0x8   : > { %542 = vmatprep.subr.bf16.mxu0 (!%p223_p2), %v590_v11  ;;  %v517_v31 = vld [vmem:[%s691_s3] ss:$0 sm:$0xff] (!%p223_p2) }
   0x9   : > { %v518_v47 = vld [vmem:[%s693_s5] ss:$0 sm:$0xff] (!%p223_p2) }
   0xb   : > { %543 = vmatpush3.bf16.msra.mxu0 (!%p223_p2), %v571_v12 }
   0xc   : > { %544 = vmatprep.subr.bf16.mxu0 (!%p223_p2), %v590_v11 }
   0xd   : > { %s696_s22 = smov (!%p256_p3, %s506_s22), 1 }
   0xe   : > { %s529_s23 = sshll.u32 %s696_s22, 4  ;;  %s515_s7 = sshll.u32 %s696_s22, 3 }
   0xf   : > { %s260_s26 = scalar_lea.vmem %s688_s0, %s529_s23  ;;  %545 = vmatpush3.bf16.msra.mxu0 %v572_v13  ;;  %s265_s28 = scalar_lea.vmem %s689_s1, %s529_s23 }
  0x10   : > { %v271_v0 = vld [vmem:[%s260_s26] sm:$0xff]  ;;  %v272_v1 = vld [vmem:[%s260_s26 + $0x8] sm:$0xff]  ;;  %546 = vmatprep.subr.bf16.mxu0 %v590_v11  ;;  %s269_s10 = scalar_lea.vmem %s694_s6, %s515_s7 }
  0x11   : > { %275 = vadd.xlane.f32.xlu0 %v271_v0  ;;  %v437_v50 = vld [vmem:[%s265_s28 + $0x8] sm:$0xff] }
  0x13   : > { %547 = vmatpush3.bf16.msra.mxu0 %v573_v14 }
  0x14   : > { %548 = vmatprep.subr.bf16.mxu0 %v590_v11 }
  0x15   : > { %277 = vadd.xlane.f32.xlu0 %v272_v1 }
  0x17   : > { %549 = vmatpush3.bf16.msra.mxu0 %v574_v15 }
  0x18   : > { %550 = vmatprep.subr.bf16.mxu0 %v590_v11 }
  0x1b   : > { %551 = vmatpush3.bf16.msra.mxu0 %v575_v16 }
  0x1c   : > { %552 = vmatprep.subr.bf16.mxu0 %v590_v11 }
  0x1f   : > { %553 = vmatpush3.bf16.msra.mxu0 %v576_v17 }
  0x20   : > { %554 = vmatprep.subr.bf16.mxu0 %v590_v11 }
  0x23   : > { %555 = vmatpush3.bf16.msra.mxu0 %v577_v18 }
  0x9e   : > { %v276_v2 = vpop.xlane.xlu0 %275 }
  0x9f   : > { %v280_v3 = vmul.f32 0.0078125, %v276_v2 }
  0xa1   : > { %v282_v4 = vsub.f32 %v271_v0, %v280_v3 }
  0xa2   : > { %v278_v5 = vpop.xlane.xlu0 %277 }
  0xa3   : > { %v281_v6 = vmul.f32 0.0078125, %v278_v5  ;;  %v284_v7 = vmul.f32 %v282_v4, %v282_v4 }
  0xa5   : > { %v283_v8 = vsub.f32 %v272_v1, %v281_v6  ;;  %286 = vadd.xlane.f32.xlu1 %v284_v7 }
  0xa7   : > { %v285_v9 = vmul.f32 %v283_v8, %v283_v8 }
  0xa9   : > { %288 = vadd.xlane.f32.xlu1 %v285_v9 }
 0x132   : > { %v287_v19 = vpop.xlane.xlu1 %286 }
 0x133   : > { %v290_v20 = vmul.f32 0.0078125, %v287_v19 }
 0x135   : > { %v292_v21 = vadd.f32 1e-05, %v290_v20 }
 0x136   : > { %v289_v22 = vpop.xlane.xlu1 %288 }
 0x137   : > { %578 = vrsqrt.f32 %v292_v21  ;;  %v291_v23 = vmul.f32 0.0078125, %v289_v22 }
 0x139   : > { %v293_v24 = vadd.f32 1e-05, %v291_v23 }
 0x13b   : > { %580 = vrsqrt.f32 %v293_v24 }
 0x141   : > { %v579_v25 = vpop.eup %578 }
 0x142   : > { %v296_v26 = vmul.f32 %v579_v25, %v282_v4 }
 0x144   : > { %v304_v30 = vmul.f32 %v516_v27, %v296_v26 }
 0x145   : > { %v581_v28 = vpop.eup %580 }
 0x146   : > { %v297_v29 = vmul.f32 %v581_v28, %v283_v8  ;;  %v312_v33 = vadd.f32 %v517_v31, %v304_v30 }
 0x148   : > { %v305_v32 = vmul.f32 %v516_v27, %v297_v29 }
 0x14a   : > { %v313_v34 = vadd.f32 %v517_v31, %v305_v32 }
 0x14c   : > { %v314_v35 = vadd.f32 %v313_v34, %v312_v33 }
 0x14e   : > { %v315_v36 = vrot.slane %v314_v35, 4 }
 0x150   : > { %v316_v37 = vadd.f32 %v315_v36, %v314_v35 }
 0x152   : > { %v317_v38 = vrot.slane %v316_v37, 2 }
 0x154   : > { %v318_v39 = vadd.f32 %v317_v38, %v316_v37 }
 0x156   : > { %v319_v40 = vrot.slane %v318_v39, 1 }
 0x158   : > { %v320_v41 = vadd.f32 %v319_v40, %v318_v39 }
 0x15a   : > { %v322_v42 = vmul.f32 0.0625, %v320_v41 }
 0x15c   : > { %v323_v43 = vsub.f32 %v312_v33, %v322_v42  ;;  %v324_v44 = vsub.f32 %v313_v34, %v322_v42 }
 0x15e   : > { %v325_v45 = vpack.c.bf16 %v324_v44, %v323_v43 }
 0x160   : > { %557 = vmatmul.mubr.bf16.vlgmr.msra.gmra.mrb[0].mxu0 %v325_v45 }
 0x233   : > { %v431_v46 = vpop.f32.mrb[0].mxu0 }
 0x234   : > { %v558_v48 = vpop.f32.mrb[1].mxu0 }
 0x235   : > { %v433_v49 = vpop.f32.mrb[2].mxu0 }
 0x236   : > { %v434_v51 = vadd.f32 %v518_v47, %v433_v49  ;;  %v559_v52 = vpop.f32.mrb[3].mxu0 }
 0x238   : > { %v438_v53 = vadd.f32 %v437_v50, %v434_v51 }
 0x23a   : > { %440 = vst.msk [vmem:[%s269_s10] sm:$0xff] %vm439_vm1, %v438_v53 }
 0x23b PF: > { %s16_s21 = sadd.s32 1, %s588_s21  }
 0x23c   : > { %p13_p4 = scmp.ge.s32.totalorder %s16_s21, 4  }
 0x23e   :  { %15 = sbr.rel (!%p13_p4) target bundleno = 1 (0x1), region = 77 }

// kernel: autoformer_forward.34
= control target key start
LH: loop header
LB: loop body
LE: loop exit
PB: predicated region body
PF: predicated region fallthrough
CT: control target
= control target key end

     0   :  { %s1540_s27 = smov 0   ;;  %s1802_s0 = inlined_call_operand.vmem [shape: f32[2,16,128], index: 0, kind: input, shape index: {}]   ;;  %s1803_s1 = inlined_call_operand.vmem [shape: f32[2,16,128], index: 1, kind: input, shape index: {}]   ;;  %s1804_s2 = inlined_call_operand.vmem [shape: f32[2,16,128], index: 2, kind: input, shape index: {}]   ;;  %s1805_s3 = inlined_call_operand.vmem [shape: f32[2,16,4], index: 3, kind: input, shape index: {}]   ;;  %s1806_s4 = inlined_call_operand.vmem [shape: bf16[128,256], index: 4, kind: input, shape index: {}]   ;;  %s1807_s5 = inlined_call_operand.vmem [shape: bf16[256,128], index: 5, kind: input, shape index: {}]   ;;  %s1808_s6 = inlined_call_operand.vmem [shape: bf16[384,4], index: 6, kind: input, shape index: {}]   ;;  %s1809_s7 = inlined_call_operand.vmem [shape: f32[2,16,128], index: 7, kind: output, shape index: {0}]   ;;  %s1810_s8 = inlined_call_operand.vmem [shape: f32[2,16,4], index: 8, kind: output, shape index: {1}]  }
   0x1 LB: > { %s1247_s28 = sadd.s32 4294967295, %s1490_s27   ;;  %p1251_p0 = scmp.ge.s32.totalorder %s1490_s27, 1  ;;  %s1490_s27 = sphi %s1540_s27, %s19_s27  }
   0x2   : > { %p295_p1 = scmp.lt.s32.totalorder %s1490_s27, 3 }
   0x4   : > { %p296_p2 = pnand %p1251_p0, %p295_p1 }
   0x5   : > { %v1412_v0 = vld [vmem:[%s1806_s4 + $0x4] ss:$8 sps:$4 sm:$0xff] (!%p296_p2)   ;;  %p349_p3 = scmp.lt.s32.totalorder (!%p296_p2), %s1247_s28, 1  ;;  %v1414_v1 = vld [vmem:[%s1806_s4] ss:$8 sps:$4 sm:$0xff] (!%p296_p2)   ;;  %v1492_v2 = vmov (!%p296_p2), 0   ;;  %v406_v5 = vlaneseq (!%p296_p2) }
   0x6   : > { %299 = sbr.rel (%p296_p2) target bundleno = 734 (0x2de), region = 48  ;;  %565 = vmatprep.mubr.bf16.mxu0 (!%p296_p2), %v1492_v2  ;;  %533 = vmatprep.subr.bf16.mxu0 (!%p296_p2), %v1412_v0  ;;  %v1415_v3 = vld [vmem:[%s1806_s4 + $0x14] ss:$8 sps:$4 sm:$0xff] (!%p296_p2)   ;;  %v1417_v4 = vld [vmem:[%s1806_s4 + $0x10] ss:$8 sps:$4 sm:$0xff] (!%p296_p2)   ;;  %vm388_vm0 = vcmask (!%p296_p2), 1040384  }
   0x7   : > { %534 = vmatpush1.bf16.msra.mxu0 (!%p296_p2), %v1414_v1  ;;  %v1418_v6 = vld [vmem:[%s1806_s4 + $0x24] ss:$8 sps:$4 sm:$0xff] (!%p296_p2)   ;;  %v1420_v7 = vld [vmem:[%s1806_s4 + $0x20] ss:$8 sps:$4 sm:$0xff] (!%p296_p2)   ;;  %v1572_v8 = vshrl.u32 (!%p296_p2), %v406_v5, 7  ;;  %vm397_vm1 = vcmask (!%p296_p2), 1046528  }
   0x8   : > { %535 = vmatprep.subr.bf16.mxu0 (!%p296_p2), %v1415_v3  ;;  %v1421_v9 = vld [vmem:[%s1806_s4 + $0x34] ss:$8 sps:$4 sm:$0xff] (!%p296_p2)   ;;  %v1423_v10 = vld [vmem:[%s1806_s4 + $0x30] ss:$8 sps:$4 sm:$0xff] (!%p296_p2)   ;;  %v1424_v17 = vld [vmem:[%s1806_s4 + $0x44] ss:$8 sps:$4 sm:$0xff] (!%p296_p2)  }
   0x9   : > { %v408_v15 = vsub.s32 (!%p296_p2), 0, %v1572_v8  ;;  %v412_v16 = vsub.s32 (!%p296_p2), 7, %v1572_v8  ;;  %v1426_v20 = vld [vmem:[%s1806_s4 + $0x40] ss:$8 sps:$4 sm:$0xff] (!%p296_p2)   ;;  %vm414_vm2 = vcmask (!%p296_p2), 1041408   ;;  %vm423_vm3 = vcmask (!%p296_p2), 1045504  }
   0xa   : > { %v1436_v21 = vld [vmem:[%s1807_s5 + $0x40] sm:$0xff] (!%p296_p2)   ;;  %v1427_v22 = vld [vmem:[%s1806_s4 + $0x54] ss:$8 sps:$4 sm:$0xff] (!%p296_p2)   ;;  %v1438_v32 = vld [vmem:[%s1807_s5 + $0x48] sm:$0xff] (!%p296_p2)   ;;  %vm1494_vm4 = vmmov (!%p296_p2), 0   ;;  %vm1120_vm5 = vcmask (!%p296_p2), 31744  }
   0xb   : > { %536 = vmatpush1.bf16.msra.mxu0 (!%p296_p2), %v1417_v4  ;;  %1328 = vmatprep.subr.bf16.mxu1 (!%p296_p2), %v1436_v21  ;;  %v1437_v31 = vld [vmem:[%s1807_s5] sm:$0xff] (!%p296_p2)   ;;  %v1429_v37 = vld [vmem:[%s1806_s4 + $0x50] ss:$8 sps:$4 sm:$0xff] (!%p296_p2)   ;;  %v1439_v40 = vld [vmem:[%s1807_s5 + $0x8] sm:$0xff] (!%p296_p2)  }
   0xc   : > { %537 = vmatprep.subr.bf16.mxu0 (!%p296_p2), %v1418_v6  ;;  %1329 = vmatpush3.bf16.msra.mxu1 (!%p296_p2), %v1437_v31  ;;  %v1430_v41 = vld [vmem:[%s1806_s4 + $0x64] ss:$8 sps:$4 sm:$0xff] (!%p296_p2)   ;;  %v1432_v50 = vld [vmem:[%s1806_s4 + $0x60] ss:$8 sps:$4 sm:$0xff] (!%p296_p2)   ;;  %v1433_v53 = vld [vmem:[%s1806_s4 + $0x74] ss:$8 sps:$4 sm:$0xff] (!%p296_p2)  }
   0xd   : > { %s1812_s28 = smov (!%p349_p3, %s1247_s28), 1  ;;  %1330 = vmatprep.subr.bf16.mxu1 %v1438_v32  ;;  %v1435_v56 = vld [vmem:[%s1806_s4 + $0x70] ss:$8 sps:$4 sm:$0xff]   ;;  %v1444_v2 = vld [vmem:[%s1807_s5 + $0x60] sm:$0xff]   ;;  %v1446_v4 = vld [vmem:[%s1807_s5 + $0x68] sm:$0xff]  }
   0xe   : > { %s1563_s17 = sshll.u32 %s1812_s28, 4  ;;  %v1440_v62 = vld [vmem:[%s1807_s5 + $0x50] sm:$0xff]   ;;  %v1442_v0 = vld [vmem:[%s1807_s5 + $0x58] sm:$0xff]   ;;  %v1445_v3 = vld [vmem:[%s1807_s5 + $0x20] sm:$0xff]  }
   0xf   : > { %s353_s22 = scalar_lea.vmem %s1802_s0, %s1563_s17  ;;  %s358_s28 = scalar_lea.vmem %s1803_s1, %s1563_s17  ;;  %538 = vmatpush1.bf16.msra.mxu0 %v1420_v7  ;;  %v1441_v63 = vld [vmem:[%s1807_s5 + $0x10] sm:$0xff]   ;;  %v1443_v1 = vld [vmem:[%s1807_s5 + $0x18] sm:$0xff]   ;;  %v1447_v5 = vld [vmem:[%s1807_s5 + $0x28] sm:$0xff]  }
  0x10   : > { %v380_v11 = vld [vmem:[%s353_s22] sm:$0xff]  ;;  %v381_v12 = vld [vmem:[%s353_s22 + $0x8] sm:$0xff]  ;;  %539 = vmatprep.subr.bf16.mxu0 %v1421_v9  ;;  %1331 = vmatpush3.bf16.msra.mxu1 %v1439_v40  ;;  %v1448_v6 = vld [vmem:[%s1807_s5 + $0x70] sm:$0xff]   ;;  %s363_s29 = scalar_lea.vmem %s1804_s2, %s1563_s17  ;;  %s373_s10 = scalar_lea.vmem %s1809_s7, %s1563_s17 }
  0x11   : > { %v382_v13 = vld [vmem:[%s358_s28] sm:$0xff]  ;;  %v383_v14 = vld [vmem:[%s358_s28 + $0x8] sm:$0xff]  ;;  %1332 = vmatprep.subr.bf16.mxu1 %v1440_v62  ;;  %v1449_v7 = vld [vmem:[%s1807_s5 + $0x30] sm:$0xff]   ;;  %s368_s13 = scalar_lea.vmem %s1805_s3, %s1563_s17  ;;  %s378_s16 = scalar_lea.vmem %s1810_s8, %s1563_s17 }
  0x12   : > { %v384_v18 = vadd.f32 %v382_v13, %v380_v11  ;;  %v385_v19 = vadd.f32 %v383_v14, %v381_v12  ;;  %v1450_v9 = vld [vmem:[%s1807_s5 + $0x78] sm:$0xff]   ;;  %v1452_v11 = vld [vmem:[%s1808_s6 + $0x40] sm:$0xff]   ;;  %v1493_v13 = vmov 0.0   ;;  %v1470_v62 = vld [vmem:[%s1808_s6 + $0x70] sm:$0xff]  }
  0x13   : > { %540 = vmatpush1.bf16.msra.mxu0 %v1423_v10  ;;  %v1451_v10 = vld [vmem:[%s1807_s5 + $0x38] sm:$0xff]   ;;  %v1453_v12 = vld [vmem:[%s1808_s6] sm:$0xff]  }
  0x14   : > { %v389_v23 = vrot.slane %v384_v18, 7  ;;  %v390_v24 = vrot.slane %v385_v19, 7  ;;  %v398_v25 = vrot.slane %v384_v18, 1  ;;  %v399_v26 = vrot.slane %v385_v19, 1  ;;  %541 = vmatprep.subr.bf16.mxu0 %v1424_v17  ;;  %1333 = vmatpush3.bf16.msra.mxu1 %v1441_v63  ;;  %v1471_v63 = vld [vmem:[%s1808_s6 + $0x30] sm:$0xff]  }
  0x15   : > { %v409_v27 = vrot.slane %v384_v18, %v408_v15  ;;  %v413_v28 = vrot.slane %v385_v19, %v412_v16  ;;  %v415_v29 = vrot.slane %v384_v18, 6  ;;  %v416_v30 = vrot.slane %v385_v19, 6  ;;  %1334 = vmatprep.subr.bf16.mxu1 %v1442_v0  ;;  %v1472_v0 = vld [vmem:[%s1808_s6 + $0xb0] sm:$0xff]  }
  0x16   : > { %v391_v33 = vsel %vm388_vm0, %v389_v23, %v390_v24  ;;  %v394_v34 = vsel %vm388_vm0, %v384_v18, %v389_v23  ;;  %v400_v35 = vsel %vm397_vm1, %v398_v25, %v399_v26  ;;  %v403_v36 = vsel %vm397_vm1, %v399_v26, %v385_v19 }
  0x17   : > { %v395_v38 = vadd.f32 %v394_v34, %v384_v18  ;;  %v396_v39 = vadd.f32 %v391_v33, %v385_v19  ;;  %v417_v42 = vsel %vm414_vm2, %v415_v29, %v416_v30  ;;  %v420_v43 = vsel %vm414_vm2, %v409_v27, %v415_v29  ;;  %542 = vmatpush1.bf16.msra.mxu0 %v1426_v20 }
  0x18   : > { %v424_v44 = vrot.slane %v384_v18, 2  ;;  %v425_v45 = vrot.slane %v385_v19, 2  ;;  %543 = vmatprep.subr.bf16.mxu0 %v1427_v22  ;;  %1335 = vmatpush3.bf16.msra.mxu1 %v1443_v1  ;;  %v1473_v1 = vld [vmem:[%s1808_s6 + $0x78] sm:$0xff]  }
  0x19   : > { %v404_v46 = vadd.f32 %v400_v35, %v395_v38  ;;  %v405_v47 = vadd.f32 %v403_v36, %v396_v39  ;;  %1336 = vmatprep.subr.bf16.mxu1 %v1444_v2  ;;  %v1474_v2 = vld [vmem:[%s1808_s6 + $0x38] sm:$0xff]  }
  0x1a   : > { %v426_v48 = vsel %vm423_vm3, %v424_v44, %v425_v45  ;;  %v429_v49 = vsel %vm423_vm3, %v425_v45, %v413_v28  ;;  %v1456_v44 = vld [vmem:[%s1808_s6 + $0x8] sm:$0xff]  }
  0x1b   : > { %v421_v51 = vadd.f32 %v420_v43, %v404_v46  ;;  %v422_v52 = vadd.f32 %v417_v42, %v405_v47  ;;  %544 = vmatpush1.bf16.msra.mxu0 %v1429_v37  ;;  %v1454_v42 = vld [vmem:[%s1808_s6 + $0x80] sm:$0xff]   ;;  %v1455_v43 = vld [vmem:[%s1808_s6 + $0x48] sm:$0xff]   ;;  %v1458_v46 = vld [vmem:[%s1808_s6 + $0x50] sm:$0xff]  }
  0x1c   : > { %545 = vmatprep.subr.bf16.mxu0 %v1430_v41  ;;  %1337 = vmatpush3.bf16.msra.mxu1 %v1445_v3  ;;  %v1457_v45 = vld [vmem:[%s1808_s6 + $0x88] sm:$0xff]   ;;  %v1459_v47 = vld [vmem:[%s1808_s6 + $0x10] sm:$0xff]   ;;  %v1475_v3 = vld [vmem:[%s1808_s6 + $0xb8] sm:$0xff]  }
  0x1d   : > { %v430_v54 = vadd.f32 %v426_v48, %v421_v51  ;;  %v431_v55 = vadd.f32 %v429_v49, %v422_v52  ;;  %1338 = vmatprep.subr.bf16.mxu1 %v1446_v4  ;;  %v1460_v48 = vld [vmem:[%s1808_s6 + $0x90] sm:$0xff]   ;;  %v1461_v49 = vld [vmem:[%s1808_s6 + $0x58] sm:$0xff]   ;;  %v1464_v52 = vld [vmem:[%s1808_s6 + $0x60] sm:$0xff]  }
  0x1e   : > { %v1463_v51 = vld [vmem:[%s1808_s6 + $0x98] sm:$0xff]  }
  0x1f   : > { %v1634_v57 = vmul.f32 0.2, %v430_v54  ;;  %v1636_v58 = vmul.f32 0.2, %v431_v55  ;;  %546 = vmatpush1.bf16.msra.mxu0 %v1432_v50  ;;  %v1462_v50 = vld [vmem:[%s1808_s6 + $0x18] sm:$0xff]   ;;  %v1466_v54 = vld [vmem:[%s1808_s6 + $0xa0] sm:$0xff]  }
  0x20   : > { %547 = vmatprep.subr.bf16.mxu0 %v1433_v53  ;;  %1339 = vmatpush3.bf16.msra.mxu1 %v1447_v5  ;;  %v1465_v53 = vld [vmem:[%s1808_s6 + $0x20] sm:$0xff]   ;;  %v1467_v55 = vld [vmem:[%s1808_s6 + $0x68] sm:$0xff]  }
  0x21   : > { %v1639_v59 = vsub.f32 %v384_v18, %v1634_v57  ;;  %v1642_v60 = vsub.f32 %v385_v19, %v1636_v58  ;;  %1340 = vmatprep.subr.bf16.mxu1 %v1448_v6 }
  0x23   : > { %v436_v61 = vpack.c.bf16 %v1642_v60, %v1639_v59  ;;  %548 = vmatpush1.bf16.msra.mxu0 %v1435_v56  ;;  %v1468_v56 = vld [vmem:[%s1808_s6 + $0x28] sm:$0xff]  }
  0x24   : > { %1341 = vmatpush3.bf16.msra.mxu1 %v1449_v7  ;;  %1350 = vmatprep.subr.bf16.mxu0 %v1452_v11 }
  0x25   : > { %1342 = vmatprep.subr.bf16.mxu1 %v1450_v9 }
  0x26   : > { %566 = vmatmul.mubr.bf16.vlgmr.msra.gmra.mrb[0].mxu0 %v436_v61  ;;  %v1469_v61 = vld [vmem:[%s1808_s6 + $0xa8] sm:$0xff]  }
  0x27   : > { %1351 = vmatpush3.bf16.msra.mxu0 %v1453_v12 }
  0x28   : > { %1343 = vmatpush3.bf16.msra.mxu1 %v1451_v10  ;;  %1352 = vmatprep.subr.bf16.mxu0 %v1455_v43 }
  0x29   : > { %1381 = vmatprep.subr.bf16.mxu1 %v1493_v13 }
  0x2b   : > { %1353 = vmatpush3.bf16.msra.mxu0 %v1456_v44 }
  0x2c   : > { %1354 = vmatprep.subr.bf16.mxu0 %v1458_v46 }
  0x2f   : > { %1355 = vmatpush3.bf16.msra.mxu0 %v1459_v47 }
  0x30   : > { %1356 = vmatprep.subr.bf16.mxu0 %v1461_v49 }
  0x33   : > { %1357 = vmatpush3.bf16.msra.mxu0 %v1462_v50 }
  0x34   : > { %1358 = vmatprep.subr.bf16.mxu0 %v1464_v52 }
  0x37   : > { %1359 = vmatpush3.bf16.msra.mxu0 %v1465_v53 }
  0x38   : > { %1360 = vmatprep.subr.bf16.mxu0 %v1467_v55 }
  0x3b   : > { %1361 = vmatpush3.bf16.msra.mxu0 %v1468_v56 }
  0x3c   : > { %1362 = vmatprep.subr.bf16.mxu0 %v1470_v62 }
  0x3f   : > { %1363 = vmatpush3.bf16.msra.mxu0 %v1471_v63 }
  0x40   : > { %1364 = vmatprep.subr.bf16.mxu0 %v1473_v1 }
  0x43   : > { %1365 = vmatpush3.bf16.msra.mxu0 %v1474_v2  ;;  %v1116_v2 = vld [vmem:[%s368_s13] sm:$0xff] }
  0xf9   : > { %v567_v14 = vpop.f32.mrb[0].mxu0 }
  0xfa   : > { %v580_v17 = vmul.f32 0.70710677, %v567_v14  ;;  %v569_v18 = vpop.f32.mrb[1].mxu0  ;;  %v576_v30 = vmul.f32 0.5, %v567_v14 }
  0xfb   : > { %v581_v19 = vmul.f32 0.70710677, %v569_v18  ;;  %v571_v20 = vpop.f32.mrb[2].mxu0  ;;  %v577_v33 = vmul.f32 0.5, %v569_v18 }
  0xfc   : > { %1476 = verf.f32 %v580_v17  ;;  %v582_v21 = vmul.f32 0.70710677, %v571_v20  ;;  %v573_v22 = vpop.f32.mrb[3].mxu0  ;;  %v578_v31 = vmul.f32 0.5, %v571_v20 }
  0xfd   : > { %1478 = verf.f32 %v581_v19  ;;  %v583_v23 = vmul.f32 0.70710677, %v573_v22  ;;  %v579_v34 = vmul.f32 0.5, %v573_v22 }
  0xfe   : > { %1480 = verf.f32 %v582_v21 }
  0xff   : > { %1482 = verf.f32 %v583_v23 }
 0x106   : > { %v1477_v24 = vpop.eup %1476 }
 0x107   : > { %v1479_v25 = vpop.eup %1478  ;;  %v588_v26 = vadd.f32 1.0, %v1477_v24 }
 0x108   : > { %v1481_v27 = vpop.eup %1480  ;;  %v589_v28 = vadd.f32 1.0, %v1479_v25 }
 0x109   : > { %v1483_v29 = vpop.eup %1482  ;;  %v590_v32 = vadd.f32 1.0, %v1481_v27  ;;  %v592_v36 = vmul.f32 %v588_v26, %v576_v30 }
 0x10a   : > { %v591_v35 = vadd.f32 1.0, %v1483_v29  ;;  %v593_v38 = vmul.f32 %v589_v28, %v577_v33  ;;  %v815_v29 = vld [vmem:[%s363_s29] sm:$0xff] }
 0x10b   : > { %v594_v37 = vmul.f32 %v590_v32, %v578_v31 }
 0x10c   : > { %v595_v39 = vmul.f32 %v591_v35, %v579_v34  ;;  %v816_v35 = vld [vmem:[%s363_s29 + $0x8] sm:$0xff] }
 0x10d   : > { %v596_v40 = vpack.c.bf16 %v594_v37, %v592_v36  ;;  %v817_v36 = vadd.f32 %v815_v29, %v1634_v57 }
 0x10e   : > { %v597_v41 = vpack.c.bf16 %v595_v39, %v593_v38 }
 0x110   : > { %758 = vmatprep.mubr.bf16.mxu1 %v597_v41 }
 0x111   : > { %759 = vmatmul.mubr.bf16.vlgmr.msra.gmra.mrb[0].mxu1 %v596_v40  ;;  %v818_v40 = vadd.f32 %v816_v35, %v1636_v58 }
 0x112   : > { %1382 = vmatpush3.bf16.msra.mxu1 %v1454_v42  ;;  %1397 = vmatprep.mubr.msk.bf16.mxu1 %vm1494_vm4, %v1493_v13 }
 0x113   : > { %1383 = vmatprep.subr.bf16.mxu1 %v1493_v13 }
 0x116   : > { %1384 = vmatpush3.bf16.msra.mxu1 %v1457_v45 }
 0x117   : > { %1385 = vmatprep.subr.bf16.mxu1 %v1493_v13 }
 0x11a   : > { %1386 = vmatpush3.bf16.msra.mxu1 %v1460_v48 }
 0x11b   : > { %1387 = vmatprep.subr.bf16.mxu1 %v1493_v13 }
 0x11e   : > { %1388 = vmatpush3.bf16.msra.mxu1 %v1463_v51 }
 0x11f   : > { %1389 = vmatprep.subr.bf16.mxu1 %v1493_v13 }
 0x122   : > { %1390 = vmatpush3.bf16.msra.mxu1 %v1466_v54 }
 0x123   : > { %1391 = vmatprep.subr.bf16.mxu1 %v1493_v13 }
 0x126   : > { %1392 = vmatpush3.bf16.msra.mxu1 %v1469_v61 }
 0x127   : > { %1393 = vmatprep.subr.bf16.mxu1 %v1493_v13 }
 0x12a   : > { %1394 = vmatpush3.bf16.msra.mxu1 %v1472_v0 }
 0x12b   : > { %1395 = vmatprep.subr.bf16.mxu1 %v1493_v13 }
 0x12e   : > { %1396 = vmatpush3.bf16.msra.mxu1 %v1475_v3 }
 0x1e4   : > { %v1344_v4 = vpop.f32.mrb[0].mxu1 }
 0x1e5   : > { %v1345_v5 = vpop.f32.mrb[1].mxu1 }
 0x1e6   : > { %v1346_v6 = vadd.f32 %v1345_v5, %v1344_v4  ;;  %v1347_v7 = vpop.f32.mrb[2].mxu1 }
 0x1e7   : > { %v1348_v9 = vpop.f32.mrb[3].mxu1 }
 0x1e8   : > { %v767_v10 = vadd.f32 %v1346_v6, %v1639_v59  ;;  %v1349_v11 = vadd.f32 %v1348_v9, %v1347_v7  ;;  %v1117_v7 = vld [vmem:[%s368_s13 + $0x8] sm:$0xff] }
 0x1ea   : > { %v768_v12 = vadd.f32 %v1349_v11, %v1642_v60  ;;  %v771_v14 = vrot.slane %v767_v10, 7  ;;  %v779_v17 = vrot.slane %v767_v10, 1  ;;  %v790_v18 = vrot.slane %v767_v10, %v408_v15 }
 0x1eb   : > { %v795_v21 = vrot.slane %v767_v10, 6  ;;  %v803_v59 = vrot.slane %v767_v10, 2 }
 0x1ec   : > { %v772_v19 = vrot.slane %v768_v12, 7  ;;  %v776_v13 = vsel %vm388_vm0, %v767_v10, %v771_v14  ;;  %v780_v20 = vrot.slane %v768_v12, 1  ;;  %v796_v23 = vrot.slane %v768_v12, 6 }
 0x1ed   : > { %v777_v22 = vadd.f32 %v776_v13, %v767_v10  ;;  %v804_v24 = vrot.slane %v768_v12, 2  ;;  %v794_v31 = vrot.slane %v768_v12, %v412_v16  ;;  %v800_v32 = vsel %vm414_vm2, %v790_v18, %v795_v21 }
 0x1ee   : > { %v773_v60 = vsel %vm388_vm0, %v771_v14, %v772_v19  ;;  %v781_v25 = vsel %vm397_vm1, %v779_v17, %v780_v20  ;;  %v797_v15 = vsel %vm414_vm2, %v795_v21, %v796_v23  ;;  %v784_v30 = vsel %vm397_vm1, %v780_v20, %v768_v12 }
 0x1ef   : > { %v778_v26 = vadd.f32 %v773_v60, %v768_v12  ;;  %v785_v27 = vadd.f32 %v781_v25, %v777_v22  ;;  %v805_v28 = vsel %vm423_vm3, %v803_v59, %v804_v24  ;;  %v808_v39 = vsel %vm423_vm3, %v804_v24, %v794_v31 }
 0x1f1   : > { %v786_v33 = vadd.f32 %v784_v30, %v778_v26  ;;  %v801_v34 = vadd.f32 %v800_v32, %v785_v27 }
 0x1f3   : > { %v802_v37 = vadd.f32 %v797_v15, %v786_v33  ;;  %v809_v38 = vadd.f32 %v805_v28, %v801_v34 }
 0x1f5   : > { %v810_v41 = vadd.f32 %v808_v39, %v802_v37  ;;  %v811_v42 = vmul.f32 0.2, %v809_v38 }
 0x1f7   : > { %v812_v8 = vmul.f32 0.2, %v810_v41  ;;  %v813_v16 = vsub.f32 %v767_v10, %v811_v42  ;;  %v819_v43 = vadd.f32 %v817_v36, %v811_v42 }
 0x1f9   : > { %v814_v44 = vsub.f32 %v768_v12, %v812_v8  ;;  %v820_v45 = vadd.f32 %v818_v40, %v812_v8  ;;  %1114 = vst [vmem:[%s373_s10] sm:$0xff] %v813_v16  ;;  %v825_v46 = vrot.slane %v819_v43, 7  ;;  %v830_v48 = vrot.slane %v819_v43, 1 }
 0x1fb   : > { %v838_v57 = vpack.c.bf16 %v820_v45, %v819_v43  ;;  %1115 = vst [vmem:[%s373_s10 + $0x8] sm:$0xff] %v814_v44  ;;  %v822_v47 = vrot.slane %v820_v45, 7  ;;  %v831_v49 = vrot.slane %v820_v45, 1 }
 0x1fd   : > { %1064 = vmatprep.mubr.bf16.mxu0 %v838_v57  ;;  %v826_v58 = vsel %vm388_vm0, %v825_v46, %v822_v47  ;;  %v829_v50 = vsel %vm388_vm0, %v822_v47, %v825_v46  ;;  %v832_v51 = vsel %vm397_vm1, %v830_v48, %v831_v49  ;;  %v836_v52 = vsel %vm397_vm1, %v831_v49, %v830_v48 }
 0x1fe   : > { %v837_v53 = vpack.c.bf16 %v826_v58, %v829_v50  ;;  %v839_v54 = vpack.c.bf16 %v836_v52, %v832_v51 }
 0x200   : > { %1065 = vmatmul.mubr.bf16.vlgmr.msra.gmra.mrb[4].mxu0 %v837_v53  ;;  %1398 = vmatmul.mubr.bf16.vlgmr.msra.gmra.mrb[4].mxu1 %v839_v54 }
 0x2d3   : > { %v1366_v55 = vpop.f32.mrb[4].mxu0  ;;  %v1107_v56 = vpop.f32.mrb[4].mxu1 }
 0x2d4   : > { %v1367_v61 = vpop.f32.mrb[5].mxu0  ;;  %v1399_v62 = vpop.f32.mrb[5].mxu1 }
 0x2d5   : > { %v1368_v63 = vadd.f32 %v1367_v61, %v1366_v55  ;;  %v1369_v0 = vpop.f32.mrb[6].mxu0  ;;  %v1110_v1 = vpop.f32.mrb[6].mxu1 }
 0x2d6   : > { %v1370_v3 = vpop.f32.mrb[7].mxu0  ;;  %v1400_v4 = vpop.f32.mrb[7].mxu1 }
 0x2d7   : > { %v1108_v5 = vadd.f32 %v1368_v63, %v1107_v56  ;;  %v1371_v6 = vadd.f32 %v1370_v3, %v1369_v0 }
 0x2d9   : > { %v1118_v9 = vadd.f32 %v1116_v2, %v1108_v5  ;;  %v1111_v10 = vadd.f32 %v1371_v6, %v1110_v1 }
 0x2db   : > { %1121 = vst.msk [vmem:[%s378_s16] sm:$0xff] %vm1120_vm5, %v1118_v9  ;;  %v1119_v11 = vadd.f32 %v1117_v7, %v1111_v10 }
 0x2dd   : > { %1122 = vst.msk [vmem:[%s378_s16 + $0x8] sm:$0xff] %vm1120_vm5, %v1119_v11 }
 0x2de PF: > { %s19_s27 = sadd.s32 1, %s1490_s27  }
 0x2df   : > { %p16_p4 = scmp.ge.s32.totalorder %s19_s27, 4  }
 0x2e1   :  { %18 = sbr.rel (!%p16_p4) target bundleno = 1 (0x1), region = 99 }

</bundles_post_ra>
